<compile_context>
chip_gen: v5e
topology: v5e:2x2
jax: 0.10.0
libtpu: 0.0.40
codegen_flags: <defaults>
</compile_context>

<pallas_src>
import itertools
import math

import jax
import jax.numpy as jnp
import numpy as np
from jax.experimental import pallas as pl
from jax.experimental.pallas import tpu as pltpu


# ----------------------------------------------------------------------------
# Pallas kernel: the full BasicBlockBase forward, fused, channels-first.
# ----------------------------------------------------------------------------
def _basic_block_kernel(xt_ref, adjt_ref, w1t_ref, w2t_ref,
                        g1_ref, b1_ref, g2_ref, b2_ref, o_ref, p_ref):
    eps = 1e-5
    c_in, n = xt_ref.shape            # (C, N) = (32, 128)
    k_vol = w1t_ref.shape[0]          # 27
    inv_n = 1.0 / n

    xt = xt_ref[...]                  # [C, N] float32 (kept f32 for residual)

    def sparse_conv(feats_t_bf16, wt_ref):
        # Stage 1: per-offset small matmuls, written to lane-aligned static
        # slices of the [C, K*N] bf16 scratch.  No carried accumulator: each
        # body's values die at its store, so the static unroll keeps vreg
        # pressure flat while the offsets stay compile-time 128-multiples.
        for k in range(k_vol):
            pk = jnp.dot(wt_ref[k], feats_t_bf16,
                         preferred_element_type=jnp.float32)       # [C, N]
            p_ref[:, k * n:(k + 1) * n] = pk.astype(p_ref.dtype)
        # Stage 2: one deep matmul with contraction K*N = 3456 (bf16 x bf16,
        # f32 accumulation).  Output [C, N] is 128-lane dense.
        return jnp.dot(p_ref[...], adjt_ref[...],
                       preferred_element_type=jnp.float32)          # [C, N]

    def batch_norm(h, gamma, beta):
        # Training-mode BatchNorm over the point axis (lane axis here),
        # single pass: sum and sum-of-squares together.
        s = jnp.sum(h, axis=1, keepdims=True)                       # [C, 1]
        sq = jnp.sum(h * h, axis=1, keepdims=True)                  # [C, 1]
        mean = s * inv_n
        var = sq * inv_n - mean * mean
        return (h - mean) * jax.lax.rsqrt(var + eps) * gamma + beta

    h = sparse_conv(xt.astype(jnp.bfloat16), w1t_ref)               # conv1
    h = batch_norm(h, g1_ref[...], b1_ref[...])                     # norm1
    h = jnp.maximum(h, 0.0)                                         # relu

    h = sparse_conv(h.astype(jnp.bfloat16), w2t_ref)                # conv2
    h = batch_norm(h, g2_ref[...], b2_ref[...])                     # norm2

    o_ref[...] = jnp.maximum(h + xt, 0.0).astype(o_ref.dtype)       # +res, relu


@jax.jit
def basic_block_forward(feats, adj_t, w1t, w2t, g1, b1, g2, b2):
    """feats: [N, C] f32; adj_t: [K*N, N] bf16 (adj_t[k*N+m, n] = A[k, n, m]);
    w?t: [K, C_out, C_in] bf16; g?/b?: [C, 1] f32.  Returns [N, C] f32."""
    n, c_in = feats.shape
    c_out = w1t.shape[1]
    kn = adj_t.shape[0]
    k_vol = w1t.shape[0]

    xt = feats.T                                   # channels-first, outside kernel

    flops = 2 * (k_vol * 2 * c_out * c_in * n + 2 * c_out * kn * n)
    bytes_accessed = (xt.size * 4 + adj_t.size * 2 + (w1t.size + w2t.size) * 2
                      + 4 * c_out * 4 + n * c_out * 4)

    vmem = lambda: pl.BlockSpec(memory_space=pltpu.MemorySpace.VMEM)
    out_t = pl.pallas_call(
        _basic_block_kernel,
        out_shape=jax.ShapeDtypeStruct((c_out, n), feats.dtype),
        # Grid collapsed: one invocation, all operands as full-array VMEM
        # blocks (total footprint ~1.5 MB << scoped VMEM on v5e/v6e/v7x).
        in_specs=[vmem() for _ in range(8)],
        out_specs=vmem(),
        scratch_shapes=[pltpu.VMEM((c_out, kn), jnp.bfloat16)],
        cost_estimate=pl.CostEstimate(flops=flops, transcendentals=2 * c_out,
                                      bytes_accessed=bytes_accessed),
    )(xt, adj_t, w1t, w2t, g1, b1, g2, b2)
    return out_t.T                                 # back to [N, C]


# ----------------------------------------------------------------------------
# Host-side kernel-map construction (what MinkowskiEngine's coordinate manager
# does) — expressed as one adjacency matrix per kernel offset.
# ----------------------------------------------------------------------------
def build_kernel_adjacency(coords, kernel_size=3, dilation=1):
    coords = np.asarray(coords, dtype=np.int64)
    n, d = coords.shape
    r = kernel_size // 2
    offsets = np.array(list(itertools.product(*([range(-r, r + 1)] * d))),
                       dtype=np.int64) * dilation
    lut = {tuple(c): i for i, c in enumerate(coords.tolist())}
    adj = np.zeros((offsets.shape[0], n, n), dtype=np.float32)
    for k, off in enumerate(offsets):
        for i, c in enumerate(coords):
            m = lut.get(tuple((c + off).tolist()))
            if m is not None:
                adj[k, i, m] = 1.0
    return adj


def pack_adjacency_for_kernel(adj):
    """[K, N, N] f32 -> [K*N, N] bf16 with adj_t[k*N+m, n] = adj[k, n, m].
    Values are exactly 0/1, so the bf16 cast is lossless."""
    k_vol, n, _ = adj.shape
    return jnp.asarray(adj.transpose(0, 2, 1).reshape(k_vol * n, n),
                       dtype=jnp.bfloat16)


# ----------------------------------------------------------------------------
# Module mirror of BasicBlockBase.
# ----------------------------------------------------------------------------
class BasicBlockBasePallas:
    expansion = 1
    NORM_TYPE = "BN"

    def __init__(self, inplanes, planes, stride=1, dilation=1, downsample=None,
                 bn_momentum=0.1, region_type=0, D=3, *, key):
        # Demo covers the default configuration: stride=1, no downsample,
        # HYPER_CUBE region (region_type=0).  dilation is encoded in the
        # host-built kernel map.
        assert stride == 1 and downsample is None
        assert inplanes == planes, "residual add requires inplanes == planes"
        self.kernel_volume = 3 ** D
        k1, k2 = jax.random.split(key)
        s1 = 1.0 / math.sqrt(inplanes * self.kernel_volume)
        s2 = 1.0 / math.sqrt(planes * self.kernel_volume)
        # f32 master copies (used by the pure-JAX reference).
        self.w1 = s1 * jax.random.normal(
            k1, (self.kernel_volume, inplanes, planes), dtype=jnp.float32)
        self.w2 = s2 * jax.random.normal(
            k2, (self.kernel_volume, planes, planes), dtype=jnp.float32)
        # BatchNorm affine params at PyTorch defaults (weight=1, bias=0).
        self.gamma1 = jnp.ones((planes,), jnp.float32)
        self.beta1 = jnp.zeros((planes,), jnp.float32)
        self.gamma2 = jnp.ones((planes,), jnp.float32)
        self.beta2 = jnp.zeros((planes,), jnp.float32)
        # Kernel-side packed operands: transposed [K, C_out, C_in] bf16 weights
        # (channels-first matmuls), channels-first [C, 1] affine params.
        self.w1t = jnp.asarray(jnp.transpose(self.w1, (0, 2, 1)), jnp.bfloat16)
        self.w2t = jnp.asarray(jnp.transpose(self.w2, (0, 2, 1)), jnp.bfloat16)
        self.g1c = self.gamma1.reshape(-1, 1)
        self.b1c = self.beta1.reshape(-1, 1)
        self.g2c = self.gamma2.reshape(-1, 1)
        self.b2c = self.beta2.reshape(-1, 1)

    def __call__(self, feats, adj_t):
        return basic_block_forward(feats, adj_t, self.w1t, self.w2t,
                                   self.g1c, self.b1c, self.g2c, self.b2c)


# ----------------------------------------------------------------------------
# Pure-JAX f32 reference (same math, no Pallas, no bf16).
# ----------------------------------------------------------------------------
def basic_block_reference(feats, adj, w1, w2, g1, b1, g2, b2, eps=1e-5):
    def sparse_conv(f, w):
        out = jnp.zeros((f.shape[0], w.shape[-1]), jnp.float32)
        for k in range(w.shape[0]):
            out = out + adj[k] @ (f @ w[k])
        return out

    def bn(h, g, b):
        m = jnp.mean(h, axis=0, keepdims=True)
        v = jnp.mean(jnp.square(h - m), axis=0, keepdims=True)
        return (h - m) * jax.lax.rsqrt(v + eps) * g.reshape(1, -1) + b.reshape(1, -1)

    h = jnp.maximum(bn(sparse_conv(feats, w1), g1, b1), 0.0)
    h = bn(sparse_conv(h, w2), g2, b2)
    return jnp.maximum(h + feats, 0.0)


if __name__ == "__main__":
    key = jax.random.PRNGKey(0)
    k_feat, k_params = jax.random.split(key)

    # Small sparse point set: a dense 4x4x8 voxel grid -> 128 points in 3D.
    coords = np.array([(x, y, z)
                       for x in range(4) for y in range(4) for z in range(8)],
                      dtype=np.int32)
    n_points = coords.shape[0]          # 128
    inplanes = planes = 32

    adj_np = build_kernel_adjacency(coords, kernel_size=3, dilation=1)  # [27,N,N]
    adj_f32 = jnp.asarray(adj_np)                      # reference operand
    adj_packed = pack_adjacency_for_kernel(adj_np)     # kernel operand, bf16
    feats = jax.random.normal(k_feat, (n_points, inplanes), dtype=jnp.float32)

    block = BasicBlockBasePallas(inplanes, planes, key=k_params)

    out = jax.block_until_ready(block(feats, adj_packed))

    ref = jax.block_until_ready(
        basic_block_reference(feats, adj_f32, block.w1, block.w2,
                              block.gamma1, block.beta1,
                              block.gamma2, block.beta2))

    assert out.shape == ref.shape, (out.shape, ref.shape)
    assert out.dtype == ref.dtype, (out.dtype, ref.dtype)
    assert bool(jnp.all(jnp.isfinite(out))), "non-finite output"
    # Tolerance accounts for the (review-requested) bf16 matmul operands and
    # the bf16 conv-stage scratch vs. the pure-f32 reference.
    np.testing.assert_allclose(np.asarray(out), np.asarray(ref),
                               rtol=5e-2, atol=5e-2)

    print("KERNEL_OK")
</pallas_src>

<mosaic_0001>
module attributes {stable_mosaic.version = 11 : i64} {
  func.func @_basic_block_kernel(%arg0: memref<32x128xf32, #tpu.memory_space<vmem>>, %arg1: memref<3456x128xbf16, #tpu.memory_space<vmem>>, %arg2: memref<27x32x32xbf16, #tpu.memory_space<vmem>>, %arg3: memref<27x32x32xbf16, #tpu.memory_space<vmem>>, %arg4: memref<32x1xf32, #tpu.memory_space<vmem>>, %arg5: memref<32x1xf32, #tpu.memory_space<vmem>>, %arg6: memref<32x1xf32, #tpu.memory_space<vmem>>, %arg7: memref<32x1xf32, #tpu.memory_space<vmem>>, %arg8: memref<32x128xf32, #tpu.memory_space<vmem>>, %arg9: memref<32x3456xbf16, #tpu.memory_space<vmem>>) attributes {dimension_semantics = [], scalar_prefetch = 0 : i64, scratch_operands = 1 : i64, tpu.core_type = #tpu.core_type<tc>} {
    %c0 = arith.constant 0 : index
    %c0_0 = arith.constant 0 : index
    %0 = vector.load %arg0[%c0, %c0_0] : memref<32x128xf32, #tpu.memory_space<vmem>>, vector<32x128xf32>
    %1 = arith.truncf %0 : vector<32x128xf32> to vector<32x128xbf16>
    %c0_1 = arith.constant 0 : index
    %c0_2 = arith.constant 0 : index
    %c0_3 = arith.constant 0 : index
    %2 = vector.load %arg2[%c0_1, %c0_2, %c0_3] : memref<27x32x32xbf16, #tpu.memory_space<vmem>>, vector<1x32x32xbf16>
    %3 = vector.shape_cast %2 : vector<1x32x32xbf16> to vector<32x32xbf16>
    %cst = arith.constant dense<0.000000e+00> : vector<32x128xf32>
    %4 = tpu.matmul %3, %1, %cst {dimension_numbers = #tpu.dot_dimension_numbers<[1], [0], [0], [1], [0, 0, 1, 1], [], []>} : vector<32x32xbf16>, vector<32x128xbf16>, vector<32x128xf32> -> vector<32x128xf32>
    %5 = arith.truncf %4 : vector<32x128xf32> to vector<32x128xbf16>
    %c0_4 = arith.constant 0 : index
    %c0_5 = arith.constant 0 : index
    %6 = vector.load %arg9[%c0_4, %c0_5] : memref<32x3456xbf16, #tpu.memory_space<vmem>>, vector<32x128xbf16>
    tpu.vector_store %arg9[%c0_4, %c0_5], %5 {strides = array<i32>} : memref<32x3456xbf16, #tpu.memory_space<vmem>>, vector<32x128xbf16>,
    %c1 = arith.constant 1 : index
    %c0_6 = arith.constant 0 : index
    %c0_7 = arith.constant 0 : index
    %7 = vector.load %arg2[%c1, %c0_6, %c0_7] : memref<27x32x32xbf16, #tpu.memory_space<vmem>>, vector<1x32x32xbf16>
    %8 = vector.shape_cast %7 : vector<1x32x32xbf16> to vector<32x32xbf16>
    %cst_8 = arith.constant dense<0.000000e+00> : vector<32x128xf32>
    %9 = tpu.matmul %8, %1, %cst_8 {dimension_numbers = #tpu.dot_dimension_numbers<[1], [0], [0], [1], [0, 0, 1, 1], [], []>} : vector<32x32xbf16>, vector<32x128xbf16>, vector<32x128xf32> -> vector<32x128xf32>
    %10 = arith.truncf %9 : vector<32x128xf32> to vector<32x128xbf16>
    %c0_9 = arith.constant 0 : index
    %c128 = arith.constant 128 : index
    %11 = vector.load %arg9[%c0_9, %c128] : memref<32x3456xbf16, #tpu.memory_space<vmem>>, vector<32x128xbf16>
    tpu.vector_store %arg9[%c0_9, %c128], %10 {strides = array<i32>} : memref<32x3456xbf16, #tpu.memory_space<vmem>>, vector<32x128xbf16>,
    %c2 = arith.constant 2 : index
    %c0_10 = arith.constant 0 : index
    %c0_11 = arith.constant 0 : index
    %12 = vector.load %arg2[%c2, %c0_10, %c0_11] : memref<27x32x32xbf16, #tpu.memory_space<vmem>>, vector<1x32x32xbf16>
    %13 = vector.shape_cast %12 : vector<1x32x32xbf16> to vector<32x32xbf16>
    %cst_12 = arith.constant dense<0.000000e+00> : vector<32x128xf32>
    %14 = tpu.matmul %13, %1, %cst_12 {dimension_numbers = #tpu.dot_dimension_numbers<[1], [0], [0], [1], [0, 0, 1, 1], [], []>} : vector<32x32xbf16>, vector<32x128xbf16>, vector<32x128xf32> -> vector<32x128xf32>
    %15 = arith.truncf %14 : vector<32x128xf32> to vector<32x128xbf16>
    %c0_13 = arith.constant 0 : index
    %c256 = arith.constant 256 : index
    %16 = vector.load %arg9[%c0_13, %c256] : memref<32x3456xbf16, #tpu.memory_space<vmem>>, vector<32x128xbf16>
    tpu.vector_store %arg9[%c0_13, %c256], %15 {strides = array<i32>} : memref<32x3456xbf16, #tpu.memory_space<vmem>>, vector<32x128xbf16>,
    %c3 = arith.constant 3 : index
    %c0_14 = arith.constant 0 : index
    %c0_15 = arith.constant 0 : index
    %17 = vector.load %arg2[%c3, %c0_14, %c0_15] : memref<27x32x32xbf16, #tpu.memory_space<vmem>>, vector<1x32x32xbf16>
    %18 = vector.shape_cast %17 : vector<1x32x32xbf16> to vector<32x32xbf16>
    %cst_16 = arith.constant dense<0.000000e+00> : vector<32x128xf32>
    %19 = tpu.matmul %18, %1, %cst_16 {dimension_numbers = #tpu.dot_dimension_numbers<[1], [0], [0], [1], [0, 0, 1, 1], [], []>} : vector<32x32xbf16>, vector<32x128xbf16>, vector<32x128xf32> -> vector<32x128xf32>
    %20 = arith.truncf %19 : vector<32x128xf32> to vector<32x128xbf16>
    %c0_17 = arith.constant 0 : index
    %c384 = arith.constant 384 : index
    %21 = vector.load %arg9[%c0_17, %c384] : memref<32x3456xbf16, #tpu.memory_space<vmem>>, vector<32x128xbf16>
    tpu.vector_store %arg9[%c0_17, %c384], %20 {strides = array<i32>} : memref<32x3456xbf16, #tpu.memory_space<vmem>>, vector<32x128xbf16>,
    %c4 = arith.constant 4 : index
    %c0_18 = arith.constant 0 : index
    %c0_19 = arith.constant 0 : index
    %22 = vector.load %arg2[%c4, %c0_18, %c0_19] : memref<27x32x32xbf16, #tpu.memory_space<vmem>>, vector<1x32x32xbf16>
    %23 = vector.shape_cast %22 : vector<1x32x32xbf16> to vector<32x32xbf16>
    %cst_20 = arith.constant dense<0.000000e+00> : vector<32x128xf32>
    %24 = tpu.matmul %23, %1, %cst_20 {dimension_numbers = #tpu.dot_dimension_numbers<[1], [0], [0], [1], [0, 0, 1, 1], [], []>} : vector<32x32xbf16>, vector<32x128xbf16>, vector<32x128xf32> -> vector<32x128xf32>
    %25 = arith.truncf %24 : vector<32x128xf32> to vector<32x128xbf16>
    %c0_21 = arith.constant 0 : index
    %c512 = arith.constant 512 : index
    %26 = vector.load %arg9[%c0_21, %c512] : memref<32x3456xbf16, #tpu.memory_space<vmem>>, vector<32x128xbf16>
    tpu.vector_store %arg9[%c0_21, %c512], %25 {strides = array<i32>} : memref<32x3456xbf16, #tpu.memory_space<vmem>>, vector<32x128xbf16>,
    %c5 = arith.constant 5 : index
    %c0_22 = arith.constant 0 : index
    %c0_23 = arith.constant 0 : index
    %27 = vector.load %arg2[%c5, %c0_22, %c0_23] : memref<27x32x32xbf16, #tpu.memory_space<vmem>>, vector<1x32x32xbf16>
    %28 = vector.shape_cast %27 : vector<1x32x32xbf16> to vector<32x32xbf16>
    %cst_24 = arith.constant dense<0.000000e+00> : vector<32x128xf32>
    %29 = tpu.matmul %28, %1, %cst_24 {dimension_numbers = #tpu.dot_dimension_numbers<[1], [0], [0], [1], [0, 0, 1, 1], [], []>} : vector<32x32xbf16>, vector<32x128xbf16>, vector<32x128xf32> -> vector<32x128xf32>
    %30 = arith.truncf %29 : vector<32x128xf32> to vector<32x128xbf16>
    %c0_25 = arith.constant 0 : index
    %c640 = arith.constant 640 : index
    %31 = vector.load %arg9[%c0_25, %c640] : memref<32x3456xbf16, #tpu.memory_space<vmem>>, vector<32x128xbf16>
    tpu.vector_store %arg9[%c0_25, %c640], %30 {strides = array<i32>} : memref<32x3456xbf16, #tpu.memory_space<vmem>>, vector<32x128xbf16>,
    %c6 = arith.constant 6 : index
    %c0_26 = arith.constant 0 : index
    %c0_27 = arith.constant 0 : index
    %32 = vector.load %arg2[%c6, %c0_26, %c0_27] : memref<27x32x32xbf16, #tpu.memory_space<vmem>>, vector<1x32x32xbf16>
    %33 = vector.shape_cast %32 : vector<1x32x32xbf16> to vector<32x32xbf16>
    %cst_28 = arith.constant dense<0.000000e+00> : vector<32x128xf32>
    %34 = tpu.matmul %33, %1, %cst_28 {dimension_numbers = #tpu.dot_dimension_numbers<[1], [0], [0], [1], [0, 0, 1, 1], [], []>} : vector<32x32xbf16>, vector<32x128xbf16>, vector<32x128xf32> -> vector<32x128xf32>
    %35 = arith.truncf %34 : vector<32x128xf32> to vector<32x128xbf16>
    %c0_29 = arith.constant 0 : index
    %c768 = arith.constant 768 : index
    %36 = vector.load %arg9[%c0_29, %c768] : memref<32x3456xbf16, #tpu.memory_space<vmem>>, vector<32x128xbf16>
    tpu.vector_store %arg9[%c0_29, %c768], %35 {strides = array<i32>} : memref<32x3456xbf16, #tpu.memory_space<vmem>>, vector<32x128xbf16>,
    %c7 = arith.constant 7 : index
    %c0_30 = arith.constant 0 : index
    %c0_31 = arith.constant 0 : index
    %37 = vector.load %arg2[%c7, %c0_30, %c0_31] : memref<27x32x32xbf16, #tpu.memory_space<vmem>>, vector<1x32x32xbf16>
    %38 = vector.shape_cast %37 : vector<1x32x32xbf16> to vector<32x32xbf16>
    %cst_32 = arith.constant dense<0.000000e+00> : vector<32x128xf32>
    %39 = tpu.matmul %38, %1, %cst_32 {dimension_numbers = #tpu.dot_dimension_numbers<[1], [0], [0], [1], [0, 0, 1, 1], [], []>} : vector<32x32xbf16>, vector<32x128xbf16>, vector<32x128xf32> -> vector<32x128xf32>
    %40 = arith.truncf %39 : vector<32x128xf32> to vector<32x128xbf16>
    %c0_33 = arith.constant 0 : index
    %c896 = arith.constant 896 : index
    %41 = vector.load %arg9[%c0_33, %c896] : memref<32x3456xbf16, #tpu.memory_space<vmem>>, vector<32x128xbf16>
    tpu.vector_store %arg9[%c0_33, %c896], %40 {strides = array<i32>} : memref<32x3456xbf16, #tpu.memory_space<vmem>>, vector<32x128xbf16>,
    %c8 = arith.constant 8 : index
    %c0_34 = arith.constant 0 : index
    %c0_35 = arith.constant 0 : index
    %42 = vector.load %arg2[%c8, %c0_34, %c0_35] : memref<27x32x32xbf16, #tpu.memory_space<vmem>>, vector<1x32x32xbf16>
    %43 = vector.shape_cast %42 : vector<1x32x32xbf16> to vector<32x32xbf16>
    %cst_36 = arith.constant dense<0.000000e+00> : vector<32x128xf32>
    %44 = tpu.matmul %43, %1, %cst_36 {dimension_numbers = #tpu.dot_dimension_numbers<[1], [0], [0], [1], [0, 0, 1, 1], [], []>} : vector<32x32xbf16>, vector<32x128xbf16>, vector<32x128xf32> -> vector<32x128xf32>
    %45 = arith.truncf %44 : vector<32x128xf32> to vector<32x128xbf16>
    %c0_37 = arith.constant 0 : index
    %c1024 = arith.constant 1024 : index
    %46 = vector.load %arg9[%c0_37, %c1024] : memref<32x3456xbf16, #tpu.memory_space<vmem>>, vector<32x128xbf16>
    tpu.vector_store %arg9[%c0_37, %c1024], %45 {strides = array<i32>} : memref<32x3456xbf16, #tpu.memory_space<vmem>>, vector<32x128xbf16>,
    %c9 = arith.constant 9 : index
    %c0_38 = arith.constant 0 : index
    %c0_39 = arith.constant 0 : index
    %47 = vector.load %arg2[%c9, %c0_38, %c0_39] : memref<27x32x32xbf16, #tpu.memory_space<vmem>>, vector<1x32x32xbf16>
    %48 = vector.shape_cast %47 : vector<1x32x32xbf16> to vector<32x32xbf16>
    %cst_40 = arith.constant dense<0.000000e+00> : vector<32x128xf32>
    %49 = tpu.matmul %48, %1, %cst_40 {dimension_numbers = #tpu.dot_dimension_numbers<[1], [0], [0], [1], [0, 0, 1, 1], [], []>} : vector<32x32xbf16>, vector<32x128xbf16>, vector<32x128xf32> -> vector<32x128xf32>
    %50 = arith.truncf %49 : vector<32x128xf32> to vector<32x128xbf16>
    %c0_41 = arith.constant 0 : index
    %c1152 = arith.constant 1152 : index
    %51 = vector.load %arg9[%c0_41, %c1152] : memref<32x3456xbf16, #tpu.memory_space<vmem>>, vector<32x128xbf16>
    tpu.vector_store %arg9[%c0_41, %c1152], %50 {strides = array<i32>} : memref<32x3456xbf16, #tpu.memory_space<vmem>>, vector<32x128xbf16>,
    %c10 = arith.constant 10 : index
    %c0_42 = arith.constant 0 : index
    %c0_43 = arith.constant 0 : index
    %52 = vector.load %arg2[%c10, %c0_42, %c0_43] : memref<27x32x32xbf16, #tpu.memory_space<vmem>>, vector<1x32x32xbf16>
    %53 = vector.shape_cast %52 : vector<1x32x32xbf16> to vector<32x32xbf16>
    %cst_44 = arith.constant dense<0.000000e+00> : vector<32x128xf32>
    %54 = tpu.matmul %53, %1, %cst_44 {dimension_numbers = #tpu.dot_dimension_numbers<[1], [0], [0], [1], [0, 0, 1, 1], [], []>} : vector<32x32xbf16>, vector<32x128xbf16>, vector<32x128xf32> -> vector<32x128xf32>
    %55 = arith.truncf %54 : vector<32x128xf32> to vector<32x128xbf16>
    %c0_45 = arith.constant 0 : index
    %c1280 = arith.constant 1280 : index
    %56 = vector.load %arg9[%c0_45, %c1280] : memref<32x3456xbf16, #tpu.memory_space<vmem>>, vector<32x128xbf16>
    tpu.vector_store %arg9[%c0_45, %c1280], %55 {strides = array<i32>} : memref<32x3456xbf16, #tpu.memory_space<vmem>>, vector<32x128xbf16>,
    %c11 = arith.constant 11 : index
    %c0_46 = arith.constant 0 : index
    %c0_47 = arith.constant 0 : index
    %57 = vector.load %arg2[%c11, %c0_46, %c0_47] : memref<27x32x32xbf16, #tpu.memory_space<vmem>>, vector<1x32x32xbf16>
    %58 = vector.shape_cast %57 : vector<1x32x32xbf16> to vector<32x32xbf16>
    %cst_48 = arith.constant dense<0.000000e+00> : vector<32x128xf32>
    %59 = tpu.matmul %58, %1, %cst_48 {dimension_numbers = #tpu.dot_dimension_numbers<[1], [0], [0], [1], [0, 0, 1, 1], [], []>} : vector<32x32xbf16>, vector<32x128xbf16>, vector<32x128xf32> -> vector<32x128xf32>
    %60 = arith.truncf %59 : vector<32x128xf32> to vector<32x128xbf16>
    %c0_49 = arith.constant 0 : index
    %c1408 = arith.constant 1408 : index
    %61 = vector.load %arg9[%c0_49, %c1408] : memref<32x3456xbf16, #tpu.memory_space<vmem>>, vector<32x128xbf16>
    tpu.vector_store %arg9[%c0_49, %c1408], %60 {strides = array<i32>} : memref<32x3456xbf16, #tpu.memory_space<vmem>>, vector<32x128xbf16>,
    %c12 = arith.constant 12 : index
    %c0_50 = arith.constant 0 : index
    %c0_51 = arith.constant 0 : index
    %62 = vector.load %arg2[%c12, %c0_50, %c0_51] : memref<27x32x32xbf16, #tpu.memory_space<vmem>>, vector<1x32x32xbf16>
    %63 = vector.shape_cast %62 : vector<1x32x32xbf16> to vector<32x32xbf16>
    %cst_52 = arith.constant dense<0.000000e+00> : vector<32x128xf32>
    %64 = tpu.matmul %63, %1, %cst_52 {dimension_numbers = #tpu.dot_dimension_numbers<[1], [0], [0], [1], [0, 0, 1, 1], [], []>} : vector<32x32xbf16>, vector<32x128xbf16>, vector<32x128xf32> -> vector<32x128xf32>
    %65 = arith.truncf %64 : vector<32x128xf32> to vector<32x128xbf16>
    %c0_53 = arith.constant 0 : index
    %c1536 = arith.constant 1536 : index
    %66 = vector.load %arg9[%c0_53, %c1536] : memref<32x3456xbf16, #tpu.memory_space<vmem>>, vector<32x128xbf16>
    tpu.vector_store %arg9[%c0_53, %c1536], %65 {strides = array<i32>} : memref<32x3456xbf16, #tpu.memory_space<vmem>>, vector<32x128xbf16>,
    %c13 = arith.constant 13 : index
    %c0_54 = arith.constant 0 : index
    %c0_55 = arith.constant 0 : index
    %67 = vector.load %arg2[%c13, %c0_54, %c0_55] : memref<27x32x32xbf16, #tpu.memory_space<vmem>>, vector<1x32x32xbf16>
    %68 = vector.shape_cast %67 : vector<1x32x32xbf16> to vector<32x32xbf16>
    %cst_56 = arith.constant dense<0.000000e+00> : vector<32x128xf32>
    %69 = tpu.matmul %68, %1, %cst_56 {dimension_numbers = #tpu.dot_dimension_numbers<[1], [0], [0], [1], [0, 0, 1, 1], [], []>} : vector<32x32xbf16>, vector<32x128xbf16>, vector<32x128xf32> -> vector<32x128xf32>
    %70 = arith.truncf %69 : vector<32x128xf32> to vector<32x128xbf16>
    %c0_57 = arith.constant 0 : index
    %c1664 = arith.constant 1664 : index
    %71 = vector.load %arg9[%c0_57, %c1664] : memref<32x3456xbf16, #tpu.memory_space<vmem>>, vector<32x128xbf16>
    tpu.vector_store %arg9[%c0_57, %c1664], %70 {strides = array<i32>} : memref<32x3456xbf16, #tpu.memory_space<vmem>>, vector<32x128xbf16>,
    %c14 = arith.constant 14 : index
    %c0_58 = arith.constant 0 : index
    %c0_59 = arith.constant 0 : index
    %72 = vector.load %arg2[%c14, %c0_58, %c0_59] : memref<27x32x32xbf16, #tpu.memory_space<vmem>>, vector<1x32x32xbf16>
    %73 = vector.shape_cast %72 : vector<1x32x32xbf16> to vector<32x32xbf16>
    %cst_60 = arith.constant dense<0.000000e+00> : vector<32x128xf32>
    %74 = tpu.matmul %73, %1, %cst_60 {dimension_numbers = #tpu.dot_dimension_numbers<[1], [0], [0], [1], [0, 0, 1, 1], [], []>} : vector<32x32xbf16>, vector<32x128xbf16>, vector<32x128xf32> -> vector<32x128xf32>
    %75 = arith.truncf %74 : vector<32x128xf32> to vector<32x128xbf16>
    %c0_61 = arith.constant 0 : index
    %c1792 = arith.constant 1792 : index
    %76 = vector.load %arg9[%c0_61, %c1792] : memref<32x3456xbf16, #tpu.memory_space<vmem>>, vector<32x128xbf16>
    tpu.vector_store %arg9[%c0_61, %c1792], %75 {strides = array<i32>} : memref<32x3456xbf16, #tpu.memory_space<vmem>>, vector<32x128xbf16>,
    %c15 = arith.constant 15 : index
    %c0_62 = arith.constant 0 : index
    %c0_63 = arith.constant 0 : index
    %77 = vector.load %arg2[%c15, %c0_62, %c0_63] : memref<27x32x32xbf16, #tpu.memory_space<vmem>>, vector<1x32x32xbf16>
    %78 = vector.shape_cast %77 : vector<1x32x32xbf16> to vector<32x32xbf16>
    %cst_64 = arith.constant dense<0.000000e+00> : vector<32x128xf32>
    %79 = tpu.matmul %78, %1, %cst_64 {dimension_numbers = #tpu.dot_dimension_numbers<[1], [0], [0], [1], [0, 0, 1, 1], [], []>} : vector<32x32xbf16>, vector<32x128xbf16>, vector<32x128xf32> -> vector<32x128xf32>
    %80 = arith.truncf %79 : vector<32x128xf32> to vector<32x128xbf16>
    %c0_65 = arith.constant 0 : index
    %c1920 = arith.constant 1920 : index
    %81 = vector.load %arg9[%c0_65, %c1920] : memref<32x3456xbf16, #tpu.memory_space<vmem>>, vector<32x128xbf16>
    tpu.vector_store %arg9[%c0_65, %c1920], %80 {strides = array<i32>} : memref<32x3456xbf16, #tpu.memory_space<vmem>>, vector<32x128xbf16>,
    %c16 = arith.constant 16 : index
    %c0_66 = arith.constant 0 : index
    %c0_67 = arith.constant 0 : index
    %82 = vector.load %arg2[%c16, %c0_66, %c0_67] : memref<27x32x32xbf16, #tpu.memory_space<vmem>>, vector<1x32x32xbf16>
    %83 = vector.shape_cast %82 : vector<1x32x32xbf16> to vector<32x32xbf16>
    %cst_68 = arith.constant dense<0.000000e+00> : vector<32x128xf32>
    %84 = tpu.matmul %83, %1, %cst_68 {dimension_numbers = #tpu.dot_dimension_numbers<[1], [0], [0], [1], [0, 0, 1, 1], [], []>} : vector<32x32xbf16>, vector<32x128xbf16>, vector<32x128xf32> -> vector<32x128xf32>
    %85 = arith.truncf %84 : vector<32x128xf32> to vector<32x128xbf16>
    %c0_69 = arith.constant 0 : index
    %c2048 = arith.constant 2048 : index
    %86 = vector.load %arg9[%c0_69, %c2048] : memref<32x3456xbf16, #tpu.memory_space<vmem>>, vector<32x128xbf16>
    tpu.vector_store %arg9[%c0_69, %c2048], %85 {strides = array<i32>} : memref<32x3456xbf16, #tpu.memory_space<vmem>>, vector<32x128xbf16>,
    %c17 = arith.constant 17 : index
    %c0_70 = arith.constant 0 : index
    %c0_71 = arith.constant 0 : index
    %87 = vector.load %arg2[%c17, %c0_70, %c0_71] : memref<27x32x32xbf16, #tpu.memory_space<vmem>>, vector<1x32x32xbf16>
    %88 = vector.shape_cast %87 : vector<1x32x32xbf16> to vector<32x32xbf16>
    %cst_72 = arith.constant dense<0.000000e+00> : vector<32x128xf32>
    %89 = tpu.matmul %88, %1, %cst_72 {dimension_numbers = #tpu.dot_dimension_numbers<[1], [0], [0], [1], [0, 0, 1, 1], [], []>} : vector<32x32xbf16>, vector<32x128xbf16>, vector<32x128xf32> -> vector<32x128xf32>
    %90 = arith.truncf %89 : vector<32x128xf32> to vector<32x128xbf16>
    %c0_73 = arith.constant 0 : index
    %c2176 = arith.constant 2176 : index
    %91 = vector.load %arg9[%c0_73, %c2176] : memref<32x3456xbf16, #tpu.memory_space<vmem>>, vector<32x128xbf16>
    tpu.vector_store %arg9[%c0_73, %c2176], %90 {strides = array<i32>} : memref<32x3456xbf16, #tpu.memory_space<vmem>>, vector<32x128xbf16>,
    %c18 = arith.constant 18 : index
    %c0_74 = arith.constant 0 : index
    %c0_75 = arith.constant 0 : index
    %92 = vector.load %arg2[%c18, %c0_74, %c0_75] : memref<27x32x32xbf16, #tpu.memory_space<vmem>>, vector<1x32x32xbf16>
    %93 = vector.shape_cast %92 : vector<1x32x32xbf16> to vector<32x32xbf16>
    %cst_76 = arith.constant dense<0.000000e+00> : vector<32x128xf32>
    %94 = tpu.matmul %93, %1, %cst_76 {dimension_numbers = #tpu.dot_dimension_numbers<[1], [0], [0], [1], [0, 0, 1, 1], [], []>} : vector<32x32xbf16>, vector<32x128xbf16>, vector<32x128xf32> -> vector<32x128xf32>
    %95 = arith.truncf %94 : vector<32x128xf32> to vector<32x128xbf16>
    %c0_77 = arith.constant 0 : index
    %c2304 = arith.constant 2304 : index
    %96 = vector.load %arg9[%c0_77, %c2304] : memref<32x3456xbf16, #tpu.memory_space<vmem>>, vector<32x128xbf16>
    tpu.vector_store %arg9[%c0_77, %c2304], %95 {strides = array<i32>} : memref<32x3456xbf16, #tpu.memory_space<vmem>>, vector<32x128xbf16>,
    %c19 = arith.constant 19 : index
    %c0_78 = arith.constant 0 : index
    %c0_79 = arith.constant 0 : index
    %97 = vector.load %arg2[%c19, %c0_78, %c0_79] : memref<27x32x32xbf16, #tpu.memory_space<vmem>>, vector<1x32x32xbf16>
    %98 = vector.shape_cast %97 : vector<1x32x32xbf16> to vector<32x32xbf16>
    %cst_80 = arith.constant dense<0.000000e+00> : vector<32x128xf32>
    %99 = tpu.matmul %98, %1, %cst_80 {dimension_numbers = #tpu.dot_dimension_numbers<[1], [0], [0], [1], [0, 0, 1, 1], [], []>} : vector<32x32xbf16>, vector<32x128xbf16>, vector<32x128xf32> -> vector<32x128xf32>
    %100 = arith.truncf %99 : vector<32x128xf32> to vector<32x128xbf16>
    %c0_81 = arith.constant 0 : index
    %c2432 = arith.constant 2432 : index
    %101 = vector.load %arg9[%c0_81, %c2432] : memref<32x3456xbf16, #tpu.memory_space<vmem>>, vector<32x128xbf16>
    tpu.vector_store %arg9[%c0_81, %c2432], %100 {strides = array<i32>} : memref<32x3456xbf16, #tpu.memory_space<vmem>>, vector<32x128xbf16>,
    %c20 = arith.constant 20 : index
    %c0_82 = arith.constant 0 : index
    %c0_83 = arith.constant 0 : index
    %102 = vector.load %arg2[%c20, %c0_82, %c0_83] : memref<27x32x32xbf16, #tpu.memory_space<vmem>>, vector<1x32x32xbf16>
    %103 = vector.shape_cast %102 : vector<1x32x32xbf16> to vector<32x32xbf16>
    %cst_84 = arith.constant dense<0.000000e+00> : vector<32x128xf32>
    %104 = tpu.matmul %103, %1, %cst_84 {dimension_numbers = #tpu.dot_dimension_numbers<[1], [0], [0], [1], [0, 0, 1, 1], [], []>} : vector<32x32xbf16>, vector<32x128xbf16>, vector<32x128xf32> -> vector<32x128xf32>
    %105 = arith.truncf %104 : vector<32x128xf32> to vector<32x128xbf16>
    %c0_85 = arith.constant 0 : index
    %c2560 = arith.constant 2560 : index
    %106 = vector.load %arg9[%c0_85, %c2560] : memref<32x3456xbf16, #tpu.memory_space<vmem>>, vector<32x128xbf16>
    tpu.vector_store %arg9[%c0_85, %c2560], %105 {strides = array<i32>} : memref<32x3456xbf16, #tpu.memory_space<vmem>>, vector<32x128xbf16>,
    %c21 = arith.constant 21 : index
    %c0_86 = arith.constant 0 : index
    %c0_87 = arith.constant 0 : index
    %107 = vector.load %arg2[%c21, %c0_86, %c0_87] : memref<27x32x32xbf16, #tpu.memory_space<vmem>>, vector<1x32x32xbf16>
    %108 = vector.shape_cast %107 : vector<1x32x32xbf16> to vector<32x32xbf16>
    %cst_88 = arith.constant dense<0.000000e+00> : vector<32x128xf32>
    %109 = tpu.matmul %108, %1, %cst_88 {dimension_numbers = #tpu.dot_dimension_numbers<[1], [0], [0], [1], [0, 0, 1, 1], [], []>} : vector<32x32xbf16>, vector<32x128xbf16>, vector<32x128xf32> -> vector<32x128xf32>
    %110 = arith.truncf %109 : vector<32x128xf32> to vector<32x128xbf16>
    %c0_89 = arith.constant 0 : index
    %c2688 = arith.constant 2688 : index
    %111 = vector.load %arg9[%c0_89, %c2688] : memref<32x3456xbf16, #tpu.memory_space<vmem>>, vector<32x128xbf16>
    tpu.vector_store %arg9[%c0_89, %c2688], %110 {strides = array<i32>} : memref<32x3456xbf16, #tpu.memory_space<vmem>>, vector<32x128xbf16>,
    %c22 = arith.constant 22 : index
    %c0_90 = arith.constant 0 : index
    %c0_91 = arith.constant 0 : index
    %112 = vector.load %arg2[%c22, %c0_90, %c0_91] : memref<27x32x32xbf16, #tpu.memory_space<vmem>>, vector<1x32x32xbf16>
    %113 = vector.shape_cast %112 : vector<1x32x32xbf16> to vector<32x32xbf16>
    %cst_92 = arith.constant dense<0.000000e+00> : vector<32x128xf32>
    %114 = tpu.matmul %113, %1, %cst_92 {dimension_numbers = #tpu.dot_dimension_numbers<[1], [0], [0], [1], [0, 0, 1, 1], [], []>} : vector<32x32xbf16>, vector<32x128xbf16>, vector<32x128xf32> -> vector<32x128xf32>
    %115 = arith.truncf %114 : vector<32x128xf32> to vector<32x128xbf16>
    %c0_93 = arith.constant 0 : index
    %c2816 = arith.constant 2816 : index
    %116 = vector.load %arg9[%c0_93, %c2816] : memref<32x3456xbf16, #tpu.memory_space<vmem>>, vector<32x128xbf16>
    tpu.vector_store %arg9[%c0_93, %c2816], %115 {strides = array<i32>} : memref<32x3456xbf16, #tpu.memory_space<vmem>>, vector<32x128xbf16>,
    %c23 = arith.constant 23 : index
    %c0_94 = arith.constant 0 : index
    %c0_95 = arith.constant 0 : index
    %117 = vector.load %arg2[%c23, %c0_94, %c0_95] : memref<27x32x32xbf16, #tpu.memory_space<vmem>>, vector<1x32x32xbf16>
    %118 = vector.shape_cast %117 : vector<1x32x32xbf16> to vector<32x32xbf16>
    %cst_96 = arith.constant dense<0.000000e+00> : vector<32x128xf32>
    %119 = tpu.matmul %118, %1, %cst_96 {dimension_numbers = #tpu.dot_dimension_numbers<[1], [0], [0], [1], [0, 0, 1, 1], [], []>} : vector<32x32xbf16>, vector<32x128xbf16>, vector<32x128xf32> -> vector<32x128xf32>
    %120 = arith.truncf %119 : vector<32x128xf32> to vector<32x128xbf16>
    %c0_97 = arith.constant 0 : index
    %c2944 = arith.constant 2944 : index
    %121 = vector.load %arg9[%c0_97, %c2944] : memref<32x3456xbf16, #tpu.memory_space<vmem>>, vector<32x128xbf16>
    tpu.vector_store %arg9[%c0_97, %c2944], %120 {strides = array<i32>} : memref<32x3456xbf16, #tpu.memory_space<vmem>>, vector<32x128xbf16>,
    %c24 = arith.constant 24 : index
    %c0_98 = arith.constant 0 : index
    %c0_99 = arith.constant 0 : index
    %122 = vector.load %arg2[%c24, %c0_98, %c0_99] : memref<27x32x32xbf16, #tpu.memory_space<vmem>>, vector<1x32x32xbf16>
    %123 = vector.shape_cast %122 : vector<1x32x32xbf16> to vector<32x32xbf16>
    %cst_100 = arith.constant dense<0.000000e+00> : vector<32x128xf32>
    %124 = tpu.matmul %123, %1, %cst_100 {dimension_numbers = #tpu.dot_dimension_numbers<[1], [0], [0], [1], [0, 0, 1, 1], [], []>} : vector<32x32xbf16>, vector<32x128xbf16>, vector<32x128xf32> -> vector<32x128xf32>
    %125 = arith.truncf %124 : vector<32x128xf32> to vector<32x128xbf16>
    %c0_101 = arith.constant 0 : index
    %c3072 = arith.constant 3072 : index
    %126 = vector.load %arg9[%c0_101, %c3072] : memref<32x3456xbf16, #tpu.memory_space<vmem>>, vector<32x128xbf16>
    tpu.vector_store %arg9[%c0_101, %c3072], %125 {strides = array<i32>} : memref<32x3456xbf16, #tpu.memory_space<vmem>>, vector<32x128xbf16>,
    %c25 = arith.constant 25 : index
    %c0_102 = arith.constant 0 : index
    %c0_103 = arith.constant 0 : index
    %127 = vector.load %arg2[%c25, %c0_102, %c0_103] : memref<27x32x32xbf16, #tpu.memory_space<vmem>>, vector<1x32x32xbf16>
    %128 = vector.shape_cast %127 : vector<1x32x32xbf16> to vector<32x32xbf16>
    %cst_104 = arith.constant dense<0.000000e+00> : vector<32x128xf32>
    %129 = tpu.matmul %128, %1, %cst_104 {dimension_numbers = #tpu.dot_dimension_numbers<[1], [0], [0], [1], [0, 0, 1, 1], [], []>} : vector<32x32xbf16>, vector<32x128xbf16>, vector<32x128xf32> -> vector<32x128xf32>
    %130 = arith.truncf %129 : vector<32x128xf32> to vector<32x128xbf16>
    %c0_105 = arith.constant 0 : index
    %c3200 = arith.constant 3200 : index
    %131 = vector.load %arg9[%c0_105, %c3200] : memref<32x3456xbf16, #tpu.memory_space<vmem>>, vector<32x128xbf16>
    tpu.vector_store %arg9[%c0_105, %c3200], %130 {strides = array<i32>} : memref<32x3456xbf16, #tpu.memory_space<vmem>>, vector<32x128xbf16>,
    %c26 = arith.constant 26 : index
    %c0_106 = arith.constant 0 : index
    %c0_107 = arith.constant 0 : index
    %132 = vector.load %arg2[%c26, %c0_106, %c0_107] : memref<27x32x32xbf16, #tpu.memory_space<vmem>>, vector<1x32x32xbf16>
    %133 = vector.shape_cast %132 : vector<1x32x32xbf16> to vector<32x32xbf16>
    %cst_108 = arith.constant dense<0.000000e+00> : vector<32x128xf32>
    %134 = tpu.matmul %133, %1, %cst_108 {dimension_numbers = #tpu.dot_dimension_numbers<[1], [0], [0], [1], [0, 0, 1, 1], [], []>} : vector<32x32xbf16>, vector<32x128xbf16>, vector<32x128xf32> -> vector<32x128xf32>
    %135 = arith.truncf %134 : vector<32x128xf32> to vector<32x128xbf16>
    %c0_109 = arith.constant 0 : index
    %c3328 = arith.constant 3328 : index
    %136 = vector.load %arg9[%c0_109, %c3328] : memref<32x3456xbf16, #tpu.memory_space<vmem>>, vector<32x128xbf16>
    tpu.vector_store %arg9[%c0_109, %c3328], %135 {strides = array<i32>} : memref<32x3456xbf16, #tpu.memory_space<vmem>>, vector<32x128xbf16>,
    %c0_110 = arith.constant 0 : index
    %c0_111 = arith.constant 0 : index
    %137 = vector.load %arg9[%c0_110, %c0_111] : memref<32x3456xbf16, #tpu.memory_space<vmem>>, vector<32x3456xbf16>
    %c0_112 = arith.constant 0 : index
    %c0_113 = arith.constant 0 : index
    %138 = vector.load %arg1[%c0_112, %c0_113] : memref<3456x128xbf16, #tpu.memory_space<vmem>>, vector<3456x128xbf16>
    %cst_114 = arith.constant dense<0.000000e+00> : vector<32x128xf32>
    %139 = tpu.matmul %137, %138, %cst_114 {dimension_numbers = #tpu.dot_dimension_numbers<[1], [0], [0], [1], [0, 0, 1, 1], [], []>} : vector<32x3456xbf16>, vector<3456x128xbf16>, vector<32x128xf32> -> vector<32x128xf32>
    %c0_115 = arith.constant 0 : index
    %c0_116 = arith.constant 0 : index
    %140 = vector.load %arg4[%c0_115, %c0_116] : memref<32x1xf32, #tpu.memory_space<vmem>>, vector<32x1xf32>
    %c0_117 = arith.constant 0 : index
    %c0_118 = arith.constant 0 : index
    %141 = vector.load %arg5[%c0_117, %c0_118] : memref<32x1xf32, #tpu.memory_space<vmem>>, vector<32x1xf32>
    %cst_119 = arith.constant dense<0.000000e+00> : vector<32xf32>
    %142 = vector.multi_reduction <add>, %139, %cst_119 [1] : vector<32x128xf32> to vector<32xf32>
    %143 = vector.shape_cast %142 : vector<32xf32> to vector<32x1xf32>
    %144 = arith.mulf %139, %139 : vector<32x128xf32>
    %cst_120 = arith.constant dense<0.000000e+00> : vector<32xf32>
    %145 = vector.multi_reduction <add>, %144, %cst_120 [1] : vector<32x128xf32> to vector<32xf32>
    %146 = vector.shape_cast %145 : vector<32xf32> to vector<32x1xf32>
    %cst_121 = arith.constant 7.812500e-03 : f32
    %147 = vector.broadcast %cst_121 : f32 to vector<32x1xf32>
    %148 = arith.mulf %143, %147 : vector<32x1xf32>
    %cst_122 = arith.constant 7.812500e-03 : f32
    %149 = vector.broadcast %cst_122 : f32 to vector<32x1xf32>
    %150 = arith.mulf %146, %149 : vector<32x1xf32>
    %151 = arith.mulf %148, %148 : vector<32x1xf32>
    %152 = arith.subf %150, %151 : vector<32x1xf32>
    %153 = vector.broadcast %148 : vector<32x1xf32> to vector<32x128xf32>
    %154 = arith.subf %139, %153 : vector<32x128xf32>
    %cst_123 = arith.constant 9.99999974E-6 : f32
    %155 = vector.broadcast %cst_123 : f32 to vector<32x1xf32>
    %156 = arith.addf %152, %155 : vector<32x1xf32>
    %157 = math.rsqrt %156 : vector<32x1xf32>
    %158 = vector.broadcast %157 : vector<32x1xf32> to vector<32x128xf32>
    %159 = arith.mulf %154, %158 : vector<32x128xf32>
    %160 = vector.broadcast %140 : vector<32x1xf32> to vector<32x128xf32>
    %161 = arith.mulf %159, %160 : vector<32x128xf32>
    %162 = vector.broadcast %141 : vector<32x1xf32> to vector<32x128xf32>
    %163 = arith.addf %161, %162 : vector<32x128xf32>
    %cst_124 = arith.constant 0.000000e+00 : f32
    %164 = vector.broadcast %cst_124 : f32 to vector<32x128xf32>
    %165 = arith.maximumf %163, %164 : vector<32x128xf32>
    %166 = arith.truncf %165 : vector<32x128xf32> to vector<32x128xbf16>
    %c0_125 = arith.constant 0 : index
    %c0_126 = arith.constant 0 : index
    %c0_127 = arith.constant 0 : index
    %167 = vector.load %arg3[%c0_125, %c0_126, %c0_127] : memref<27x32x32xbf16, #tpu.memory_space<vmem>>, vector<1x32x32xbf16>
    %168 = vector.shape_cast %167 : vector<1x32x32xbf16> to vector<32x32xbf16>
    %cst_128 = arith.constant dense<0.000000e+00> : vector<32x128xf32>
    %169 = tpu.matmul %168, %166, %cst_128 {dimension_numbers = #tpu.dot_dimension_numbers<[1], [0], [0], [1], [0, 0, 1, 1], [], []>} : vector<32x32xbf16>, vector<32x128xbf16>, vector<32x128xf32> -> vector<32x128xf32>
    %170 = arith.truncf %169 : vector<32x128xf32> to vector<32x128xbf16>
    %c0_129 = arith.constant 0 : index
    %c0_130 = arith.constant 0 : index
    %171 = vector.load %arg9[%c0_129, %c0_130] : memref<32x3456xbf16, #tpu.memory_space<vmem>>, vector<32x128xbf16>
    tpu.vector_store %arg9[%c0_129, %c0_130], %170 {strides = array<i32>} : memref<32x3456xbf16, #tpu.memory_space<vmem>>, vector<32x128xbf16>,
    %c1_131 = arith.constant 1 : index
    %c0_132 = arith.constant 0 : index
    %c0_133 = arith.constant 0 : index
    %172 = vector.load %arg3[%c1_131, %c0_132, %c0_133] : memref<27x32x32xbf16, #tpu.memory_space<vmem>>, vector<1x32x32xbf16>
    %173 = vector.shape_cast %172 : vector<1x32x32xbf16> to vector<32x32xbf16>
    %cst_134 = arith.constant dense<0.000000e+00> : vector<32x128xf32>
    %174 = tpu.matmul %173, %166, %cst_134 {dimension_numbers = #tpu.dot_dimension_numbers<[1], [0], [0], [1], [0, 0, 1, 1], [], []>} : vector<32x32xbf16>, vector<32x128xbf16>, vector<32x128xf32> -> vector<32x128xf32>
    %175 = arith.truncf %174 : vector<32x128xf32> to vector<32x128xbf16>
    %c0_135 = arith.constant 0 : index
    %c128_136 = arith.constant 128 : index
    %176 = vector.load %arg9[%c0_135, %c128_136] : memref<32x3456xbf16, #tpu.memory_space<vmem>>, vector<32x128xbf16>
    tpu.vector_store %arg9[%c0_135, %c128_136], %175 {strides = array<i32>} : memref<32x3456xbf16, #tpu.memory_space<vmem>>, vector<32x128xbf16>,
    %c2_137 = arith.constant 2 : index
    %c0_138 = arith.constant 0 : index
    %c0_139 = arith.constant 0 : index
    %177 = vector.load %arg3[%c2_137, %c0_138, %c0_139] : memref<27x32x32xbf16, #tpu.memory_space<vmem>>, vector<1x32x32xbf16>
    %178 = vector.shape_cast %177 : vector<1x32x32xbf16> to vector<32x32xbf16>
    %cst_140 = arith.constant dense<0.000000e+00> : vector<32x128xf32>
    %179 = tpu.matmul %178, %166, %cst_140 {dimension_numbers = #tpu.dot_dimension_numbers<[1], [0], [0], [1], [0, 0, 1, 1], [], []>} : vector<32x32xbf16>, vector<32x128xbf16>, vector<32x128xf32> -> vector<32x128xf32>
    %180 = arith.truncf %179 : vector<32x128xf32> to vector<32x128xbf16>
    %c0_141 = arith.constant 0 : index
    %c256_142 = arith.constant 256 : index
    %181 = vector.load %arg9[%c0_141, %c256_142] : memref<32x3456xbf16, #tpu.memory_space<vmem>>, vector<32x128xbf16>
    tpu.vector_store %arg9[%c0_141, %c256_142], %180 {strides = array<i32>} : memref<32x3456xbf16, #tpu.memory_space<vmem>>, vector<32x128xbf16>,
    %c3_143 = arith.constant 3 : index
    %c0_144 = arith.constant 0 : index
    %c0_145 = arith.constant 0 : index
    %182 = vector.load %arg3[%c3_143, %c0_144, %c0_145] : memref<27x32x32xbf16, #tpu.memory_space<vmem>>, vector<1x32x32xbf16>
    %183 = vector.shape_cast %182 : vector<1x32x32xbf16> to vector<32x32xbf16>
    %cst_146 = arith.constant dense<0.000000e+00> : vector<32x128xf32>
    %184 = tpu.matmul %183, %166, %cst_146 {dimension_numbers = #tpu.dot_dimension_numbers<[1], [0], [0], [1], [0, 0, 1, 1], [], []>} : vector<32x32xbf16>, vector<32x128xbf16>, vector<32x128xf32> -> vector<32x128xf32>
    %185 = arith.truncf %184 : vector<32x128xf32> to vector<32x128xbf16>
    %c0_147 = arith.constant 0 : index
    %c384_148 = arith.constant 384 : index
    %186 = vector.load %arg9[%c0_147, %c384_148] : memref<32x3456xbf16, #tpu.memory_space<vmem>>, vector<32x128xbf16>
    tpu.vector_store %arg9[%c0_147, %c384_148], %185 {strides = array<i32>} : memref<32x3456xbf16, #tpu.memory_space<vmem>>, vector<32x128xbf16>,
    %c4_149 = arith.constant 4 : index
    %c0_150 = arith.constant 0 : index
    %c0_151 = arith.constant 0 : index
    %187 = vector.load %arg3[%c4_149, %c0_150, %c0_151] : memref<27x32x32xbf16, #tpu.memory_space<vmem>>, vector<1x32x32xbf16>
    %188 = vector.shape_cast %187 : vector<1x32x32xbf16> to vector<32x32xbf16>
    %cst_152 = arith.constant dense<0.000000e+00> : vector<32x128xf32>
    %189 = tpu.matmul %188, %166, %cst_152 {dimension_numbers = #tpu.dot_dimension_numbers<[1], [0], [0], [1], [0, 0, 1, 1], [], []>} : vector<32x32xbf16>, vector<32x128xbf16>, vector<32x128xf32> -> vector<32x128xf32>
    %190 = arith.truncf %189 : vector<32x128xf32> to vector<32x128xbf16>
    %c0_153 = arith.constant 0 : index
    %c512_154 = arith.constant 512 : index
    %191 = vector.load %arg9[%c0_153, %c512_154] : memref<32x3456xbf16, #tpu.memory_space<vmem>>, vector<32x128xbf16>
    tpu.vector_store %arg9[%c0_153, %c512_154], %190 {strides = array<i32>} : memref<32x3456xbf16, #tpu.memory_space<vmem>>, vector<32x128xbf16>,
    %c5_155 = arith.constant 5 : index
    %c0_156 = arith.constant 0 : index
    %c0_157 = arith.constant 0 : index
    %192 = vector.load %arg3[%c5_155, %c0_156, %c0_157] : memref<27x32x32xbf16, #tpu.memory_space<vmem>>, vector<1x32x32xbf16>
    %193 = vector.shape_cast %192 : vector<1x32x32xbf16> to vector<32x32xbf16>
    %cst_158 = arith.constant dense<0.000000e+00> : vector<32x128xf32>
    %194 = tpu.matmul %193, %166, %cst_158 {dimension_numbers = #tpu.dot_dimension_numbers<[1], [0], [0], [1], [0, 0, 1, 1], [], []>} : vector<32x32xbf16>, vector<32x128xbf16>, vector<32x128xf32> -> vector<32x128xf32>
    %195 = arith.truncf %194 : vector<32x128xf32> to vector<32x128xbf16>
    %c0_159 = arith.constant 0 : index
    %c640_160 = arith.constant 640 : index
    %196 = vector.load %arg9[%c0_159, %c640_160] : memref<32x3456xbf16, #tpu.memory_space<vmem>>, vector<32x128xbf16>
    tpu.vector_store %arg9[%c0_159, %c640_160], %195 {strides = array<i32>} : memref<32x3456xbf16, #tpu.memory_space<vmem>>, vector<32x128xbf16>,
    %c6_161 = arith.constant 6 : index
    %c0_162 = arith.constant 0 : index
    %c0_163 = arith.constant 0 : index
    %197 = vector.load %arg3[%c6_161, %c0_162, %c0_163] : memref<27x32x32xbf16, #tpu.memory_space<vmem>>, vector<1x32x32xbf16>
    %198 = vector.shape_cast %197 : vector<1x32x32xbf16> to vector<32x32xbf16>
    %cst_164 = arith.constant dense<0.000000e+00> : vector<32x128xf32>
    %199 = tpu.matmul %198, %166, %cst_164 {dimension_numbers = #tpu.dot_dimension_numbers<[1], [0], [0], [1], [0, 0, 1, 1], [], []>} : vector<32x32xbf16>, vector<32x128xbf16>, vector<32x128xf32> -> vector<32x128xf32>
    %200 = arith.truncf %199 : vector<32x128xf32> to vector<32x128xbf16>
    %c0_165 = arith.constant 0 : index
    %c768_166 = arith.constant 768 : index
    %201 = vector.load %arg9[%c0_165, %c768_166] : memref<32x3456xbf16, #tpu.memory_space<vmem>>, vector<32x128xbf16>
    tpu.vector_store %arg9[%c0_165, %c768_166], %200 {strides = array<i32>} : memref<32x3456xbf16, #tpu.memory_space<vmem>>, vector<32x128xbf16>,
    %c7_167 = arith.constant 7 : index
    %c0_168 = arith.constant 0 : index
    %c0_169 = arith.constant 0 : index
    %202 = vector.load %arg3[%c7_167, %c0_168, %c0_169] : memref<27x32x32xbf16, #tpu.memory_space<vmem>>, vector<1x32x32xbf16>
    %203 = vector.shape_cast %202 : vector<1x32x32xbf16> to vector<32x32xbf16>
    %cst_170 = arith.constant dense<0.000000e+00> : vector<32x128xf32>
    %204 = tpu.matmul %203, %166, %cst_170 {dimension_numbers = #tpu.dot_dimension_numbers<[1], [0], [0], [1], [0, 0, 1, 1], [], []>} : vector<32x32xbf16>, vector<32x128xbf16>, vector<32x128xf32> -> vector<32x128xf32>
    %205 = arith.truncf %204 : vector<32x128xf32> to vector<32x128xbf16>
    %c0_171 = arith.constant 0 : index
    %c896_172 = arith.constant 896 : index
    %206 = vector.load %arg9[%c0_171, %c896_172] : memref<32x3456xbf16, #tpu.memory_space<vmem>>, vector<32x128xbf16>
    tpu.vector_store %arg9[%c0_171, %c896_172], %205 {strides = array<i32>} : memref<32x3456xbf16, #tpu.memory_space<vmem>>, vector<32x128xbf16>,
    %c8_173 = arith.constant 8 : index
    %c0_174 = arith.constant 0 : index
    %c0_175 = arith.constant 0 : index
    %207 = vector.load %arg3[%c8_173, %c0_174, %c0_175] : memref<27x32x32xbf16, #tpu.memory_space<vmem>>, vector<1x32x32xbf16>
    %208 = vector.shape_cast %207 : vector<1x32x32xbf16> to vector<32x32xbf16>
    %cst_176 = arith.constant dense<0.000000e+00> : vector<32x128xf32>
    %209 = tpu.matmul %208, %166, %cst_176 {dimension_numbers = #tpu.dot_dimension_numbers<[1], [0], [0], [1], [0, 0, 1, 1], [], []>} : vector<32x32xbf16>, vector<32x128xbf16>, vector<32x128xf32> -> vector<32x128xf32>
    %210 = arith.truncf %209 : vector<32x128xf32> to vector<32x128xbf16>
    %c0_177 = arith.constant 0 : index
    %c1024_178 = arith.constant 1024 : index
    %211 = vector.load %arg9[%c0_177, %c1024_178] : memref<32x3456xbf16, #tpu.memory_space<vmem>>, vector<32x128xbf16>
    tpu.vector_store %arg9[%c0_177, %c1024_178], %210 {strides = array<i32>} : memref<32x3456xbf16, #tpu.memory_space<vmem>>, vector<32x128xbf16>,
    %c9_179 = arith.constant 9 : index
    %c0_180 = arith.constant 0 : index
    %c0_181 = arith.constant 0 : index
    %212 = vector.load %arg3[%c9_179, %c0_180, %c0_181] : memref<27x32x32xbf16, #tpu.memory_space<vmem>>, vector<1x32x32xbf16>
    %213 = vector.shape_cast %212 : vector<1x32x32xbf16> to vector<32x32xbf16>
    %cst_182 = arith.constant dense<0.000000e+00> : vector<32x128xf32>
    %214 = tpu.matmul %213, %166, %cst_182 {dimension_numbers = #tpu.dot_dimension_numbers<[1], [0], [0], [1], [0, 0, 1, 1], [], []>} : vector<32x32xbf16>, vector<32x128xbf16>, vector<32x128xf32> -> vector<32x128xf32>
    %215 = arith.truncf %214 : vector<32x128xf32> to vector<32x128xbf16>
    %c0_183 = arith.constant 0 : index
    %c1152_184 = arith.constant 1152 : index
    %216 = vector.load %arg9[%c0_183, %c1152_184] : memref<32x3456xbf16, #tpu.memory_space<vmem>>, vector<32x128xbf16>
    tpu.vector_store %arg9[%c0_183, %c1152_184], %215 {strides = array<i32>} : memref<32x3456xbf16, #tpu.memory_space<vmem>>, vector<32x128xbf16>,
    %c10_185 = arith.constant 10 : index
    %c0_186 = arith.constant 0 : index
    %c0_187 = arith.constant 0 : index
    %217 = vector.load %arg3[%c10_185, %c0_186, %c0_187] : memref<27x32x32xbf16, #tpu.memory_space<vmem>>, vector<1x32x32xbf16>
    %218 = vector.shape_cast %217 : vector<1x32x32xbf16> to vector<32x32xbf16>
    %cst_188 = arith.constant dense<0.000000e+00> : vector<32x128xf32>
    %219 = tpu.matmul %218, %166, %cst_188 {dimension_numbers = #tpu.dot_dimension_numbers<[1], [0], [0], [1], [0, 0, 1, 1], [], []>} : vector<32x32xbf16>, vector<32x128xbf16>, vector<32x128xf32> -> vector<32x128xf32>
    %220 = arith.truncf %219 : vector<32x128xf32> to vector<32x128xbf16>
    %c0_189 = arith.constant 0 : index
    %c1280_190 = arith.constant 1280 : index
    %221 = vector.load %arg9[%c0_189, %c1280_190] : memref<32x3456xbf16, #tpu.memory_space<vmem>>, vector<32x128xbf16>
    tpu.vector_store %arg9[%c0_189, %c1280_190], %220 {strides = array<i32>} : memref<32x3456xbf16, #tpu.memory_space<vmem>>, vector<32x128xbf16>,
    %c11_191 = arith.constant 11 : index
    %c0_192 = arith.constant 0 : index
    %c0_193 = arith.constant 0 : index
    %222 = vector.load %arg3[%c11_191, %c0_192, %c0_193] : memref<27x32x32xbf16, #tpu.memory_space<vmem>>, vector<1x32x32xbf16>
    %223 = vector.shape_cast %222 : vector<1x32x32xbf16> to vector<32x32xbf16>
    %cst_194 = arith.constant dense<0.000000e+00> : vector<32x128xf32>
    %224 = tpu.matmul %223, %166, %cst_194 {dimension_numbers = #tpu.dot_dimension_numbers<[1], [0], [0], [1], [0, 0, 1, 1], [], []>} : vector<32x32xbf16>, vector<32x128xbf16>, vector<32x128xf32> -> vector<32x128xf32>
    %225 = arith.truncf %224 : vector<32x128xf32> to vector<32x128xbf16>
    %c0_195 = arith.constant 0 : index
    %c1408_196 = arith.constant 1408 : index
    %226 = vector.load %arg9[%c0_195, %c1408_196] : memref<32x3456xbf16, #tpu.memory_space<vmem>>, vector<32x128xbf16>
    tpu.vector_store %arg9[%c0_195, %c1408_196], %225 {strides = array<i32>} : memref<32x3456xbf16, #tpu.memory_space<vmem>>, vector<32x128xbf16>,
    %c12_197 = arith.constant 12 : index
    %c0_198 = arith.constant 0 : index
    %c0_199 = arith.constant 0 : index
    %227 = vector.load %arg3[%c12_197, %c0_198, %c0_199] : memref<27x32x32xbf16, #tpu.memory_space<vmem>>, vector<1x32x32xbf16>
    %228 = vector.shape_cast %227 : vector<1x32x32xbf16> to vector<32x32xbf16>
    %cst_200 = arith.constant dense<0.000000e+00> : vector<32x128xf32>
    %229 = tpu.matmul %228, %166, %cst_200 {dimension_numbers = #tpu.dot_dimension_numbers<[1], [0], [0], [1], [0, 0, 1, 1], [], []>} : vector<32x32xbf16>, vector<32x128xbf16>, vector<32x128xf32> -> vector<32x128xf32>
    %230 = arith.truncf %229 : vector<32x128xf32> to vector<32x128xbf16>
    %c0_201 = arith.constant 0 : index
    %c1536_202 = arith.constant 1536 : index
    %231 = vector.load %arg9[%c0_201, %c1536_202] : memref<32x3456xbf16, #tpu.memory_space<vmem>>, vector<32x128xbf16>
    tpu.vector_store %arg9[%c0_201, %c1536_202], %230 {strides = array<i32>} : memref<32x3456xbf16, #tpu.memory_space<vmem>>, vector<32x128xbf16>,
    %c13_203 = arith.constant 13 : index
    %c0_204 = arith.constant 0 : index
    %c0_205 = arith.constant 0 : index
    %232 = vector.load %arg3[%c13_203, %c0_204, %c0_205] : memref<27x32x32xbf16, #tpu.memory_space<vmem>>, vector<1x32x32xbf16>
    %233 = vector.shape_cast %232 : vector<1x32x32xbf16> to vector<32x32xbf16>
    %cst_206 = arith.constant dense<0.000000e+00> : vector<32x128xf32>
    %234 = tpu.matmul %233, %166, %cst_206 {dimension_numbers = #tpu.dot_dimension_numbers<[1], [0], [0], [1], [0, 0, 1, 1], [], []>} : vector<32x32xbf16>, vector<32x128xbf16>, vector<32x128xf32> -> vector<32x128xf32>
    %235 = arith.truncf %234 : vector<32x128xf32> to vector<32x128xbf16>
    %c0_207 = arith.constant 0 : index
    %c1664_208 = arith.constant 1664 : index
    %236 = vector.load %arg9[%c0_207, %c1664_208] : memref<32x3456xbf16, #tpu.memory_space<vmem>>, vector<32x128xbf16>
    tpu.vector_store %arg9[%c0_207, %c1664_208], %235 {strides = array<i32>} : memref<32x3456xbf16, #tpu.memory_space<vmem>>, vector<32x128xbf16>,
    %c14_209 = arith.constant 14 : index
    %c0_210 = arith.constant 0 : index
    %c0_211 = arith.constant 0 : index
    %237 = vector.load %arg3[%c14_209, %c0_210, %c0_211] : memref<27x32x32xbf16, #tpu.memory_space<vmem>>, vector<1x32x32xbf16>
    %238 = vector.shape_cast %237 : vector<1x32x32xbf16> to vector<32x32xbf16>
    %cst_212 = arith.constant dense<0.000000e+00> : vector<32x128xf32>
    %239 = tpu.matmul %238, %166, %cst_212 {dimension_numbers = #tpu.dot_dimension_numbers<[1], [0], [0], [1], [0, 0, 1, 1], [], []>} : vector<32x32xbf16>, vector<32x128xbf16>, vector<32x128xf32> -> vector<32x128xf32>
    %240 = arith.truncf %239 : vector<32x128xf32> to vector<32x128xbf16>
    %c0_213 = arith.constant 0 : index
    %c1792_214 = arith.constant 1792 : index
    %241 = vector.load %arg9[%c0_213, %c1792_214] : memref<32x3456xbf16, #tpu.memory_space<vmem>>, vector<32x128xbf16>
    tpu.vector_store %arg9[%c0_213, %c1792_214], %240 {strides = array<i32>} : memref<32x3456xbf16, #tpu.memory_space<vmem>>, vector<32x128xbf16>,
    %c15_215 = arith.constant 15 : index
    %c0_216 = arith.constant 0 : index
    %c0_217 = arith.constant 0 : index
    %242 = vector.load %arg3[%c15_215, %c0_216, %c0_217] : memref<27x32x32xbf16, #tpu.memory_space<vmem>>, vector<1x32x32xbf16>
    %243 = vector.shape_cast %242 : vector<1x32x32xbf16> to vector<32x32xbf16>
    %cst_218 = arith.constant dense<0.000000e+00> : vector<32x128xf32>
    %244 = tpu.matmul %243, %166, %cst_218 {dimension_numbers = #tpu.dot_dimension_numbers<[1], [0], [0], [1], [0, 0, 1, 1], [], []>} : vector<32x32xbf16>, vector<32x128xbf16>, vector<32x128xf32> -> vector<32x128xf32>
    %245 = arith.truncf %244 : vector<32x128xf32> to vector<32x128xbf16>
    %c0_219 = arith.constant 0 : index
    %c1920_220 = arith.constant 1920 : index
    %246 = vector.load %arg9[%c0_219, %c1920_220] : memref<32x3456xbf16, #tpu.memory_space<vmem>>, vector<32x128xbf16>
    tpu.vector_store %arg9[%c0_219, %c1920_220], %245 {strides = array<i32>} : memref<32x3456xbf16, #tpu.memory_space<vmem>>, vector<32x128xbf16>,
    %c16_221 = arith.constant 16 : index
    %c0_222 = arith.constant 0 : index
    %c0_223 = arith.constant 0 : index
    %247 = vector.load %arg3[%c16_221, %c0_222, %c0_223] : memref<27x32x32xbf16, #tpu.memory_space<vmem>>, vector<1x32x32xbf16>
    %248 = vector.shape_cast %247 : vector<1x32x32xbf16> to vector<32x32xbf16>
    %cst_224 = arith.constant dense<0.000000e+00> : vector<32x128xf32>
    %249 = tpu.matmul %248, %166, %cst_224 {dimension_numbers = #tpu.dot_dimension_numbers<[1], [0], [0], [1], [0, 0, 1, 1], [], []>} : vector<32x32xbf16>, vector<32x128xbf16>, vector<32x128xf32> -> vector<32x128xf32>
    %250 = arith.truncf %249 : vector<32x128xf32> to vector<32x128xbf16>
    %c0_225 = arith.constant 0 : index
    %c2048_226 = arith.constant 2048 : index
    %251 = vector.load %arg9[%c0_225, %c2048_226] : memref<32x3456xbf16, #tpu.memory_space<vmem>>, vector<32x128xbf16>
    tpu.vector_store %arg9[%c0_225, %c2048_226], %250 {strides = array<i32>} : memref<32x3456xbf16, #tpu.memory_space<vmem>>, vector<32x128xbf16>,
    %c17_227 = arith.constant 17 : index
    %c0_228 = arith.constant 0 : index
    %c0_229 = arith.constant 0 : index
    %252 = vector.load %arg3[%c17_227, %c0_228, %c0_229] : memref<27x32x32xbf16, #tpu.memory_space<vmem>>, vector<1x32x32xbf16>
    %253 = vector.shape_cast %252 : vector<1x32x32xbf16> to vector<32x32xbf16>
    %cst_230 = arith.constant dense<0.000000e+00> : vector<32x128xf32>
    %254 = tpu.matmul %253, %166, %cst_230 {dimension_numbers = #tpu.dot_dimension_numbers<[1], [0], [0], [1], [0, 0, 1, 1], [], []>} : vector<32x32xbf16>, vector<32x128xbf16>, vector<32x128xf32> -> vector<32x128xf32>
    %255 = arith.truncf %254 : vector<32x128xf32> to vector<32x128xbf16>
    %c0_231 = arith.constant 0 : index
    %c2176_232 = arith.constant 2176 : index
    %256 = vector.load %arg9[%c0_231, %c2176_232] : memref<32x3456xbf16, #tpu.memory_space<vmem>>, vector<32x128xbf16>
    tpu.vector_store %arg9[%c0_231, %c2176_232], %255 {strides = array<i32>} : memref<32x3456xbf16, #tpu.memory_space<vmem>>, vector<32x128xbf16>,
    %c18_233 = arith.constant 18 : index
    %c0_234 = arith.constant 0 : index
    %c0_235 = arith.constant 0 : index
    %257 = vector.load %arg3[%c18_233, %c0_234, %c0_235] : memref<27x32x32xbf16, #tpu.memory_space<vmem>>, vector<1x32x32xbf16>
    %258 = vector.shape_cast %257 : vector<1x32x32xbf16> to vector<32x32xbf16>
    %cst_236 = arith.constant dense<0.000000e+00> : vector<32x128xf32>
    %259 = tpu.matmul %258, %166, %cst_236 {dimension_numbers = #tpu.dot_dimension_numbers<[1], [0], [0], [1], [0, 0, 1, 1], [], []>} : vector<32x32xbf16>, vector<32x128xbf16>, vector<32x128xf32> -> vector<32x128xf32>
    %260 = arith.truncf %259 : vector<32x128xf32> to vector<32x128xbf16>
    %c0_237 = arith.constant 0 : index
    %c2304_238 = arith.constant 2304 : index
    %261 = vector.load %arg9[%c0_237, %c2304_238] : memref<32x3456xbf16, #tpu.memory_space<vmem>>, vector<32x128xbf16>
    tpu.vector_store %arg9[%c0_237, %c2304_238], %260 {strides = array<i32>} : memref<32x3456xbf16, #tpu.memory_space<vmem>>, vector<32x128xbf16>,
    %c19_239 = arith.constant 19 : index
    %c0_240 = arith.constant 0 : index
    %c0_241 = arith.constant 0 : index
    %262 = vector.load %arg3[%c19_239, %c0_240, %c0_241] : memref<27x32x32xbf16, #tpu.memory_space<vmem>>, vector<1x32x32xbf16>
    %263 = vector.shape_cast %262 : vector<1x32x32xbf16> to vector<32x32xbf16>
    %cst_242 = arith.constant dense<0.000000e+00> : vector<32x128xf32>
    %264 = tpu.matmul %263, %166, %cst_242 {dimension_numbers = #tpu.dot_dimension_numbers<[1], [0], [0], [1], [0, 0, 1, 1], [], []>} : vector<32x32xbf16>, vector<32x128xbf16>, vector<32x128xf32> -> vector<32x128xf32>
    %265 = arith.truncf %264 : vector<32x128xf32> to vector<32x128xbf16>
    %c0_243 = arith.constant 0 : index
    %c2432_244 = arith.constant 2432 : index
    %266 = vector.load %arg9[%c0_243, %c2432_244] : memref<32x3456xbf16, #tpu.memory_space<vmem>>, vector<32x128xbf16>
    tpu.vector_store %arg9[%c0_243, %c2432_244], %265 {strides = array<i32>} : memref<32x3456xbf16, #tpu.memory_space<vmem>>, vector<32x128xbf16>,
    %c20_245 = arith.constant 20 : index
    %c0_246 = arith.constant 0 : index
    %c0_247 = arith.constant 0 : index
    %267 = vector.load %arg3[%c20_245, %c0_246, %c0_247] : memref<27x32x32xbf16, #tpu.memory_space<vmem>>, vector<1x32x32xbf16>
    %268 = vector.shape_cast %267 : vector<1x32x32xbf16> to vector<32x32xbf16>
    %cst_248 = arith.constant dense<0.000000e+00> : vector<32x128xf32>
    %269 = tpu.matmul %268, %166, %cst_248 {dimension_numbers = #tpu.dot_dimension_numbers<[1], [0], [0], [1], [0, 0, 1, 1], [], []>} : vector<32x32xbf16>, vector<32x128xbf16>, vector<32x128xf32> -> vector<32x128xf32>
    %270 = arith.truncf %269 : vector<32x128xf32> to vector<32x128xbf16>
    %c0_249 = arith.constant 0 : index
    %c2560_250 = arith.constant 2560 : index
    %271 = vector.load %arg9[%c0_249, %c2560_250] : memref<32x3456xbf16, #tpu.memory_space<vmem>>, vector<32x128xbf16>
    tpu.vector_store %arg9[%c0_249, %c2560_250], %270 {strides = array<i32>} : memref<32x3456xbf16, #tpu.memory_space<vmem>>, vector<32x128xbf16>,
    %c21_251 = arith.constant 21 : index
    %c0_252 = arith.constant 0 : index
    %c0_253 = arith.constant 0 : index
    %272 = vector.load %arg3[%c21_251, %c0_252, %c0_253] : memref<27x32x32xbf16, #tpu.memory_space<vmem>>, vector<1x32x32xbf16>
    %273 = vector.shape_cast %272 : vector<1x32x32xbf16> to vector<32x32xbf16>
    %cst_254 = arith.constant dense<0.000000e+00> : vector<32x128xf32>
    %274 = tpu.matmul %273, %166, %cst_254 {dimension_numbers = #tpu.dot_dimension_numbers<[1], [0], [0], [1], [0, 0, 1, 1], [], []>} : vector<32x32xbf16>, vector<32x128xbf16>, vector<32x128xf32> -> vector<32x128xf32>
    %275 = arith.truncf %274 : vector<32x128xf32> to vector<32x128xbf16>
    %c0_255 = arith.constant 0 : index
    %c2688_256 = arith.constant 2688 : index
    %276 = vector.load %arg9[%c0_255, %c2688_256] : memref<32x3456xbf16, #tpu.memory_space<vmem>>, vector<32x128xbf16>
    tpu.vector_store %arg9[%c0_255, %c2688_256], %275 {strides = array<i32>} : memref<32x3456xbf16, #tpu.memory_space<vmem>>, vector<32x128xbf16>,
    %c22_257 = arith.constant 22 : index
    %c0_258 = arith.constant 0 : index
    %c0_259 = arith.constant 0 : index
    %277 = vector.load %arg3[%c22_257, %c0_258, %c0_259] : memref<27x32x32xbf16, #tpu.memory_space<vmem>>, vector<1x32x32xbf16>
    %278 = vector.shape_cast %277 : vector<1x32x32xbf16> to vector<32x32xbf16>
    %cst_260 = arith.constant dense<0.000000e+00> : vector<32x128xf32>
    %279 = tpu.matmul %278, %166, %cst_260 {dimension_numbers = #tpu.dot_dimension_numbers<[1], [0], [0], [1], [0, 0, 1, 1], [], []>} : vector<32x32xbf16>, vector<32x128xbf16>, vector<32x128xf32> -> vector<32x128xf32>
    %280 = arith.truncf %279 : vector<32x128xf32> to vector<32x128xbf16>
    %c0_261 = arith.constant 0 : index
    %c2816_262 = arith.constant 2816 : index
    %281 = vector.load %arg9[%c0_261, %c2816_262] : memref<32x3456xbf16, #tpu.memory_space<vmem>>, vector<32x128xbf16>
    tpu.vector_store %arg9[%c0_261, %c2816_262], %280 {strides = array<i32>} : memref<32x3456xbf16, #tpu.memory_space<vmem>>, vector<32x128xbf16>,
    %c23_263 = arith.constant 23 : index
    %c0_264 = arith.constant 0 : index
    %c0_265 = arith.constant 0 : index
    %282 = vector.load %arg3[%c23_263, %c0_264, %c0_265] : memref<27x32x32xbf16, #tpu.memory_space<vmem>>, vector<1x32x32xbf16>
    %283 = vector.shape_cast %282 : vector<1x32x32xbf16> to vector<32x32xbf16>
    %cst_266 = arith.constant dense<0.000000e+00> : vector<32x128xf32>
    %284 = tpu.matmul %283, %166, %cst_266 {dimension_numbers = #tpu.dot_dimension_numbers<[1], [0], [0], [1], [0, 0, 1, 1], [], []>} : vector<32x32xbf16>, vector<32x128xbf16>, vector<32x128xf32> -> vector<32x128xf32>
    %285 = arith.truncf %284 : vector<32x128xf32> to vector<32x128xbf16>
    %c0_267 = arith.constant 0 : index
    %c2944_268 = arith.constant 2944 : index
    %286 = vector.load %arg9[%c0_267, %c2944_268] : memref<32x3456xbf16, #tpu.memory_space<vmem>>, vector<32x128xbf16>
    tpu.vector_store %arg9[%c0_267, %c2944_268], %285 {strides = array<i32>} : memref<32x3456xbf16, #tpu.memory_space<vmem>>, vector<32x128xbf16>,
    %c24_269 = arith.constant 24 : index
    %c0_270 = arith.constant 0 : index
    %c0_271 = arith.constant 0 : index
    %287 = vector.load %arg3[%c24_269, %c0_270, %c0_271] : memref<27x32x32xbf16, #tpu.memory_space<vmem>>, vector<1x32x32xbf16>
    %288 = vector.shape_cast %287 : vector<1x32x32xbf16> to vector<32x32xbf16>
    %cst_272 = arith.constant dense<0.000000e+00> : vector<32x128xf32>
    %289 = tpu.matmul %288, %166, %cst_272 {dimension_numbers = #tpu.dot_dimension_numbers<[1], [0], [0], [1], [0, 0, 1, 1], [], []>} : vector<32x32xbf16>, vector<32x128xbf16>, vector<32x128xf32> -> vector<32x128xf32>
    %290 = arith.truncf %289 : vector<32x128xf32> to vector<32x128xbf16>
    %c0_273 = arith.constant 0 : index
    %c3072_274 = arith.constant 3072 : index
    %291 = vector.load %arg9[%c0_273, %c3072_274] : memref<32x3456xbf16, #tpu.memory_space<vmem>>, vector<32x128xbf16>
    tpu.vector_store %arg9[%c0_273, %c3072_274], %290 {strides = array<i32>} : memref<32x3456xbf16, #tpu.memory_space<vmem>>, vector<32x128xbf16>,
    %c25_275 = arith.constant 25 : index
    %c0_276 = arith.constant 0 : index
    %c0_277 = arith.constant 0 : index
    %292 = vector.load %arg3[%c25_275, %c0_276, %c0_277] : memref<27x32x32xbf16, #tpu.memory_space<vmem>>, vector<1x32x32xbf16>
    %293 = vector.shape_cast %292 : vector<1x32x32xbf16> to vector<32x32xbf16>
    %cst_278 = arith.constant dense<0.000000e+00> : vector<32x128xf32>
    %294 = tpu.matmul %293, %166, %cst_278 {dimension_numbers = #tpu.dot_dimension_numbers<[1], [0], [0], [1], [0, 0, 1, 1], [], []>} : vector<32x32xbf16>, vector<32x128xbf16>, vector<32x128xf32> -> vector<32x128xf32>
    %295 = arith.truncf %294 : vector<32x128xf32> to vector<32x128xbf16>
    %c0_279 = arith.constant 0 : index
    %c3200_280 = arith.constant 3200 : index
    %296 = vector.load %arg9[%c0_279, %c3200_280] : memref<32x3456xbf16, #tpu.memory_space<vmem>>, vector<32x128xbf16>
    tpu.vector_store %arg9[%c0_279, %c3200_280], %295 {strides = array<i32>} : memref<32x3456xbf16, #tpu.memory_space<vmem>>, vector<32x128xbf16>,
    %c26_281 = arith.constant 26 : index
    %c0_282 = arith.constant 0 : index
    %c0_283 = arith.constant 0 : index
    %297 = vector.load %arg3[%c26_281, %c0_282, %c0_283] : memref<27x32x32xbf16, #tpu.memory_space<vmem>>, vector<1x32x32xbf16>
    %298 = vector.shape_cast %297 : vector<1x32x32xbf16> to vector<32x32xbf16>
    %cst_284 = arith.constant dense<0.000000e+00> : vector<32x128xf32>
    %299 = tpu.matmul %298, %166, %cst_284 {dimension_numbers = #tpu.dot_dimension_numbers<[1], [0], [0], [1], [0, 0, 1, 1], [], []>} : vector<32x32xbf16>, vector<32x128xbf16>, vector<32x128xf32> -> vector<32x128xf32>
    %300 = arith.truncf %299 : vector<32x128xf32> to vector<32x128xbf16>
    %c0_285 = arith.constant 0 : index
    %c3328_286 = arith.constant 3328 : index
    %301 = vector.load %arg9[%c0_285, %c3328_286] : memref<32x3456xbf16, #tpu.memory_space<vmem>>, vector<32x128xbf16>
    tpu.vector_store %arg9[%c0_285, %c3328_286], %300 {strides = array<i32>} : memref<32x3456xbf16, #tpu.memory_space<vmem>>, vector<32x128xbf16>,
    %c0_287 = arith.constant 0 : index
    %c0_288 = arith.constant 0 : index
    %302 = vector.load %arg9[%c0_287, %c0_288] : memref<32x3456xbf16, #tpu.memory_space<vmem>>, vector<32x3456xbf16>
    %c0_289 = arith.constant 0 : index
    %c0_290 = arith.constant 0 : index
    %303 = vector.load %arg1[%c0_289, %c0_290] : memref<3456x128xbf16, #tpu.memory_space<vmem>>, vector<3456x128xbf16>
    %cst_291 = arith.constant dense<0.000000e+00> : vector<32x128xf32>
    %304 = tpu.matmul %302, %303, %cst_291 {dimension_numbers = #tpu.dot_dimension_numbers<[1], [0], [0], [1], [0, 0, 1, 1], [], []>} : vector<32x3456xbf16>, vector<3456x128xbf16>, vector<32x128xf32> -> vector<32x128xf32>
    %c0_292 = arith.constant 0 : index
    %c0_293 = arith.constant 0 : index
    %305 = vector.load %arg6[%c0_292, %c0_293] : memref<32x1xf32, #tpu.memory_space<vmem>>, vector<32x1xf32>
    %c0_294 = arith.constant 0 : index
    %c0_295 = arith.constant 0 : index
    %306 = vector.load %arg7[%c0_294, %c0_295] : memref<32x1xf32, #tpu.memory_space<vmem>>, vector<32x1xf32>
    %cst_296 = arith.constant dense<0.000000e+00> : vector<32xf32>
    %307 = vector.multi_reduction <add>, %304, %cst_296 [1] : vector<32x128xf32> to vector<32xf32>
    %308 = vector.shape_cast %307 : vector<32xf32> to vector<32x1xf32>
    %309 = arith.mulf %304, %304 : vector<32x128xf32>
    %cst_297 = arith.constant dense<0.000000e+00> : vector<32xf32>
    %310 = vector.multi_reduction <add>, %309, %cst_297 [1] : vector<32x128xf32> to vector<32xf32>
    %311 = vector.shape_cast %310 : vector<32xf32> to vector<32x1xf32>
    %cst_298 = arith.constant 7.812500e-03 : f32
    %312 = vector.broadcast %cst_298 : f32 to vector<32x1xf32>
    %313 = arith.mulf %308, %312 : vector<32x1xf32>
    %cst_299 = arith.constant 7.812500e-03 : f32
    %314 = vector.broadcast %cst_299 : f32 to vector<32x1xf32>
    %315 = arith.mulf %311, %314 : vector<32x1xf32>
    %316 = arith.mulf %313, %313 : vector<32x1xf32>
    %317 = arith.subf %315, %316 : vector<32x1xf32>
    %318 = vector.broadcast %313 : vector<32x1xf32> to vector<32x128xf32>
    %319 = arith.subf %304, %318 : vector<32x128xf32>
    %cst_300 = arith.constant 9.99999974E-6 : f32
    %320 = vector.broadcast %cst_300 : f32 to vector<32x1xf32>
    %321 = arith.addf %317, %320 : vector<32x1xf32>
    %322 = math.rsqrt %321 : vector<32x1xf32>
    %323 = vector.broadcast %322 : vector<32x1xf32> to vector<32x128xf32>
    %324 = arith.mulf %319, %323 : vector<32x128xf32>
    %325 = vector.broadcast %305 : vector<32x1xf32> to vector<32x128xf32>
    %326 = arith.mulf %324, %325 : vector<32x128xf32>
    %327 = vector.broadcast %306 : vector<32x1xf32> to vector<32x128xf32>
    %328 = arith.addf %326, %327 : vector<32x128xf32>
    %329 = arith.addf %328, %0 : vector<32x128xf32>
    %cst_301 = arith.constant 0.000000e+00 : f32
    %330 = vector.broadcast %cst_301 : f32 to vector<32x128xf32>
    %331 = arith.maximumf %329, %330 : vector<32x128xf32>
    %c0_302 = arith.constant 0 : index
    %c0_303 = arith.constant 0 : index
    %332 = vector.load %arg8[%c0_302, %c0_303] : memref<32x128xf32, #tpu.memory_space<vmem>>, vector<32x128xf32>
    tpu.vector_store %arg8[%c0_302, %c0_303], %331 {strides = array<i32>} : memref<32x128xf32, #tpu.memory_space<vmem>>, vector<32x128xf32>,
    return
  }
}

</mosaic_0001>

<bundles_post_ra>
// kernel: basic_block_forward.1
= control target key start
LH: loop header
LB: loop body
LE: loop exit
PB: predicated region body
PF: predicated region fallthrough
CT: control target
= control target key end

     0   :  { %13 = vsyncpa [#allocation4], 0  ;;  %s12203_s0 = inlined_call_operand.vmem [shape: f32[32,128], index: 0, kind: input, shape index: {}]   ;;  %s12204_s1 = inlined_call_operand.hbm [shape: bf16[3456,128], index: 1, kind: input, shape index: {}]   ;;  %s12205_s2 = inlined_call_operand.hbm [shape: bf16[27,32,32], index: 2, kind: input, shape index: {}]   ;;  %s12206_s3 = inlined_call_operand.hbm [shape: bf16[27,32,32], index: 3, kind: input, shape index: {}]   ;;  %s12207_s4 = inlined_call_operand.vmem [shape: f32[32,1], index: 4, kind: input, shape index: {}]   ;;  %s12208_s5 = inlined_call_operand.vmem [shape: f32[32,1], index: 5, kind: input, shape index: {}]   ;;  %s12209_s6 = inlined_call_operand.vmem [shape: f32[32,1], index: 6, kind: input, shape index: {}]   ;;  %s12210_s7 = inlined_call_operand.vmem [shape: f32[32,1], index: 7, kind: input, shape index: {}]   ;;  %s12211_s8 = inlined_call_operand.hbm [shape: f32[32,128], index: 8, kind: output, shape index: {}]  }
   0x1   :  { %14 = vsyncpa [#allocation7], 0 }
   0x2   :  { %15 = vsyncpa [#allocation5], 0  ;;  %s35_s29 = sshll.u32 %s12205_s2, 4  ;;  %s11621_s30 = smov [#allocation6]   ;;  %s36_s29 = int_to_ptr.hbm [resolvable:$true] %s35_s29 }
   0x3   :  { %s37_s9 = sshll.u32 %s11621_s30, 4  ;;  %s22_s12 = sshll.u32 %s12204_s1, 4  ;;  %s38_s9 = int_to_ptr.vmem [resolvable:$true] %s37_s9  ;;  %s23_s12 = int_to_ptr.hbm [resolvable:$true] %s22_s12 }
   0x4   :  { %s11622_s13 = smov 64   ;;  %s11623_s14 = smov 4  }
   0x5   :  { %43 = dma.hbm_to_vmem [thread:$0]  %s36_s29, 6912, %s38_s9, [#allocation7], %s11622_s13, %s11622_s13, %s11623_s14  }
   0x6   :  { %s11624_s15 = smov [#allocation3]   ;;  %s48_s19 = sshll.u32 %s12206_s3, 4  ;;  %s49_s19 = int_to_ptr.hbm [resolvable:$true] %s48_s19 }
   0x7   :  { %s24_s16 = sshll.u32 %s11624_s15, 4  ;;  %s11625_s2 = smov [#allocation8]   ;;  %s25_s16 = int_to_ptr.vmem [resolvable:$true] %s24_s16 }
   0x8   :  { %30 = dma.hbm_to_vmem [thread:$0]  %s23_s12, 27648, %s25_s16, [#allocation4], %s11622_s13, %s11622_s13, %s11623_s14  }
   0x9   :  { %s50_s20 = sshll.u32 %s11625_s2, 4  ;;  %s51_s20 = int_to_ptr.vmem [resolvable:$true] %s50_s20 }
   0xa   :  { %56 = dma.hbm_to_vmem [thread:$0]  %s49_s19, 6912, %s51_s20, [#allocation7], %s11622_s13, %s11622_s13, %s11623_s14  }
   0xb   :  { %11615 = dma.done.wait [#allocation4], 27648  }
   0xc   :  { %11616 = vsyncadd [#allocation4], 4294939648 }
   0xd   :  { %11617 = dma.done.wait [#allocation7], 13824  }
   0xe   :  { %11618 = vsyncadd [#allocation7], 4294953472  ;;  %v80_v0 = vld [vmem:[%s12203_s0 + $0x10] sm:$0xff]  ;;  %v81_v1 = vld [vmem:[%s12203_s0 + $0x18] sm:$0xff]  ;;  %vm98_vm0 = vcmask 261120   ;;  %s11627_s14 = smov [#allocation9]  }
   0xf   :  { %v78_v2 = vld [vmem:[%s12203_s0] sm:$0xff]  ;;  %v11693_v3 = vpack.c.bf16 %v81_v1, %v80_v0  ;;  %v79_v4 = vld [vmem:[%s12203_s0 + $0x8] sm:$0xff]  ;;  %v10839_v6 = vld [vmem:[#allocation6] sm:$0xff]  ;;  %s8123_s15 = sshll.u32 %s11627_s14, 4  ;;  %s8125_s18 = sshll.u32 %s12211_s8, 4  ;;  %s8124_s15 = int_to_ptr.vmem [resolvable:$true] %s8123_s15  ;;  %s8126_s18 = int_to_ptr.hbm [resolvable:$true] %s8125_s18 }
  0x10   :  { %v11700_v5 = vpack.c.bf16 %v79_v4, %v78_v2  ;;  %v10841_v7 = vld [vmem:[#allocation6 + $0x10] sm:$0xff]  ;;  %v10843_v8 = vld [vmem:[#allocation6 + $0x20] sm:$0xff]  ;;  %v10840_v10 = vld [vmem:[#allocation6 + $0x8] sm:$0xff]  ;;  %s11628_s20 = smov 128   ;;  %s11629_s1 = smov 8  }
  0x11   :  { %111 = vmatpush.bf16.msra.mxu0 %v11693_v3  ;;  %159 = vmatpush.bf16.msra.mxu1 %v11693_v3  ;;  %v10845_v9 = vld [vmem:[#allocation6 + $0x30] sm:$0xff]  ;;  %v10842_v11 = vld [vmem:[#allocation6 + $0x18] sm:$0xff]  ;;  %v10844_v12 = vld [vmem:[#allocation6 + $0x28] sm:$0xff] }
  0x12   :  { %207 = vmatpush.bf16.msra.mxu2 %v11693_v3  ;;  %255 = vmatpush.bf16.msra.mxu3 %v11693_v3  ;;  %v10846_v13 = vld [vmem:[#allocation6 + $0x38] sm:$0xff]  ;;  %v10847_v14 = vld [vmem:[#allocation6 + $0x40] sm:$0xff]  ;;  %v10849_v15 = vld [vmem:[#allocation6 + $0x50] sm:$0xff] }
  0x13   :  { %v10851_v16 = vld [vmem:[#allocation6 + $0x60] sm:$0xff]  ;;  %v10853_v17 = vld [vmem:[#allocation6 + $0x70] sm:$0xff]  ;;  %v10848_v18 = vld [vmem:[#allocation6 + $0x48] sm:$0xff] }
  0x14   :  { %v10850_v19 = vld [vmem:[#allocation6 + $0x58] sm:$0xff]  ;;  %v10852_v20 = vld [vmem:[#allocation6 + $0x68] sm:$0xff]  ;;  %v10855_v22 = vld [vmem:[#allocation6 + $0x80] sm:$0xff] }
  0x15   :  { %112 = vmatpush.bf16.msra.mxu0 %v11700_v5  ;;  %160 = vmatpush.bf16.msra.mxu1 %v11700_v5  ;;  %v10854_v21 = vld [vmem:[#allocation6 + $0x78] sm:$0xff]  ;;  %v10857_v23 = vld [vmem:[#allocation6 + $0x90] sm:$0xff]  ;;  %v10859_v24 = vld [vmem:[#allocation6 + $0xa0] sm:$0xff] }
  0x16   :  { %208 = vmatpush.bf16.msra.mxu2 %v11700_v5  ;;  %256 = vmatpush.bf16.msra.mxu3 %v11700_v5  ;;  %v10861_v25 = vld [vmem:[#allocation6 + $0xb0] sm:$0xff]  ;;  %v10856_v26 = vld [vmem:[#allocation6 + $0x88] sm:$0xff]  ;;  %v10858_v27 = vld [vmem:[#allocation6 + $0x98] sm:$0xff] }
  0x17   :  { %v10860_v28 = vld [vmem:[#allocation6 + $0xa8] sm:$0xff]  ;;  %v10862_v29 = vld [vmem:[#allocation6 + $0xb8] sm:$0xff]  ;;  %v10863_v30 = vld [vmem:[#allocation6 + $0xc0] sm:$0xff] }
  0x18   :  { %8147 = vmatmul.msk.bf16.vlgmr.msra.gmra.mxu0 %vm98_vm0, %v10839_v6  ;;  %8157 = vmatmul.msk.bf16.vlgmr.msra.gmra.mxu1 %vm98_vm0, %v10841_v7  ;;  %v10865_v31 = vld [vmem:[#allocation6 + $0xd0] sm:$0xff]  ;;  %v10867_v32 = vld [vmem:[#allocation6 + $0xe0] sm:$0xff]  ;;  %v10864_v34 = vld [vmem:[#allocation6 + $0xc8] sm:$0xff] }
  0x19   :  { %303 = vmatpush.bf16.msrb.mxu0 %v11693_v3  ;;  %351 = vmatpush.bf16.msrb.mxu1 %v11693_v3  ;;  %v10869_v33 = vld [vmem:[#allocation6 + $0xf0] sm:$0xff]  ;;  %v10866_v35 = vld [vmem:[#allocation6 + $0xd8] sm:$0xff]  ;;  %v10868_v36 = vld [vmem:[#allocation6 + $0xe8] sm:$0xff] }
  0x1a   :  { %8167 = vmatmul.msk.bf16.vlgmr.msra.gmra.mxu2 %vm98_vm0, %v10843_v8  ;;  %8177 = vmatmul.msk.bf16.vlgmr.msra.gmra.mxu3 %vm98_vm0, %v10845_v9  ;;  %v10870_v37 = vld [vmem:[#allocation6 + $0xf8] sm:$0xff]  ;;  %v10871_v38 = vld [vmem:[#allocation6 + $0x100] sm:$0xff]  ;;  %v10873_v39 = vld [vmem:[#allocation6 + $0x110] sm:$0xff] }
  0x1b   :  { %399 = vmatpush.bf16.msrb.mxu2 %v11693_v3  ;;  %447 = vmatpush.bf16.msrb.mxu3 %v11693_v3  ;;  %v10875_v42 = vld [vmem:[#allocation6 + $0x120] sm:$0xff]  ;;  %v10877_v43 = vld [vmem:[#allocation6 + $0x130] sm:$0xff]  ;;  %v10954_v46 = vld [vmem:[#allocation3 + $0x38] sm:$0xff] }
  0x1c   :  { %v10953_v53 = vld [vmem:[#allocation3 + $0x30] sm:$0xff]  ;;  %v10952_v56 = vld [vmem:[#allocation3 + $0x28] sm:$0xff]  ;;  %v10874_v60 = vld [vmem:[#allocation6 + $0x118] sm:$0xff] }
  0x1d   :  { %304 = vmatpush.bf16.msrb.mxu0 %v11700_v5  ;;  %352 = vmatpush.bf16.msrb.mxu1 %v11700_v5  ;;  %v10872_v59 = vld [vmem:[#allocation6 + $0x108] sm:$0xff]  ;;  %v10878_v2 = vld [vmem:[#allocation6 + $0x138] sm:$0xff] }
  0x1e   :  { %v10876_v1 = vld [vmem:[#allocation6 + $0x128] sm:$0xff] }
  0x1f   :  { %400 = vmatpush.bf16.msrb.mxu2 %v11700_v5  ;;  %448 = vmatpush.bf16.msrb.mxu3 %v11700_v5 }
  0x21   :  { %495 = vmatpush.bf16.msra.mxu0 %v11693_v3  ;;  %543 = vmatpush.bf16.msra.mxu1 %v11693_v3 }
  0x23   :  { %591 = vmatpush.bf16.msra.mxu2 %v11693_v3  ;;  %639 = vmatpush.bf16.msra.mxu3 %v11693_v3 }
  0x25   :  { %496 = vmatpush.bf16.msra.mxu0 %v11700_v5  ;;  %544 = vmatpush.bf16.msra.mxu1 %v11700_v5 }
  0x27   :  { %592 = vmatpush.bf16.msra.mxu2 %v11700_v5  ;;  %640 = vmatpush.bf16.msra.mxu3 %v11700_v5 }
  0x28   :  { %8148 = vmatmul.msk.bf16.gmra.mxu0 %vm98_vm0, %v10840_v10  ;;  %8158 = vmatmul.msk.bf16.gmra.mxu1 %vm98_vm0, %v10842_v11 }
  0x2a   :  { %8168 = vmatmul.msk.bf16.gmra.mxu2 %vm98_vm0, %v10844_v12  ;;  %8178 = vmatmul.msk.bf16.gmra.mxu3 %vm98_vm0, %v10846_v13  ;;  %v10949_v13 = vld [vmem:[#allocation3 + $0x10] sm:$0xff] }
  0x38   :  { %8187 = vmatmul.msk.bf16.vlgmr.msrb.gmra.mxu0 %vm98_vm0, %v10847_v14  ;;  %8197 = vmatmul.msk.bf16.vlgmr.msrb.gmra.mxu1 %vm98_vm0, %v10849_v15 }
  0x39   :  { %687 = vmatpush.bf16.msrb.mxu0 %v11693_v3  ;;  %735 = vmatpush.bf16.msrb.mxu1 %v11693_v3 }
  0x3a   :  { %8207 = vmatmul.msk.bf16.vlgmr.msrb.gmra.mxu2 %vm98_vm0, %v10851_v16  ;;  %8217 = vmatmul.msk.bf16.vlgmr.msrb.gmra.mxu3 %vm98_vm0, %v10853_v17  ;;  %v10948_v16 = vld [vmem:[#allocation3 + $0x8] sm:$0xff] }
  0x3b   :  { %783 = vmatpush.bf16.msrb.mxu2 %v11693_v3  ;;  %831 = vmatpush.bf16.msrb.mxu3 %v11693_v3 }
  0x3d   :  { %688 = vmatpush.bf16.msrb.mxu0 %v11700_v5  ;;  %736 = vmatpush.bf16.msrb.mxu1 %v11700_v5 }
  0x3f   :  { %784 = vmatpush.bf16.msrb.mxu2 %v11700_v5  ;;  %832 = vmatpush.bf16.msrb.mxu3 %v11700_v5 }
  0x48   :  { %8188 = vmatmul.msk.bf16.gmra.mxu0 %vm98_vm0, %v10848_v18  ;;  %8198 = vmatmul.msk.bf16.gmra.mxu1 %vm98_vm0, %v10850_v19  ;;  %v10879_v19 = vld [vmem:[#allocation6 + $0x140] sm:$0xff] }
  0x4a   :  { %8208 = vmatmul.msk.bf16.gmra.mxu2 %vm98_vm0, %v10852_v20  ;;  %8218 = vmatmul.msk.bf16.gmra.mxu3 %vm98_vm0, %v10854_v21  ;;  %v10881_v20 = vld [vmem:[#allocation6 + $0x150] sm:$0xff] }
  0x58   :  { %8227 = vmatmul.msk.bf16.vlgmr.msra.gmra.mxu0 %vm98_vm0, %v10855_v22  ;;  %8237 = vmatmul.msk.bf16.vlgmr.msra.gmra.mxu1 %vm98_vm0, %v10857_v23 }
  0x59   :  { %879 = vmatpush.bf16.msra.mxu0 %v11693_v3  ;;  %927 = vmatpush.bf16.msra.mxu1 %v11693_v3 }
  0x5a   :  { %8247 = vmatmul.msk.bf16.vlgmr.msra.gmra.mxu2 %vm98_vm0, %v10859_v24  ;;  %8257 = vmatmul.msk.bf16.vlgmr.msra.gmra.mxu3 %vm98_vm0, %v10861_v25  ;;  %v10883_v25 = vld [vmem:[#allocation6 + $0x160] sm:$0xff] }
  0x5b   :  { %975 = vmatpush.bf16.msra.mxu2 %v11693_v3  ;;  %1023 = vmatpush.bf16.msra.mxu3 %v11693_v3 }
  0x5d   :  { %880 = vmatpush.bf16.msra.mxu0 %v11700_v5  ;;  %928 = vmatpush.bf16.msra.mxu1 %v11700_v5 }
  0x5f   :  { %976 = vmatpush.bf16.msra.mxu2 %v11700_v5  ;;  %1024 = vmatpush.bf16.msra.mxu3 %v11700_v5 }
  0x68   :  { %8228 = vmatmul.msk.bf16.gmra.mxu0 %vm98_vm0, %v10856_v26  ;;  %8238 = vmatmul.msk.bf16.gmra.mxu1 %vm98_vm0, %v10858_v27  ;;  %v10885_v26 = vld [vmem:[#allocation6 + $0x170] sm:$0xff]  ;;  %v10947_v27 = vld [vmem:[#allocation3] sm:$0xff] }
  0x6a   :  { %8248 = vmatmul.msk.bf16.gmra.mxu2 %vm98_vm0, %v10860_v28  ;;  %8258 = vmatmul.msk.bf16.gmra.mxu3 %vm98_vm0, %v10862_v29 }
  0x78   :  { %8267 = vmatmul.msk.bf16.vlgmr.msrb.gmra.mxu0 %vm98_vm0, %v10863_v30  ;;  %8277 = vmatmul.msk.bf16.vlgmr.msrb.gmra.mxu1 %vm98_vm0, %v10865_v31  ;;  %v10962_v30 = vld [vmem:[#allocation3 + $0x78] sm:$0xff] }
  0x79   :  { %1071 = vmatpush.bf16.msrb.mxu0 %v11693_v3  ;;  %1119 = vmatpush.bf16.msrb.mxu1 %v11693_v3  ;;  %v10970_v31 = vld [vmem:[#allocation3 + $0xb8] sm:$0xff] }
  0x7a   :  { %8287 = vmatmul.msk.bf16.vlgmr.msrb.gmra.mxu2 %vm98_vm0, %v10867_v32  ;;  %8297 = vmatmul.msk.bf16.vlgmr.msrb.gmra.mxu3 %vm98_vm0, %v10869_v33  ;;  %v10978_v32 = vld [vmem:[#allocation3 + $0xf8] sm:$0xff] }
  0x7b   :  { %1167 = vmatpush.bf16.msrb.mxu2 %v11693_v3  ;;  %1215 = vmatpush.bf16.msrb.mxu3 %v11693_v3  ;;  %v10986_v33 = vld [vmem:[#allocation3 + $0x138] sm:$0xff] }
  0x7d   :  { %1072 = vmatpush.bf16.msrb.mxu0 %v11700_v5  ;;  %1120 = vmatpush.bf16.msrb.mxu1 %v11700_v5 }
  0x7f   :  { %1168 = vmatpush.bf16.msrb.mxu2 %v11700_v5  ;;  %1216 = vmatpush.bf16.msrb.mxu3 %v11700_v5 }
  0x88   :  { %8268 = vmatmul.msk.bf16.gmra.mxu0 %vm98_vm0, %v10864_v34  ;;  %8278 = vmatmul.msk.bf16.gmra.mxu1 %vm98_vm0, %v10866_v35 }
  0x8a   :  { %8288 = vmatmul.msk.bf16.gmra.mxu2 %vm98_vm0, %v10868_v36  ;;  %8298 = vmatmul.msk.bf16.gmra.mxu3 %vm98_vm0, %v10870_v37 }
  0x95   :  { %v114_v40 = vpop.f32.mrf.mxu0  ;;  %v162_v41 = vpop.f32.mrf.mxu1 }
  0x96   :  { %v124_v44 = vpack.c.bf16 %v114_v40, %v114_v40  ;;  %v172_v45 = vpack.c.bf16 %v162_v41, %v162_v41  ;;  %v10961_v40 = vld [vmem:[#allocation3 + $0x70] sm:$0xff] }
  0x97   :  { %v10969_v41 = vld [vmem:[#allocation3 + $0xb0] sm:$0xff] }
  0x98   :  { %128 = vst [vmem:[#allocation2] sm:$0xf] %v124_v44  ;;  %8307 = vmatmul.msk.bf16.vlgmr.msra.gmra.mxu0 %vm98_vm0, %v10871_v38  ;;  %8317 = vmatmul.msk.bf16.vlgmr.msra.gmra.mxu1 %vm98_vm0, %v10873_v39 }
  0x99   :  { %176 = vst [vmem:[#allocation2 + $0x4] sm:$0xf] %v172_v45  ;;  %1263 = vmatpush.bf16.msra.mxu0 %v11693_v3  ;;  %1311 = vmatpush.bf16.msra.mxu1 %v11693_v3  ;;  %v10985_v45 = vld [vmem:[#allocation3 + $0x130] sm:$0xff] }
  0x9a   :  { %8327 = vmatmul.msk.bf16.vlgmr.msra.gmra.mxu2 %vm98_vm0, %v10875_v42  ;;  %8337 = vmatmul.msk.bf16.vlgmr.msra.gmra.mxu3 %vm98_vm0, %v10877_v43  ;;  %v10977_v42 = vld [vmem:[#allocation3 + $0xf0] sm:$0xff] }
  0x9b   :  { %3436 = vmatpush.bf16.msra.mxu3 %v10954_v46  ;;  %1359 = vmatpush.bf16.msra.mxu2 %v11693_v3  ;;  %v10951_v3 = vld [vmem:[#allocation3 + $0x20] sm:$0xff]  ;;  %v10960_v46 = vld [vmem:[#allocation3 + $0x68] sm:$0xff] }
  0x9d   :  { %v210_v47 = vpop.f32.mrf.mxu2  ;;  %v258_v48 = vpop.f32.mrf.mxu3  ;;  %1264 = vmatpush.bf16.msra.mxu0 %v11700_v5  ;;  %1312 = vmatpush.bf16.msra.mxu1 %v11700_v5 }
  0x9e   :  { %v220_v49 = vpack.c.bf16 %v210_v47, %v210_v47  ;;  %v268_v50 = vpack.c.bf16 %v258_v48, %v258_v48  ;;  %v116_v51 = vpop.f32.mrf.mxu0  ;;  %v164_v52 = vpop.f32.mrf.mxu1  ;;  %v10968_v47 = vld [vmem:[#allocation3 + $0xa8] sm:$0xff] }
  0x9f   :  { %v125_v54 = vpack.c.bf16 %v116_v51, %v116_v51  ;;  %v173_v55 = vpack.c.bf16 %v164_v52, %v164_v52  ;;  %3437 = vmatpush.bf16.msra.mxu3 %v10953_v53  ;;  %1360 = vmatpush.bf16.msra.mxu2 %v11700_v5  ;;  %v10950_v5 = vld [vmem:[#allocation3 + $0x18] sm:$0xff]  ;;  %v10976_v48 = vld [vmem:[#allocation3 + $0xe8] sm:$0xff] }
  0xa0   :  { %224 = vst [vmem:[#allocation2 + $0x8] sm:$0xf] %v220_v49  ;;  %v10984_v49 = vld [vmem:[#allocation3 + $0x128] sm:$0xff]  ;;  %v10882_v53 = vld [vmem:[#allocation6 + $0x158] sm:$0xff] }
  0xa1   :  { %272 = vst [vmem:[#allocation2 + $0xc] sm:$0xf] %v268_v50  ;;  %v10880_v52 = vld [vmem:[#allocation6 + $0x148] sm:$0xff] }
  0xa2   :  { %129 = vst [vmem:[#allocation2 + $0x6c] sm:$0xf] %v125_v54  ;;  %v10884_v54 = vld [vmem:[#allocation6 + $0x168] sm:$0xff] }
  0xa3   :  { %177 = vst [vmem:[#allocation2 + $0x70] sm:$0xf] %v173_v55  ;;  %3438 = vmatpush.bf16.msra.mxu3 %v10952_v56 }
  0xa5   :  { %v212_v57 = vpop.f32.mrf.mxu2  ;;  %v260_v58 = vpop.f32.mrf.mxu3 }
  0xa6   :  { %v221_v61 = vpack.c.bf16 %v212_v57, %v212_v57  ;;  %v269_v62 = vpack.c.bf16 %v260_v58, %v260_v58  ;;  %v119_v63 = vpop.f32.mrf.mxu0  ;;  %v167_v0 = vpop.f32.mrf.mxu1 }
  0xa7   :  { %v126_v4 = vpack.c.bf16 %v119_v63, %v119_v63  ;;  %v174_v6 = vpack.c.bf16 %v167_v0, %v167_v0  ;;  %3439 = vmatpush.bf16.msra.mxu3 %v10951_v3  ;;  %v10975_v0 = vld [vmem:[#allocation3 + $0xe0] sm:$0xff]  ;;  %v10966_v3 = vld [vmem:[#allocation3 + $0x98] sm:$0xff] }
  0xa8   :  { %225 = vst [vmem:[#allocation2 + $0x74] sm:$0xf] %v221_v61  ;;  %8308 = vmatmul.msk.bf16.gmra.mxu0 %vm98_vm0, %v10872_v59  ;;  %8318 = vmatmul.msk.bf16.gmra.mxu1 %vm98_vm0, %v10874_v60  ;;  %v10886_v59 = vld [vmem:[#allocation6 + $0x178] sm:$0xff]  ;;  %v10959_v60 = vld [vmem:[#allocation3 + $0x60] sm:$0xff] }
  0xa9   :  { %273 = vst [vmem:[#allocation2 + $0x78] sm:$0xf] %v269_v62  ;;  %v10967_v61 = vld [vmem:[#allocation3 + $0xa0] sm:$0xff] }
  0xaa   :  { %130 = vst [vmem:[#allocation2 + $0xd8] sm:$0xf] %v126_v4  ;;  %8328 = vmatmul.msk.bf16.gmra.mxu2 %vm98_vm0, %v10876_v1  ;;  %8338 = vmatmul.msk.bf16.gmra.mxu3 %vm98_vm0, %v10878_v2  ;;  %v10983_v1 = vld [vmem:[#allocation3 + $0x120] sm:$0xff]  ;;  %v10958_v2 = vld [vmem:[#allocation3 + $0x58] sm:$0xff] }
  0xab   :  { %178 = vst [vmem:[#allocation2 + $0xdc] sm:$0xf] %v174_v6  ;;  %3440 = vmatpush.bf16.msra.mxu3 %v10950_v5  ;;  %v10974_v4 = vld [vmem:[#allocation3 + $0xd8] sm:$0xff] }
  0xac   :  { %v10982_v6 = vld [vmem:[#allocation3 + $0x118] sm:$0xff] }
  0xad   :  { %v215_v7 = vpop.f32.mrf.mxu2  ;;  %v263_v8 = vpop.f32.mrf.mxu3 }
  0xae   :  { %v222_v9 = vpack.c.bf16 %v215_v7, %v215_v7  ;;  %v270_v10 = vpack.c.bf16 %v263_v8, %v263_v8  ;;  %v121_v11 = vpop.f32.mrf.mxu0  ;;  %v169_v12 = vpop.f32.mrf.mxu1 }
  0xaf   :  { %v127_v14 = vpack.c.bf16 %v121_v11, %v121_v11  ;;  %v175_v15 = vpack.c.bf16 %v169_v12, %v169_v12  ;;  %3441 = vmatpush.bf16.msra.mxu3 %v10949_v13 }
  0xb0   :  { %226 = vst [vmem:[#allocation2 + $0xe0] sm:$0xf] %v222_v9 }
  0xb1   :  { %274 = vst [vmem:[#allocation2 + $0xe4] sm:$0xf] %v270_v10 }
  0xb2   :  { %131 = vst [vmem:[#allocation2 + $0x144] sm:$0xf] %v127_v14  ;;  %v10957_v14 = vld [vmem:[#allocation3 + $0x50] sm:$0xff] }
  0xb3   :  { %179 = vst [vmem:[#allocation2 + $0x148] sm:$0xf] %v175_v15  ;;  %3442 = vmatpush.bf16.msra.mxu3 %v10948_v16  ;;  %v10965_v15 = vld [vmem:[#allocation3 + $0x90] sm:$0xff] }
  0xb4   :  { %v10973_v16 = vld [vmem:[#allocation3 + $0xd0] sm:$0xff] }
  0xb5   :  { %v217_v17 = vpop.f32.mrf.mxu2  ;;  %v265_v18 = vpop.f32.mrf.mxu3 }
  0xb6   :  { %v223_v21 = vpack.c.bf16 %v217_v17, %v217_v17  ;;  %v271_v22 = vpack.c.bf16 %v265_v18, %v265_v18  ;;  %v306_v23 = vpop.f32.mrf.mxu0  ;;  %v354_v24 = vpop.f32.mrf.mxu1  ;;  %v10981_v17 = vld [vmem:[#allocation3 + $0x110] sm:$0xff]  ;;  %v10956_v18 = vld [vmem:[#allocation3 + $0x48] sm:$0xff] }
  0xb7   :  { %v316_v28 = vpack.c.bf16 %v306_v23, %v306_v23  ;;  %v364_v29 = vpack.c.bf16 %v354_v24, %v354_v24  ;;  %3443 = vmatpush.bf16.msra.mxu3 %v10947_v27  ;;  %v10887_v24 = vld [vmem:[#allocation6 + $0x180] sm:$0xff] }
  0xb8   :  { %227 = vst [vmem:[#allocation2 + $0x14c] sm:$0xf] %v223_v21  ;;  %8347 = vmatmul.msk.bf16.vlgmr.msrb.gmra.mxu0 %vm98_vm0, %v10879_v19  ;;  %8357 = vmatmul.msk.bf16.vlgmr.msrb.gmra.mxu1 %vm98_vm0, %v10881_v20  ;;  %v10964_v19 = vld [vmem:[#allocation3 + $0x88] sm:$0xff] }
  0xb9   :  { %275 = vst [vmem:[#allocation2 + $0x150] sm:$0xf] %v271_v22  ;;  %3455 = vmatpush.bf16.msrb.mxu0 %v10962_v30  ;;  %3474 = vmatpush.bf16.msrb.mxu1 %v10970_v31  ;;  %v10972_v20 = vld [vmem:[#allocation3 + $0xc8] sm:$0xff]  ;;  %v10891_v31 = vld [vmem:[#allocation6 + $0x1a0] sm:$0xff] }
  0xba   :  { %320 = vst [vmem:[#allocation2 + $0x10] sm:$0xf] %v316_v28  ;;  %8367 = vmatmul.msk.bf16.vlgmr.msrb.gmra.mxu2 %vm98_vm0, %v10883_v25  ;;  %8377 = vmatmul.msk.bf16.vlgmr.msrb.gmra.mxu3 %vm98_vm0, %v10885_v26  ;;  %v10980_v21 = vld [vmem:[#allocation3 + $0x108] sm:$0xff]  ;;  %v10889_v25 = vld [vmem:[#allocation6 + $0x190] sm:$0xff]  ;;  %v10906_v26 = vld [vmem:[#allocation2 + $0x68] sm:$0xf0] }
  0xbb   :  { %368 = vst [vmem:[#allocation2 + $0x14] sm:$0xf] %v364_v29  ;;  %3493 = vmatpush.bf16.msrb.mxu2 %v10978_v32  ;;  %3512 = vmatpush.bf16.msrb.mxu3 %v10986_v33 }
  0xbd   :  { %v402_v34 = vpop.f32.mrf.mxu2  ;;  %v450_v35 = vpop.f32.mrf.mxu3  ;;  %3456 = vmatpush.bf16.msrb.mxu0 %v10961_v40  ;;  %3475 = vmatpush.bf16.msrb.mxu1 %v10969_v41  ;;  %v10994_v40 = vld [vmem:[#allocation3 + $0x178] sm:$0xff] }
  0xbe   :  { %v412_v36 = vpack.c.bf16 %v402_v34, %v402_v34  ;;  %v460_v37 = vpack.c.bf16 %v450_v35, %v450_v35  ;;  %v308_v38 = vpop.f32.mrf.mxu0  ;;  %v356_v39 = vpop.f32.mrf.mxu1  ;;  %v8411_v34 = vld [vmem:[#allocation2] sm:$0xf]  ;;  %v10955_v35 = vld [vmem:[#allocation3 + $0x40] sm:$0xff]  ;;  %v11002_v41 = vld [vmem:[#allocation3 + $0x1b8] sm:$0xff] }
  0xbf   :  { %v317_v43 = vpack.c.bf16 %v308_v38, %v308_v38  ;;  %v365_v44 = vpack.c.bf16 %v356_v39, %v356_v39  ;;  %3494 = vmatpush.bf16.msrb.mxu2 %v10977_v42  ;;  %3513 = vmatpush.bf16.msrb.mxu3 %v10985_v45  ;;  %v10971_v38 = vld [vmem:[#allocation3 + $0xc0] sm:$0xff]  ;;  %v11010_v42 = vld [vmem:[#allocation3 + $0x1f8] sm:$0xff] }
  0xc0   :  { %416 = vst [vmem:[#allocation2 + $0x18] sm:$0xf] %v412_v36  ;;  %v10963_v36 = vld [vmem:[#allocation3 + $0x80] sm:$0xff] }
  0xc1   :  { %464 = vst [vmem:[#allocation2 + $0x1c] sm:$0xf] %v460_v37  ;;  %3457 = vmatpush.bf16.msrb.mxu0 %v10960_v46  ;;  %3476 = vmatpush.bf16.msrb.mxu1 %v10968_v47  ;;  %v8412_v37 = vor.u32 %v10906_v26, %v8411_v34  ;;  %v10979_v39 = vld [vmem:[#allocation3 + $0x100] sm:$0xff]  ;;  %v10989_v26 = vld [vmem:[#allocation3 + $0x150] sm:$0xff]  ;;  %v10996_v34 = vld [vmem:[#allocation3 + $0x188] sm:$0xff] }
  0xc2   :  { %321 = vst [vmem:[#allocation2 + $0x7c] sm:$0xf] %v317_v43  ;;  %v11018_v43 = vld [vmem:[#allocation3 + $0x238] sm:$0xff] }
  0xc3   :  { %369 = vst [vmem:[#allocation2 + $0x80] sm:$0xf] %v365_v44  ;;  %3495 = vmatpush.bf16.msrb.mxu2 %v10976_v48  ;;  %3514 = vmatpush.bf16.msrb.mxu3 %v10984_v49 }
  0xc5   :  { %v404_v50 = vpop.f32.mrf.mxu2  ;;  %v452_v51 = vpop.f32.mrf.mxu3  ;;  %3458 = vmatpush.bf16.msrb.mxu0 %v10959_v60  ;;  %3477 = vmatpush.bf16.msrb.mxu1 %v10967_v61 }
  0xc6   :  { %v413_v55 = vpack.c.bf16 %v404_v50, %v404_v50  ;;  %v461_v56 = vpack.c.bf16 %v452_v51, %v452_v51  ;;  %v311_v57 = vpop.f32.mrf.mxu0  ;;  %v359_v58 = vpop.f32.mrf.mxu1 }
  0xc7   :  { %v318_v62 = vpack.c.bf16 %v311_v57, %v311_v57  ;;  %v366_v63 = vpack.c.bf16 %v359_v58, %v359_v58  ;;  %3496 = vmatpush.bf16.msrb.mxu2 %v10975_v0  ;;  %3515 = vmatpush.bf16.msrb.mxu3 %v10983_v1  ;;  %v11000_v57 = vld [vmem:[#allocation3 + $0x1a8] sm:$0xff]  ;;  %v10933_v0 = vld [vmem:[#allocation2 + $0x140] sm:$0xf0] }
  0xc8   :  { %417 = vst [vmem:[#allocation2 + $0x84] sm:$0xf] %v413_v55  ;;  %8348 = vmatmul.msk.bf16.gmra.mxu0 %vm98_vm0, %v10880_v52  ;;  %8358 = vmatmul.msk.bf16.gmra.mxu1 %vm98_vm0, %v10882_v53  ;;  %v10993_v52 = vld [vmem:[#allocation3 + $0x170] sm:$0xff]  ;;  %v11008_v58 = vld [vmem:[#allocation3 + $0x1e8] sm:$0xff] }
  0xc9   :  { %465 = vst [vmem:[#allocation2 + $0x88] sm:$0xf] %v461_v56  ;;  %3459 = vmatpush.bf16.msrb.mxu0 %v10958_v2  ;;  %3478 = vmatpush.bf16.msrb.mxu1 %v10966_v3  ;;  %v11001_v53 = vld [vmem:[#allocation3 + $0x1b0] sm:$0xff]  ;;  %v10992_v56 = vld [vmem:[#allocation3 + $0x168] sm:$0xff] }
  0xca   :  { %322 = vst [vmem:[#allocation2 + $0xe8] sm:$0xf] %v318_v62  ;;  %8368 = vmatmul.msk.bf16.gmra.mxu2 %vm98_vm0, %v10884_v54  ;;  %8378 = vmatmul.msk.bf16.gmra.mxu3 %vm98_vm0, %v10886_v59  ;;  %v11009_v54 = vld [vmem:[#allocation3 + $0x1f0] sm:$0xff]  ;;  %v11016_v59 = vld [vmem:[#allocation3 + $0x228] sm:$0xff] }
  0xcb   :  { %370 = vst [vmem:[#allocation2 + $0xec] sm:$0xf] %v366_v63  ;;  %3497 = vmatpush.bf16.msrb.mxu2 %v10974_v4  ;;  %3516 = vmatpush.bf16.msrb.mxu3 %v10982_v6  ;;  %v11017_v55 = vld [vmem:[#allocation3 + $0x230] sm:$0xff]  ;;  %v10888_v62 = vld [vmem:[#allocation6 + $0x188] sm:$0xff]  ;;  %v10890_v63 = vld [vmem:[#allocation6 + $0x198] sm:$0xff] }
  0xcc   :  { %v10892_v6 = vld [vmem:[#allocation6 + $0x1a8] sm:$0xff] }
  0xcd   :  { %v407_v5 = vpop.f32.mrf.mxu2  ;;  %v455_v7 = vpop.f32.mrf.mxu3  ;;  %3460 = vmatpush.bf16.msrb.mxu0 %v10957_v14  ;;  %3479 = vmatpush.bf16.msrb.mxu1 %v10965_v15  ;;  %v10990_v14 = vld [vmem:[#allocation3 + $0x158] sm:$0xff] }
  0xce   :  { %v414_v8 = vpack.c.bf16 %v407_v5, %v407_v5  ;;  %v462_v9 = vpack.c.bf16 %v455_v7, %v455_v7  ;;  %v313_v10 = vpop.f32.mrf.mxu0  ;;  %v361_v11 = vpop.f32.mrf.mxu1  ;;  %v10998_v15 = vld [vmem:[#allocation3 + $0x198] sm:$0xff] }
  0xcf   :  { %v319_v12 = vpack.c.bf16 %v313_v10, %v313_v10  ;;  %v367_v13 = vpack.c.bf16 %v361_v11, %v361_v11  ;;  %3498 = vmatpush.bf16.msrb.mxu2 %v10973_v16  ;;  %3517 = vmatpush.bf16.msrb.mxu3 %v10981_v17  ;;  %v10999_v10 = vld [vmem:[#allocation3 + $0x1a0] sm:$0xff]  ;;  %v11006_v16 = vld [vmem:[#allocation3 + $0x1d8] sm:$0xff] }
  0xd0   :  { %418 = vst [vmem:[#allocation2 + $0xf0] sm:$0xf] %v414_v8  ;;  %v8519_v8 = vld [vmem:[#allocation2 + $0xd8] sm:$0xf]  ;;  %v11014_v17 = vld [vmem:[#allocation3 + $0x218] sm:$0xff] }
  0xd1   :  { %466 = vst [vmem:[#allocation2 + $0xf4] sm:$0xf] %v462_v9  ;;  %3461 = vmatpush.bf16.msrb.mxu0 %v10956_v18  ;;  %3480 = vmatpush.bf16.msrb.mxu1 %v10964_v19  ;;  %v10991_v9 = vld [vmem:[#allocation3 + $0x160] sm:$0xff]  ;;  %v8520_v11 = vor.u32 %v10933_v0, %v8519_v8  ;;  %v11041_v8 = vld [vmem:[#allocation3 + $0x2f0] sm:$0xff] }
  0xd2   :  { %323 = vst [vmem:[#allocation2 + $0x154] sm:$0xf] %v319_v12  ;;  %v11007_v12 = vld [vmem:[#allocation3 + $0x1e0] sm:$0xff] }
  0xd3   :  { %371 = vst [vmem:[#allocation2 + $0x158] sm:$0xf] %v367_v13  ;;  %3499 = vmatpush.bf16.msrb.mxu2 %v10972_v20  ;;  %3518 = vmatpush.bf16.msrb.mxu3 %v10980_v21  ;;  %v11015_v13 = vld [vmem:[#allocation3 + $0x220] sm:$0xff] }
  0xd5   :  { %v409_v22 = vpop.f32.mrf.mxu2  ;;  %v457_v23 = vpop.f32.mrf.mxu3  ;;  %3462 = vmatpush.bf16.msrb.mxu0 %v10955_v35  ;;  %3481 = vmatpush.bf16.msrb.mxu1 %v10963_v36  ;;  %v10907_v35 = vld [vmem:[#allocation2 + $0x70] sm:$0xf0]  ;;  %v11004_v36 = vld [vmem:[#allocation3 + $0x1c8] sm:$0xff] }
  0xd6   :  { %v415_v27 = vpack.c.bf16 %v409_v22, %v409_v22  ;;  %v463_v28 = vpack.c.bf16 %v457_v23, %v457_v23  ;;  %v498_v29 = vpop.f32.mrf.mxu0  ;;  %v546_v30 = vpop.f32.mrf.mxu1 }
  0xd7   :  { %v508_v32 = vpack.c.bf16 %v498_v29, %v498_v29  ;;  %v556_v33 = vpack.c.bf16 %v546_v30, %v546_v30  ;;  %3500 = vmatpush.bf16.msrb.mxu2 %v10971_v38  ;;  %3519 = vmatpush.bf16.msrb.mxu3 %v10979_v39  ;;  %v11013_v29 = vld [vmem:[#allocation3 + $0x210] sm:$0xff]  ;;  %v8419_v30 = vld [vmem:[#allocation2 + $0x8] sm:$0xf] }
  0xd8   :  { %419 = vst [vmem:[#allocation2 + $0x15c] sm:$0xf] %v415_v27  ;;  %8387 = vmatmul.msk.bf16.vlgmr.msra.gmra.mxu0 %vm98_vm0, %v10887_v24  ;;  %8397 = vmatmul.msk.bf16.vlgmr.msra.gmra.mxu1 %vm98_vm0, %v10889_v25  ;;  %v10997_v27 = vld [vmem:[#allocation3 + $0x190] sm:$0xff] }
  0xd9   :  { %467 = vst [vmem:[#allocation2 + $0x160] sm:$0xf] %v463_v28  ;;  %3531 = vmatpush.bf16.msra.mxu0 %v10994_v40  ;;  %3550 = vmatpush.bf16.msra.mxu1 %v11002_v41  ;;  %v11005_v28 = vld [vmem:[#allocation3 + $0x1d0] sm:$0xff]  ;;  %v10894_v40 = vld [vmem:[#allocation2 + $0xc] sm:$0xf] }
  0xda   :  { %512 = vst [vmem:[#allocation2 + $0x20] sm:$0xf] %v508_v32  ;;  %8407 = vmatmul.msk.bf16.vlgmr.msra.gmra.mxu2 %vm98_vm0, %v10891_v31  ;;  %3444 = vmatmul.bf16.vlgmr.msra.gmra.mxu3 %v8412_v37  ;;  %v10893_v31 = vld [vmem:[#allocation2 + $0x4] sm:$0xf]  ;;  %v8413_v32 = vld [vmem:[#allocation2 + $0x6c] sm:$0xf0] }
  0xdb   :  { %560 = vst [vmem:[#allocation2 + $0x24] sm:$0xf] %v556_v33  ;;  %3569 = vmatpush.bf16.msra.mxu2 %v11010_v42  ;;  %3588 = vmatpush.bf16.msra.mxu3 %v11018_v43  ;;  %v10988_v33 = vld [vmem:[#allocation3 + $0x148] sm:$0xff] }
  0xdc   :  { %v11012_v37 = vld [vmem:[#allocation3 + $0x208] sm:$0xff] }
  0xdd   :  { %v594_v44 = vpop.f32.mrf.mxu2  ;;  %v642_v45 = vpop.f32.mrf.mxu3  ;;  %3532 = vmatpush.bf16.msra.mxu0 %v10993_v52  ;;  %3551 = vmatpush.bf16.msra.mxu1 %v11001_v53  ;;  %v8421_v41 = vld [vmem:[#allocation2 + $0x74] sm:$0xf0]  ;;  %v10908_v42 = vld [vmem:[#allocation2 + $0x78] sm:$0xf0] }
  0xde   :  { %v604_v46 = vpack.c.bf16 %v594_v44, %v594_v44  ;;  %v652_v47 = vpack.c.bf16 %v642_v45, %v642_v45  ;;  %v500_v48 = vpop.f32.mrf.mxu0  ;;  %v548_v49 = vpop.f32.mrf.mxu1  ;;  %v8424_v52 = vor.u32 %v10894_v40, %v8421_v41  ;;  %v11038_v40 = vld [vmem:[#allocation3 + $0x2d8] sm:$0xff] }
  0xdf   :  { %v509_v50 = vpack.c.bf16 %v500_v48, %v500_v48  ;;  %v557_v51 = vpack.c.bf16 %v548_v49, %v548_v49  ;;  %3570 = vmatpush.bf16.msra.mxu2 %v11009_v54  ;;  %3589 = vmatpush.bf16.msra.mxu3 %v11017_v55  ;;  %v10987_v54 = vld [vmem:[#allocation3 + $0x140] sm:$0xff]  ;;  %v11046_v41 = vld [vmem:[#allocation3 + $0x318] sm:$0xff] }
  0xe0   :  { %608 = vst [vmem:[#allocation2 + $0x28] sm:$0xf] %v604_v46  ;;  %v10995_v55 = vld [vmem:[#allocation3 + $0x180] sm:$0xff] }
  0xe1   :  { %656 = vst [vmem:[#allocation2 + $0x2c] sm:$0xf] %v652_v47  ;;  %3533 = vmatpush.bf16.msra.mxu0 %v10992_v56  ;;  %3552 = vmatpush.bf16.msra.mxu1 %v11000_v57  ;;  %v8416_v47 = vor.u32 %v10893_v31, %v8413_v32  ;;  %v11003_v56 = vld [vmem:[#allocation3 + $0x1c0] sm:$0xff]  ;;  %v8535_v31 = vld [vmem:[#allocation2 + $0xe8] sm:$0xf] }
  0xe2   :  { %513 = vst [vmem:[#allocation2 + $0x8c] sm:$0xf] %v509_v50  ;;  %v8420_v50 = vor.u32 %v10907_v35, %v8419_v30  ;;  %v11011_v57 = vld [vmem:[#allocation3 + $0x200] sm:$0xff] }
  0xe3   :  { %561 = vst [vmem:[#allocation2 + $0x90] sm:$0xf] %v557_v51  ;;  %3571 = vmatpush.bf16.msra.mxu2 %v11008_v58  ;;  %3590 = vmatpush.bf16.msra.mxu3 %v11016_v59  ;;  %v8427_v51 = vld [vmem:[#allocation2 + $0x10] sm:$0xf]  ;;  %v11026_v58 = vld [vmem:[#allocation3 + $0x278] sm:$0xff] }
  0xe4   :  { %v8428_v53 = vor.u32 %v10908_v42, %v8427_v51  ;;  %v11034_v59 = vld [vmem:[#allocation3 + $0x2b8] sm:$0xff]  ;;  %v11031_v35 = vld [vmem:[#allocation3 + $0x2a0] sm:$0xff]  ;;  %v11029_v51 = vld [vmem:[#allocation3 + $0x290] sm:$0xff] }
  0xe5   :  { %v596_v60 = vpop.f32.mrf.mxu2  ;;  %v644_v61 = vpop.f32.mrf.mxu3  ;;  %3534 = vmatpush.bf16.msra.mxu0 %v10991_v9  ;;  %3553 = vmatpush.bf16.msra.mxu1 %v10999_v10  ;;  %v11049_v9 = vld [vmem:[#allocation3 + $0x330] sm:$0xff]  ;;  %v8521_v10 = vld [vmem:[#allocation2 + $0x144] sm:$0xf0] }
  0xe6   :  { %v605_v1 = vpack.c.bf16 %v596_v60, %v596_v60  ;;  %v653_v2 = vpack.c.bf16 %v644_v61, %v644_v61  ;;  %v503_v3 = vpop.f32.mrf.mxu0  ;;  %v551_v4 = vpop.f32.mrf.mxu1  ;;  %v11042_v60 = vld [vmem:[#allocation3 + $0x2f8] sm:$0xff] }
  0xe7   :  { %v510_v5 = vpack.c.bf16 %v503_v3, %v503_v3  ;;  %v558_v7 = vpack.c.bf16 %v551_v4, %v551_v4  ;;  %3572 = vmatpush.bf16.msra.mxu2 %v11007_v12  ;;  %3591 = vmatpush.bf16.msra.mxu3 %v11015_v13  ;;  %v11050_v61 = vld [vmem:[#allocation3 + $0x338] sm:$0xff]  ;;  %v11024_v12 = vld [vmem:[#allocation3 + $0x268] sm:$0xff] }
  0xe8   :  { %609 = vst [vmem:[#allocation2 + $0x94] sm:$0xf] %v605_v1  ;;  %8388 = vmatmul.msk.bf16.gmra.mxu0 %vm98_vm0, %v10888_v62  ;;  %8398 = vmatmul.msk.bf16.gmra.mxu1 %vm98_vm0, %v10890_v63  ;;  %v11032_v13 = vld [vmem:[#allocation3 + $0x2a8] sm:$0xff] }
  0xe9   :  { %657 = vst [vmem:[#allocation2 + $0x98] sm:$0xf] %v653_v2  ;;  %3535 = vmatpush.bf16.msra.mxu0 %v10990_v14  ;;  %3554 = vmatpush.bf16.msra.mxu1 %v10998_v15  ;;  %v11040_v14 = vld [vmem:[#allocation3 + $0x2e8] sm:$0xff]  ;;  %v8527_v15 = vld [vmem:[#allocation2 + $0xe0] sm:$0xf] }
  0xea   :  { %514 = vst [vmem:[#allocation2 + $0xf8] sm:$0xf] %v510_v5  ;;  %8408 = vmatmul.msk.bf16.gmra.mxu2 %vm98_vm0, %v10892_v6  ;;  %3449 = vmatmul.bf16.gmra.mxu3 %v8520_v11  ;;  %v11025_v5 = vld [vmem:[#allocation3 + $0x270] sm:$0xff]  ;;  %v10920_v11 = vld [vmem:[#allocation2 + $0xdc] sm:$0xf] }
  0xeb   :  { %562 = vst [vmem:[#allocation2 + $0xfc] sm:$0xf] %v558_v7  ;;  %3573 = vmatpush.bf16.msra.mxu2 %v11006_v16  ;;  %3592 = vmatpush.bf16.msra.mxu3 %v11014_v17  ;;  %v11033_v7 = vld [vmem:[#allocation3 + $0x2b0] sm:$0xff]  ;;  %v10934_v16 = vld [vmem:[#allocation2 + $0x148] sm:$0xf0]  ;;  %v11048_v17 = vld [vmem:[#allocation3 + $0x328] sm:$0xff] }
  0xec   :  { %v8528_v30 = vor.u32 %v10934_v16, %v8527_v15  ;;  %v11027_v15 = vld [vmem:[#allocation3 + $0x280] sm:$0xff] }
  0xed   :  { %v599_v18 = vpop.f32.mrf.mxu2  ;;  %v647_v19 = vpop.f32.mrf.mxu3  ;;  %3536 = vmatpush.bf16.msra.mxu0 %v10989_v26  ;;  %3555 = vmatpush.bf16.msra.mxu1 %v10997_v27  ;;  %v8524_v27 = vor.u32 %v10920_v11, %v8521_v10  ;;  %v8443_v11 = vld [vmem:[#allocation2 + $0x20] sm:$0xf]  ;;  %v11035_v16 = vld [vmem:[#allocation3 + $0x2c0] sm:$0xff] }
  0xee   :  { %v606_v20 = vpack.c.bf16 %v599_v18, %v599_v18  ;;  %v654_v21 = vpack.c.bf16 %v647_v19, %v647_v19  ;;  %v505_v22 = vpop.f32.mrf.mxu0  ;;  %v553_v23 = vpop.f32.mrf.mxu1 }
  0xef   :  { %v511_v24 = vpack.c.bf16 %v505_v22, %v505_v22  ;;  %v559_v25 = vpack.c.bf16 %v553_v23, %v553_v23  ;;  %3574 = vmatpush.bf16.msra.mxu2 %v11005_v28  ;;  %3593 = vmatpush.bf16.msra.mxu3 %v11013_v29  ;;  %v10935_v22 = vld [vmem:[#allocation2 + $0x150] sm:$0xf0] }
  0xf0   :  { %610 = vst [vmem:[#allocation2 + $0x100] sm:$0xf] %v606_v20  ;;  %v10921_v20 = vld [vmem:[#allocation2 + $0xe4] sm:$0xf] }
  0xf1   :  { %658 = vst [vmem:[#allocation2 + $0x104] sm:$0xf] %v654_v21  ;;  %3537 = vmatpush.bf16.msra.mxu0 %v10988_v33  ;;  %3556 = vmatpush.bf16.msra.mxu1 %v10996_v34  ;;  %v8529_v21 = vld [vmem:[#allocation2 + $0x14c] sm:$0xf0]  ;;  %v8536_v33 = vor.u32 %v10935_v22, %v8535_v31  ;;  %v11065_v31 = vld [vmem:[#allocation3 + $0x3b0] sm:$0xff] }
  0xf2   :  { %515 = vst [vmem:[#allocation2 + $0x164] sm:$0xf] %v511_v24  ;;  %v8532_v32 = vor.u32 %v10921_v20, %v8529_v21  ;;  %v11023_v34 = vld [vmem:[#allocation3 + $0x260] sm:$0xff]  ;;  %v11074_v20 = vld [vmem:[#allocation3 + $0x3f8] sm:$0xff] }
  0xf3   :  { %563 = vst [vmem:[#allocation2 + $0x168] sm:$0xf] %v559_v25  ;;  %3575 = vmatpush.bf16.msra.mxu2 %v11004_v36  ;;  %3594 = vmatpush.bf16.msra.mxu3 %v11012_v37  ;;  %v11039_v36 = vld [vmem:[#allocation3 + $0x2e0] sm:$0xff]  ;;  %v11082_v21 = vld [vmem:[#allocation3 + $0x438] sm:$0xff] }
  0xf4   :  { %v11047_v37 = vld [vmem:[#allocation3 + $0x320] sm:$0xff] }
  0xf5   :  { %v601_v38 = vpop.f32.mrf.mxu2  ;;  %v649_v39 = vpop.f32.mrf.mxu3  ;;  %3538 = vmatpush.bf16.msra.mxu0 %v10987_v54  ;;  %3557 = vmatpush.bf16.msra.mxu1 %v10995_v55  ;;  %v8435_v54 = vld [vmem:[#allocation2 + $0x18] sm:$0xf]  ;;  %v10895_v55 = vld [vmem:[#allocation2 + $0x14] sm:$0xf] }
  0xf6   :  { %v607_v43 = vpack.c.bf16 %v601_v38, %v601_v38  ;;  %v655_v44 = vpack.c.bf16 %v649_v39, %v649_v39  ;;  %v690_v45 = vpop.f32.mrf.mxu0  ;;  %v738_v46 = vpop.f32.mrf.mxu1  ;;  %v11022_v38 = vld [vmem:[#allocation3 + $0x258] sm:$0xff] }
  0xf7   :  { %v700_v48 = vpack.c.bf16 %v690_v45, %v690_v45  ;;  %v748_v49 = vpack.c.bf16 %v738_v46, %v738_v46  ;;  %3576 = vmatpush.bf16.msra.mxu2 %v11003_v56  ;;  %3595 = vmatpush.bf16.msra.mxu3 %v11011_v57  ;;  %v11030_v39 = vld [vmem:[#allocation3 + $0x298] sm:$0xff]  ;;  %v8429_v56 = vld [vmem:[#allocation2 + $0x7c] sm:$0xf0]  ;;  %v11020_v57 = vld [vmem:[#allocation3 + $0x248] sm:$0xff] }
  0xf8   :  { %611 = vst [vmem:[#allocation2 + $0x16c] sm:$0xf] %v607_v43  ;;  %3463 = vmatmul.bf16.vlgmr.msrb.gmra.mxu0 %v8416_v47  ;;  %3482 = vmatmul.bf16.vlgmr.msrb.gmra.mxu1 %v8420_v50  ;;  %v11021_v50 = vld [vmem:[#allocation3 + $0x250] sm:$0xff] }
  0xf9   :  { %659 = vst [vmem:[#allocation2 + $0x170] sm:$0xf] %v655_v44  ;;  %3607 = vmatpush.bf16.msrb.mxu0 %v11026_v58  ;;  %3626 = vmatpush.bf16.msrb.mxu1 %v11034_v59  ;;  %v11028_v58 = vld [vmem:[#allocation3 + $0x288] sm:$0xff]  ;;  %v10909_v59 = vld [vmem:[#allocation2 + $0x80] sm:$0xf0] }
  0xfa   :  { %704 = vst [vmem:[#allocation2 + $0x30] sm:$0xf] %v700_v48  ;;  %3501 = vmatmul.bf16.vlgmr.msrb.gmra.mxu2 %v8424_v52  ;;  %3520 = vmatmul.bf16.vlgmr.msrb.gmra.mxu3 %v8428_v53  ;;  %v11037_v52 = vld [vmem:[#allocation3 + $0x2d0] sm:$0xff]  ;;  %v8436_v10 = vor.u32 %v10909_v59, %v8435_v54  ;;  %v11063_v59 = vld [vmem:[#allocation3 + $0x3a0] sm:$0xff] }
  0xfb   :  { %752 = vst [vmem:[#allocation2 + $0x34] sm:$0xf] %v748_v49  ;;  %3645 = vmatpush.bf16.msrb.mxu2 %v11042_v60  ;;  %3664 = vmatpush.bf16.msrb.mxu3 %v11050_v61  ;;  %v11045_v53 = vld [vmem:[#allocation3 + $0x310] sm:$0xff]  ;;  %v11036_v60 = vld [vmem:[#allocation3 + $0x2c8] sm:$0xff] }
  0xfc   :  { %v11044_v61 = vld [vmem:[#allocation3 + $0x308] sm:$0xff] }
  0xfd   :  { %v786_v62 = vpop.f32.mrf.mxu2  ;;  %v834_v63 = vpop.f32.mrf.mxu3  ;;  %3608 = vmatpush.bf16.msrb.mxu0 %v11025_v5  ;;  %3627 = vmatpush.bf16.msrb.mxu1 %v11033_v7  ;;  %v8432_v7 = vor.u32 %v10895_v55, %v8429_v56  ;;  %v8551_v55 = vld [vmem:[#allocation2 + $0xf8] sm:$0xf] }
  0xfe   :  { %v796_v0 = vpack.c.bf16 %v786_v62, %v786_v62  ;;  %v844_v1 = vpack.c.bf16 %v834_v63, %v834_v63  ;;  %v692_v2 = vpop.f32.mrf.mxu0  ;;  %v740_v3 = vpop.f32.mrf.mxu1 }
  0xff   :  { %v701_v4 = vpack.c.bf16 %v692_v2, %v692_v2  ;;  %v749_v6 = vpack.c.bf16 %v740_v3, %v740_v3  ;;  %3646 = vmatpush.bf16.msrb.mxu2 %v11041_v8  ;;  %3665 = vmatpush.bf16.msrb.mxu3 %v11049_v9  ;;  %v10910_v2 = vld [vmem:[#allocation2 + $0x88] sm:$0xf0] }
 0x100   :  { %800 = vst [vmem:[#allocation2 + $0x38] sm:$0xf] %v796_v0  ;;  %v10896_v0 = vld [vmem:[#allocation2 + $0x1c] sm:$0xf] }
 0x101   :  { %848 = vst [vmem:[#allocation2 + $0x3c] sm:$0xf] %v844_v1  ;;  %3609 = vmatpush.bf16.msrb.mxu0 %v11024_v12  ;;  %3628 = vmatpush.bf16.msrb.mxu1 %v11032_v13  ;;  %v8437_v1 = vld [vmem:[#allocation2 + $0x84] sm:$0xf0]  ;;  %v8444_v13 = vor.u32 %v10910_v2, %v8443_v11  ;;  %v11061_v11 = vld [vmem:[#allocation3 + $0x390] sm:$0xff] }
 0x102   :  { %705 = vst [vmem:[#allocation2 + $0x9c] sm:$0xf] %v701_v4  ;;  %v8440_v12 = vor.u32 %v10896_v0, %v8437_v1  ;;  %v11070_v0 = vld [vmem:[#allocation3 + $0x3d8] sm:$0xff] }
 0x103   :  { %753 = vst [vmem:[#allocation2 + $0xa0] sm:$0xf] %v749_v6  ;;  %3647 = vmatpush.bf16.msrb.mxu2 %v11040_v14  ;;  %3666 = vmatpush.bf16.msrb.mxu3 %v11048_v17  ;;  %v11019_v14 = vld [vmem:[#allocation3 + $0x240] sm:$0xff]  ;;  %v11078_v1 = vld [vmem:[#allocation3 + $0x418] sm:$0xff] }
 0x104   :  { %v11043_v17 = vld [vmem:[#allocation3 + $0x300] sm:$0xff] }
 0x105   :  { %v788_v18 = vpop.f32.mrf.mxu2  ;;  %v836_v19 = vpop.f32.mrf.mxu3  ;;  %3610 = vmatpush.bf16.msrb.mxu0 %v11023_v34  ;;  %3629 = vmatpush.bf16.msrb.mxu1 %v11031_v35  ;;  %v8537_v34 = vld [vmem:[#allocation2 + $0x154] sm:$0xf0]  ;;  %v10922_v35 = vld [vmem:[#allocation2 + $0xec] sm:$0xf] }
 0x106   :  { %v797_v23 = vpack.c.bf16 %v788_v18, %v788_v18  ;;  %v845_v24 = vpack.c.bf16 %v836_v19, %v836_v19  ;;  %v695_v25 = vpop.f32.mrf.mxu0  ;;  %v743_v26 = vpop.f32.mrf.mxu1  ;;  %v11058_v18 = vld [vmem:[#allocation3 + $0x378] sm:$0xff] }
 0x107   :  { %v702_v28 = vpack.c.bf16 %v695_v25, %v695_v25  ;;  %v750_v29 = vpack.c.bf16 %v743_v26, %v743_v26  ;;  %3648 = vmatpush.bf16.msrb.mxu2 %v11039_v36  ;;  %3667 = vmatpush.bf16.msrb.mxu3 %v11047_v37  ;;  %v11066_v19 = vld [vmem:[#allocation3 + $0x3b8] sm:$0xff]  ;;  %v11056_v36 = vld [vmem:[#allocation3 + $0x368] sm:$0xff] }
 0x108   :  { %801 = vst [vmem:[#allocation2 + $0xa4] sm:$0xf] %v797_v23  ;;  %3468 = vmatmul.bf16.gmra.mxu0 %v8524_v27  ;;  %3487 = vmatmul.bf16.gmra.mxu1 %v8528_v30  ;;  %v11057_v30 = vld [vmem:[#allocation3 + $0x370] sm:$0xff]  ;;  %v11064_v37 = vld [vmem:[#allocation3 + $0x3a8] sm:$0xff] }
 0x109   :  { %849 = vst [vmem:[#allocation2 + $0xa8] sm:$0xf] %v845_v24  ;;  %3611 = vmatpush.bf16.msrb.mxu0 %v11022_v38  ;;  %3630 = vmatpush.bf16.msrb.mxu1 %v11030_v39  ;;  %v11072_v38 = vld [vmem:[#allocation3 + $0x3e8] sm:$0xff]  ;;  %v8543_v39 = vld [vmem:[#allocation2 + $0xf0] sm:$0xf] }
 0x10a   :  { %706 = vst [vmem:[#allocation2 + $0x108] sm:$0xf] %v702_v28  ;;  %3506 = vmatmul.bf16.gmra.mxu2 %v8532_v32  ;;  %3525 = vmatmul.bf16.gmra.mxu3 %v8536_v33  ;;  %v11073_v32 = vld [vmem:[#allocation3 + $0x3f0] sm:$0xff] }
 0x10b   :  { %754 = vst [vmem:[#allocation2 + $0x10c] sm:$0xf] %v750_v29  ;;  %3649 = vmatpush.bf16.msrb.mxu2 %v11038_v40  ;;  %3668 = vmatpush.bf16.msrb.mxu3 %v11046_v41  ;;  %v11081_v33 = vld [vmem:[#allocation3 + $0x430] sm:$0xff]  ;;  %v10936_v40 = vld [vmem:[#allocation2 + $0x158] sm:$0xf0] }
 0x10c   :  { %v11080_v41 = vld [vmem:[#allocation3 + $0x428] sm:$0xff]  ;;  %v8544_v54 = vor.u32 %v10936_v40, %v8543_v39  ;;  %v11059_v39 = vld [vmem:[#allocation3 + $0x380] sm:$0xff] }
 0x10d   :  { %v791_v42 = vpop.f32.mrf.mxu2  ;;  %v839_v43 = vpop.f32.mrf.mxu3  ;;  %3612 = vmatpush.bf16.msrb.mxu0 %v11021_v50  ;;  %3631 = vmatpush.bf16.msrb.mxu1 %v11029_v51  ;;  %v8540_v51 = vor.u32 %v10922_v35, %v8537_v34  ;;  %v8459_v35 = vld [vmem:[#allocation2 + $0x30] sm:$0xf] }
 0x10e   :  { %v798_v44 = vpack.c.bf16 %v791_v42, %v791_v42  ;;  %v846_v45 = vpack.c.bf16 %v839_v43, %v839_v43  ;;  %v697_v46 = vpop.f32.mrf.mxu0  ;;  %v745_v47 = vpop.f32.mrf.mxu1  ;;  %v11067_v40 = vld [vmem:[#allocation3 + $0x3c0] sm:$0xff] }
 0x10f   :  { %v703_v48 = vpack.c.bf16 %v697_v46, %v697_v46  ;;  %v751_v49 = vpack.c.bf16 %v745_v47, %v745_v47  ;;  %3650 = vmatpush.bf16.msrb.mxu2 %v11037_v52  ;;  %3669 = vmatpush.bf16.msrb.mxu3 %v11045_v53  ;;  %v10937_v46 = vld [vmem:[#allocation2 + $0x160] sm:$0xf0] }
 0x110   :  { %802 = vst [vmem:[#allocation2 + $0x110] sm:$0xf] %v798_v44  ;;  %v10923_v44 = vld [vmem:[#allocation2 + $0xf4] sm:$0xf] }
 0x111   :  { %850 = vst [vmem:[#allocation2 + $0x114] sm:$0xf] %v846_v45  ;;  %3613 = vmatpush.bf16.msrb.mxu0 %v11020_v57  ;;  %3632 = vmatpush.bf16.msrb.mxu1 %v11028_v58  ;;  %v8545_v45 = vld [vmem:[#allocation2 + $0x15c] sm:$0xf0]  ;;  %v8552_v57 = vor.u32 %v10937_v46, %v8551_v55  ;;  %v11055_v58 = vld [vmem:[#allocation3 + $0x360] sm:$0xff] }
 0x112   :  { %707 = vst [vmem:[#allocation2 + $0x174] sm:$0xf] %v703_v48  ;;  %v8548_v56 = vor.u32 %v10923_v44, %v8545_v45  ;;  %v11106_v44 = vld [vmem:[#allocation3 + $0x4f8] sm:$0xff]  ;;  %v11097_v55 = vld [vmem:[#allocation3 + $0x4b0] sm:$0xff] }
 0x113   :  { %755 = vst [vmem:[#allocation2 + $0x178] sm:$0xf] %v751_v49  ;;  %3651 = vmatpush.bf16.msrb.mxu2 %v11036_v60  ;;  %3670 = vmatpush.bf16.msrb.mxu3 %v11044_v61  ;;  %v11071_v60 = vld [vmem:[#allocation3 + $0x3e0] sm:$0xff]  ;;  %v11114_v45 = vld [vmem:[#allocation3 + $0x538] sm:$0xff] }
 0x114   :  { %v11079_v61 = vld [vmem:[#allocation3 + $0x420] sm:$0xff] }
 0x115   :  { %v793_v62 = vpop.f32.mrf.mxu2  ;;  %v841_v63 = vpop.f32.mrf.mxu3  ;;  %3614 = vmatpush.bf16.msrb.mxu0 %v11019_v14  ;;  %3633 = vmatpush.bf16.msrb.mxu1 %v11027_v15  ;;  %v8451_v14 = vld [vmem:[#allocation2 + $0x28] sm:$0xf]  ;;  %v10897_v15 = vld [vmem:[#allocation2 + $0x24] sm:$0xf] }
 0x116   :  { %v799_v3 = vpack.c.bf16 %v793_v62, %v793_v62  ;;  %v847_v4 = vpack.c.bf16 %v841_v63, %v841_v63  ;;  %v882_v6 = vpop.f32.mrf.mxu0  ;;  %v930_v5 = vpop.f32.mrf.mxu1  ;;  %v11054_v62 = vld [vmem:[#allocation3 + $0x358] sm:$0xff] }
 0x117   :  { %v892_v8 = vpack.c.bf16 %v882_v6, %v882_v6  ;;  %v940_v9 = vpack.c.bf16 %v930_v5, %v930_v5  ;;  %3652 = vmatpush.bf16.msrb.mxu2 %v11035_v16  ;;  %3671 = vmatpush.bf16.msrb.mxu3 %v11043_v17  ;;  %v11062_v63 = vld [vmem:[#allocation3 + $0x398] sm:$0xff]  ;;  %v8445_v16 = vld [vmem:[#allocation2 + $0x8c] sm:$0xf0]  ;;  %v11052_v17 = vld [vmem:[#allocation3 + $0x348] sm:$0xff] }
 0x118   :  { %803 = vst [vmem:[#allocation2 + $0x17c] sm:$0xf] %v799_v3  ;;  %3539 = vmatmul.bf16.vlgmr.msra.gmra.mxu0 %v8432_v7  ;;  %3558 = vmatmul.bf16.vlgmr.msra.gmra.mxu1 %v8436_v10  ;;  %v11053_v10 = vld [vmem:[#allocation3 + $0x350] sm:$0xff] }
 0x119   :  { %851 = vst [vmem:[#allocation2 + $0x180] sm:$0xf] %v847_v4  ;;  %3683 = vmatpush.bf16.msra.mxu0 %v11058_v18  ;;  %3702 = vmatpush.bf16.msra.mxu1 %v11066_v19  ;;  %v11060_v18 = vld [vmem:[#allocation3 + $0x388] sm:$0xff]  ;;  %v10911_v19 = vld [vmem:[#allocation2 + $0x90] sm:$0xf0] }
 0x11a   :  { %896 = vst [vmem:[#allocation2 + $0x40] sm:$0xf] %v892_v8  ;;  %3577 = vmatmul.bf16.vlgmr.msra.gmra.mxu2 %v8440_v12  ;;  %3596 = vmatmul.bf16.vlgmr.msra.gmra.mxu3 %v8444_v13  ;;  %v11069_v12 = vld [vmem:[#allocation3 + $0x3d0] sm:$0xff]  ;;  %v8452_v34 = vor.u32 %v10911_v19, %v8451_v14  ;;  %v11095_v19 = vld [vmem:[#allocation3 + $0x4a0] sm:$0xff] }
 0x11b   :  { %944 = vst [vmem:[#allocation2 + $0x44] sm:$0xf] %v940_v9  ;;  %3721 = vmatpush.bf16.msra.mxu2 %v11074_v20  ;;  %3740 = vmatpush.bf16.msra.mxu3 %v11082_v21  ;;  %v11077_v13 = vld [vmem:[#allocation3 + $0x410] sm:$0xff]  ;;  %v11068_v20 = vld [vmem:[#allocation3 + $0x3c8] sm:$0xff] }
 0x11c   :  { %v11076_v21 = vld [vmem:[#allocation3 + $0x408] sm:$0xff] }
 0x11d   :  { %v978_v22 = vpop.f32.mrf.mxu2  ;;  %v1026_v23 = vpop.f32.mrf.mxu3  ;;  %3684 = vmatpush.bf16.msra.mxu0 %v11057_v30  ;;  %3703 = vmatpush.bf16.msra.mxu1 %v11065_v31  ;;  %v8448_v31 = vor.u32 %v10897_v15, %v8445_v16  ;;  %v8567_v15 = vld [vmem:[#allocation2 + $0x108] sm:$0xf] }
 0x11e   :  { %v988_v24 = vpack.c.bf16 %v978_v22, %v978_v22  ;;  %v1036_v25 = vpack.c.bf16 %v1026_v23, %v1026_v23  ;;  %v884_v26 = vpop.f32.mrf.mxu0  ;;  %v932_v27 = vpop.f32.mrf.mxu1 }
 0x11f   :  { %v893_v28 = vpack.c.bf16 %v884_v26, %v884_v26  ;;  %v941_v29 = vpack.c.bf16 %v932_v27, %v932_v27  ;;  %3722 = vmatpush.bf16.msra.mxu2 %v11073_v32  ;;  %3741 = vmatpush.bf16.msra.mxu3 %v11081_v33  ;;  %v10912_v26 = vld [vmem:[#allocation2 + $0x98] sm:$0xf0] }
 0x120   :  { %992 = vst [vmem:[#allocation2 + $0x48] sm:$0xf] %v988_v24  ;;  %v10898_v24 = vld [vmem:[#allocation2 + $0x2c] sm:$0xf] }
 0x121   :  { %1040 = vst [vmem:[#allocation2 + $0x4c] sm:$0xf] %v1036_v25  ;;  %3685 = vmatpush.bf16.msra.mxu0 %v11056_v36  ;;  %3704 = vmatpush.bf16.msra.mxu1 %v11064_v37  ;;  %v8453_v25 = vld [vmem:[#allocation2 + $0x94] sm:$0xf0]  ;;  %v8460_v37 = vor.u32 %v10912_v26, %v8459_v35  ;;  %v11093_v35 = vld [vmem:[#allocation3 + $0x490] sm:$0xff] }
 0x122   :  { %897 = vst [vmem:[#allocation2 + $0xac] sm:$0xf] %v893_v28  ;;  %v8456_v36 = vor.u32 %v10898_v24, %v8453_v25  ;;  %v11102_v24 = vld [vmem:[#allocation3 + $0x4d8] sm:$0xff] }
 0x123   :  { %945 = vst [vmem:[#allocation2 + $0xb0] sm:$0xf] %v941_v29  ;;  %3723 = vmatpush.bf16.msra.mxu2 %v11072_v38  ;;  %3742 = vmatpush.bf16.msra.mxu3 %v11080_v41  ;;  %v11051_v38 = vld [vmem:[#allocation3 + $0x340] sm:$0xff]  ;;  %v11110_v25 = vld [vmem:[#allocation3 + $0x518] sm:$0xff] }
 0x124   :  { %v11075_v41 = vld [vmem:[#allocation3 + $0x400] sm:$0xff] }
 0x125   :  { %v980_v42 = vpop.f32.mrf.mxu2  ;;  %v1028_v43 = vpop.f32.mrf.mxu3  ;;  %3686 = vmatpush.bf16.msra.mxu0 %v11055_v58  ;;  %3705 = vmatpush.bf16.msra.mxu1 %v11063_v59  ;;  %v11088_v58 = vld [vmem:[#allocation3 + $0x468] sm:$0xff] }
 0x126   :  { %v989_v47 = vpack.c.bf16 %v980_v42, %v980_v42  ;;  %v1037_v48 = vpack.c.bf16 %v1028_v43, %v1028_v43  ;;  %v887_v49 = vpop.f32.mrf.mxu0  ;;  %v935_v50 = vpop.f32.mrf.mxu1  ;;  %v11090_v42 = vld [vmem:[#allocation3 + $0x478] sm:$0xff]  ;;  %v11096_v59 = vld [vmem:[#allocation3 + $0x4a8] sm:$0xff] }
 0x127   :  { %v894_v52 = vpack.c.bf16 %v887_v49, %v887_v49  ;;  %v942_v53 = vpack.c.bf16 %v935_v50, %v935_v50  ;;  %3724 = vmatpush.bf16.msra.mxu2 %v11071_v60  ;;  %3743 = vmatpush.bf16.msra.mxu3 %v11079_v61  ;;  %v11098_v43 = vld [vmem:[#allocation3 + $0x4b8] sm:$0xff]  ;;  %v11104_v61 = vld [vmem:[#allocation3 + $0x4e8] sm:$0xff] }
 0x128   :  { %993 = vst [vmem:[#allocation2 + $0xb4] sm:$0xf] %v989_v47  ;;  %3544 = vmatmul.bf16.gmra.mxu0 %v8540_v51  ;;  %3563 = vmatmul.bf16.gmra.mxu1 %v8544_v54  ;;  %v11089_v54 = vld [vmem:[#allocation3 + $0x470] sm:$0xff]  ;;  %v8553_v60 = vld [vmem:[#allocation2 + $0x164] sm:$0xf0] }
 0x129   :  { %1041 = vst [vmem:[#allocation2 + $0xb8] sm:$0xf] %v1037_v48  ;;  %3687 = vmatpush.bf16.msra.mxu0 %v11054_v62  ;;  %3706 = vmatpush.bf16.msra.mxu1 %v11062_v63  ;;  %v11112_v62 = vld [vmem:[#allocation3 + $0x528] sm:$0xff] }
 0x12a   :  { %898 = vst [vmem:[#allocation2 + $0x118] sm:$0xf] %v894_v52  ;;  %3582 = vmatmul.bf16.gmra.mxu2 %v8548_v56  ;;  %3601 = vmatmul.bf16.gmra.mxu3 %v8552_v57  ;;  %v11105_v56 = vld [vmem:[#allocation3 + $0x4f0] sm:$0xff]  ;;  %v10924_v63 = vld [vmem:[#allocation2 + $0xfc] sm:$0xf] }
 0x12b   :  { %946 = vst [vmem:[#allocation2 + $0x11c] sm:$0xf] %v942_v53  ;;  %3725 = vmatpush.bf16.msra.mxu2 %v11070_v0  ;;  %3744 = vmatpush.bf16.msra.mxu3 %v11078_v1  ;;  %v11113_v57 = vld [vmem:[#allocation3 + $0x530] sm:$0xff]  ;;  %v10938_v1 = vld [vmem:[#allocation2 + $0x168] sm:$0xf0] }
 0x12c   :  { %v8559_v0 = vld [vmem:[#allocation2 + $0x100] sm:$0xf] }
 0x12d   :  { %v983_v2 = vpop.f32.mrf.mxu2  ;;  %v1031_v3 = vpop.f32.mrf.mxu3  ;;  %3688 = vmatpush.bf16.msra.mxu0 %v11053_v10  ;;  %3707 = vmatpush.bf16.msra.mxu1 %v11061_v11  ;;  %v8556_v11 = vor.u32 %v10924_v63, %v8553_v60  ;;  %v8560_v14 = vor.u32 %v10938_v1, %v8559_v0  ;;  %v11091_v63 = vld [vmem:[#allocation3 + $0x480] sm:$0xff] }
 0x12e   :  { %v990_v4 = vpack.c.bf16 %v983_v2, %v983_v2  ;;  %v1038_v6 = vpack.c.bf16 %v1031_v3, %v1031_v3  ;;  %v889_v5 = vpop.f32.mrf.mxu0  ;;  %v937_v7 = vpop.f32.mrf.mxu1  ;;  %v11099_v0 = vld [vmem:[#allocation3 + $0x4c0] sm:$0xff] }
 0x12f   :  { %v895_v8 = vpack.c.bf16 %v889_v5, %v889_v5  ;;  %v943_v9 = vpack.c.bf16 %v937_v7, %v937_v7  ;;  %3726 = vmatpush.bf16.msra.mxu2 %v11069_v12  ;;  %3745 = vmatpush.bf16.msra.mxu3 %v11077_v13  ;;  %v10939_v5 = vld [vmem:[#allocation2 + $0x170] sm:$0xf0] }
 0x130   :  { %994 = vst [vmem:[#allocation2 + $0x120] sm:$0xf] %v990_v4  ;;  %v10925_v4 = vld [vmem:[#allocation2 + $0x104] sm:$0xf]  ;;  %v11107_v1 = vld [vmem:[#allocation3 + $0x500] sm:$0xff] }
 0x131   :  { %1042 = vst [vmem:[#allocation2 + $0x124] sm:$0xf] %v1038_v6  ;;  %3689 = vmatpush.bf16.msra.mxu0 %v11052_v17  ;;  %3708 = vmatpush.bf16.msra.mxu1 %v11060_v18  ;;  %v8561_v6 = vld [vmem:[#allocation2 + $0x16c] sm:$0xf0]  ;;  %v8568_v17 = vor.u32 %v10939_v5, %v8567_v15  ;;  %v11137_v15 = vld [vmem:[#allocation3 + $0x5f0] sm:$0xff] }
 0x132   :  { %899 = vst [vmem:[#allocation2 + $0x184] sm:$0xf] %v895_v8  ;;  %v8564_v16 = vor.u32 %v10925_v4, %v8561_v6  ;;  %v11087_v18 = vld [vmem:[#allocation3 + $0x460] sm:$0xff]  ;;  %v11138_v4 = vld [vmem:[#allocation3 + $0x5f8] sm:$0xff] }
 0x133   :  { %947 = vst [vmem:[#allocation2 + $0x188] sm:$0xf] %v943_v9  ;;  %3727 = vmatpush.bf16.msra.mxu2 %v11068_v20  ;;  %3746 = vmatpush.bf16.msra.mxu3 %v11076_v21  ;;  %v11103_v20 = vld [vmem:[#allocation3 + $0x4e0] sm:$0xff]  ;;  %v11146_v6 = vld [vmem:[#allocation3 + $0x638] sm:$0xff] }
 0x134   :  { %v11111_v21 = vld [vmem:[#allocation3 + $0x520] sm:$0xff] }
 0x135   :  { %v985_v22 = vpop.f32.mrf.mxu2  ;;  %v1033_v23 = vpop.f32.mrf.mxu3  ;;  %3690 = vmatpush.bf16.msra.mxu0 %v11051_v38  ;;  %3709 = vmatpush.bf16.msra.mxu1 %v11059_v39  ;;  %v8467_v38 = vld [vmem:[#allocation2 + $0x38] sm:$0xf]  ;;  %v10899_v39 = vld [vmem:[#allocation2 + $0x34] sm:$0xf] }
 0x136   :  { %v991_v27 = vpack.c.bf16 %v985_v22, %v985_v22  ;;  %v1039_v28 = vpack.c.bf16 %v1033_v23, %v1033_v23  ;;  %v1074_v29 = vpop.f32.mrf.mxu0  ;;  %v1122_v30 = vpop.f32.mrf.mxu1  ;;  %v11086_v22 = vld [vmem:[#allocation3 + $0x458] sm:$0xff] }
 0x137   :  { %v1084_v32 = vpack.c.bf16 %v1074_v29, %v1074_v29  ;;  %v1132_v33 = vpack.c.bf16 %v1122_v30, %v1122_v30  ;;  %3728 = vmatpush.bf16.msra.mxu2 %v11067_v40  ;;  %3747 = vmatpush.bf16.msra.mxu3 %v11075_v41  ;;  %v11094_v23 = vld [vmem:[#allocation3 + $0x498] sm:$0xff]  ;;  %v8461_v40 = vld [vmem:[#allocation2 + $0x9c] sm:$0xf0]  ;;  %v11084_v41 = vld [vmem:[#allocation3 + $0x448] sm:$0xff] }
 0x138   :  { %995 = vst [vmem:[#allocation2 + $0x18c] sm:$0xf] %v991_v27  ;;  %3615 = vmatmul.bf16.vlgmr.msrb.gmra.mxu0 %v8448_v31  ;;  %3634 = vmatmul.bf16.vlgmr.msrb.gmra.mxu1 %v8452_v34  ;;  %v11085_v34 = vld [vmem:[#allocation3 + $0x450] sm:$0xff] }
 0x139   :  { %1043 = vst [vmem:[#allocation2 + $0x190] sm:$0xf] %v1039_v28  ;;  %3759 = vmatpush.bf16.msrb.mxu0 %v11090_v42  ;;  %3778 = vmatpush.bf16.msrb.mxu1 %v11098_v43  ;;  %v11092_v42 = vld [vmem:[#allocation3 + $0x488] sm:$0xff]  ;;  %v10913_v43 = vld [vmem:[#allocation2 + $0xa0] sm:$0xf0] }
 0x13a   :  { %1088 = vst [vmem:[#allocation2 + $0x50] sm:$0xf] %v1084_v32  ;;  %3653 = vmatmul.bf16.vlgmr.msrb.gmra.mxu2 %v8456_v36  ;;  %3672 = vmatmul.bf16.vlgmr.msrb.gmra.mxu3 %v8460_v37  ;;  %v11101_v36 = vld [vmem:[#allocation3 + $0x4d0] sm:$0xff] }
 0x13b   :  { %1136 = vst [vmem:[#allocation2 + $0x54] sm:$0xf] %v1132_v33  ;;  %3797 = vmatpush.bf16.msrb.mxu2 %v11106_v44  ;;  %3816 = vmatpush.bf16.msrb.mxu3 %v11114_v45  ;;  %v11109_v37 = vld [vmem:[#allocation3 + $0x510] sm:$0xff]  ;;  %v11100_v44 = vld [vmem:[#allocation3 + $0x4c8] sm:$0xff] }
 0x13c   :  { %v11108_v45 = vld [vmem:[#allocation3 + $0x508] sm:$0xff] }
 0x13d   :  { %v1170_v46 = vpop.f32.mrf.mxu2  ;;  %v1218_v47 = vpop.f32.mrf.mxu3  ;;  %3760 = vmatpush.bf16.msrb.mxu0 %v11089_v54  ;;  %3779 = vmatpush.bf16.msrb.mxu1 %v11097_v55  ;;  %v8464_v55 = vor.u32 %v10899_v39, %v8461_v40  ;;  %v11119_v40 = vld [vmem:[#allocation3 + $0x560] sm:$0xff] }
 0x13e   :  { %v1180_v48 = vpack.c.bf16 %v1170_v46, %v1170_v46  ;;  %v1228_v49 = vpack.c.bf16 %v1218_v47, %v1218_v47  ;;  %v1076_v50 = vpop.f32.mrf.mxu0  ;;  %v1124_v51 = vpop.f32.mrf.mxu1 }
 0x13f   :  { %v1085_v52 = vpack.c.bf16 %v1076_v50, %v1076_v50  ;;  %v1133_v53 = vpack.c.bf16 %v1124_v51, %v1124_v51  ;;  %3798 = vmatpush.bf16.msrb.mxu2 %v11105_v56  ;;  %3817 = vmatpush.bf16.msrb.mxu3 %v11113_v57  ;;  %v10914_v50 = vld [vmem:[#allocation2 + $0xa8] sm:$0xf0] }
 0x140   :  { %1184 = vst [vmem:[#allocation2 + $0x58] sm:$0xf] %v1180_v48  ;;  %v10900_v48 = vld [vmem:[#allocation2 + $0x3c] sm:$0xf] }
 0x141   :  { %1232 = vst [vmem:[#allocation2 + $0x5c] sm:$0xf] %v1228_v49  ;;  %3761 = vmatpush.bf16.msrb.mxu0 %v11088_v58  ;;  %3780 = vmatpush.bf16.msrb.mxu1 %v11096_v59  ;;  %v8469_v49 = vld [vmem:[#allocation2 + $0xa4] sm:$0xf0]  ;;  %v8468_v58 = vor.u32 %v10913_v43, %v8467_v38  ;;  %v8475_v59 = vld [vmem:[#allocation2 + $0x40] sm:$0xf] }
 0x142   :  { %1089 = vst [vmem:[#allocation2 + $0xbc] sm:$0xf] %v1085_v52  ;;  %v8472_v60 = vor.u32 %v10900_v48, %v8469_v49  ;;  %v11143_v43 = vld [vmem:[#allocation3 + $0x620] sm:$0xff] }
 0x143   :  { %1137 = vst [vmem:[#allocation2 + $0xc0] sm:$0xf] %v1133_v53  ;;  %3799 = vmatpush.bf16.msrb.mxu2 %v11104_v61  ;;  %3818 = vmatpush.bf16.msrb.mxu3 %v11112_v62  ;;  %v8476_v61 = vor.u32 %v10914_v50, %v8475_v59  ;;  %v11083_v62 = vld [vmem:[#allocation3 + $0x440] sm:$0xff]  ;;  %v8483_v59 = vld [vmem:[#allocation2 + $0x48] sm:$0xf] }
 0x145   :  { %v1172_v2 = vpop.f32.mrf.mxu2  ;;  %v1220_v3 = vpop.f32.mrf.mxu3  ;;  %3762 = vmatpush.bf16.msrb.mxu0 %v11087_v18  ;;  %3781 = vmatpush.bf16.msrb.mxu1 %v11095_v19  ;;  %v11128_v18 = vld [vmem:[#allocation3 + $0x5a8] sm:$0xff] }
 0x146   :  { %v1181_v7 = vpack.c.bf16 %v1172_v2, %v1172_v2  ;;  %v1229_v8 = vpack.c.bf16 %v1220_v3, %v1220_v3  ;;  %v1079_v9 = vpop.f32.mrf.mxu0  ;;  %v1127_v10 = vpop.f32.mrf.mxu1  ;;  %v11122_v2 = vld [vmem:[#allocation3 + $0x578] sm:$0xff]  ;;  %v8569_v19 = vld [vmem:[#allocation2 + $0x174] sm:$0xf0] }
 0x147   :  { %v1086_v12 = vpack.c.bf16 %v1079_v9, %v1079_v9  ;;  %v1134_v13 = vpack.c.bf16 %v1127_v10, %v1127_v10  ;;  %3800 = vmatpush.bf16.msrb.mxu2 %v11103_v20  ;;  %3819 = vmatpush.bf16.msrb.mxu3 %v11111_v21  ;;  %v11130_v3 = vld [vmem:[#allocation3 + $0x5b8] sm:$0xff]  ;;  %v11136_v20 = vld [vmem:[#allocation3 + $0x5e8] sm:$0xff] }
 0x148   :  { %1185 = vst [vmem:[#allocation2 + $0xc4] sm:$0xf] %v1181_v7  ;;  %3620 = vmatmul.bf16.gmra.mxu0 %v8556_v11  ;;  %3639 = vmatmul.bf16.gmra.mxu1 %v8560_v14  ;;  %v11129_v14 = vld [vmem:[#allocation3 + $0x5b0] sm:$0xff]  ;;  %v11144_v21 = vld [vmem:[#allocation3 + $0x628] sm:$0xff] }
 0x149   :  { %1233 = vst [vmem:[#allocation2 + $0xc8] sm:$0xf] %v1229_v8  ;;  %3763 = vmatpush.bf16.msrb.mxu0 %v11086_v22  ;;  %3782 = vmatpush.bf16.msrb.mxu1 %v11094_v23  ;;  %v10926_v22 = vld [vmem:[#allocation2 + $0x10c] sm:$0xf]  ;;  %v8575_v23 = vld [vmem:[#allocation2 + $0x110] sm:$0xf] }
 0x14a   :  { %1090 = vst [vmem:[#allocation2 + $0x128] sm:$0xf] %v1086_v12  ;;  %3658 = vmatmul.bf16.gmra.mxu2 %v8564_v16  ;;  %3677 = vmatmul.bf16.gmra.mxu3 %v8568_v17  ;;  %v11145_v16 = vld [vmem:[#allocation3 + $0x630] sm:$0xff]  ;;  %v11120_v17 = vld [vmem:[#allocation3 + $0x568] sm:$0xff] }
 0x14b   :  { %1138 = vst [vmem:[#allocation2 + $0x12c] sm:$0xf] %v1134_v13  ;;  %3801 = vmatpush.bf16.msrb.mxu2 %v11102_v24  ;;  %3820 = vmatpush.bf16.msrb.mxu3 %v11110_v25  ;;  %v11121_v13 = vld [vmem:[#allocation3 + $0x570] sm:$0xff]  ;;  %v10940_v24 = vld [vmem:[#allocation2 + $0x178] sm:$0xf0] }
 0x14d   :  { %v1175_v26 = vpop.f32.mrf.mxu2  ;;  %v1223_v27 = vpop.f32.mrf.mxu3  ;;  %3764 = vmatpush.bf16.msrb.mxu0 %v11085_v34  ;;  %3783 = vmatpush.bf16.msrb.mxu1 %v11093_v35 }
 0x14e   :  { %v1182_v28 = vpack.c.bf16 %v1175_v26, %v1175_v26  ;;  %v1230_v29 = vpack.c.bf16 %v1223_v27, %v1223_v27  ;;  %v1081_v30 = vpop.f32.mrf.mxu0  ;;  %v1129_v31 = vpop.f32.mrf.mxu1  ;;  %v10927_v27 = vld [vmem:[#allocation2 + $0x114] sm:$0xf] }
 0x14f   :  { %v1087_v32 = vpack.c.bf16 %v1081_v30, %v1081_v30  ;;  %v1135_v33 = vpack.c.bf16 %v1129_v31, %v1129_v31  ;;  %3802 = vmatpush.bf16.msrb.mxu2 %v11101_v36  ;;  %3821 = vmatpush.bf16.msrb.mxu3 %v11109_v37  ;;  %v8576_v36 = vor.u32 %v10940_v24, %v8575_v23  ;;  %v8583_v37 = vld [vmem:[#allocation2 + $0x118] sm:$0xf]  ;;  %v11162_v23 = vld [vmem:[#allocation3 + $0x6b8] sm:$0xff] }
 0x150   :  { %1186 = vst [vmem:[#allocation2 + $0x130] sm:$0xf] %v1182_v28  ;;  %v8577_v28 = vld [vmem:[#allocation2 + $0x17c] sm:$0xf0] }
 0x151   :  { %1234 = vst [vmem:[#allocation2 + $0x134] sm:$0xf] %v1230_v29  ;;  %3765 = vmatpush.bf16.msrb.mxu0 %v11084_v41  ;;  %3784 = vmatpush.bf16.msrb.mxu1 %v11092_v42  ;;  %v10941_v29 = vld [vmem:[#allocation2 + $0x180] sm:$0xf0]  ;;  %v8580_v38 = vor.u32 %v10927_v27, %v8577_v28  ;;  %v11127_v41 = vld [vmem:[#allocation3 + $0x5a0] sm:$0xff] }
 0x152   :  { %1091 = vst [vmem:[#allocation2 + $0x194] sm:$0xf] %v1087_v32  ;;  %v8584_v39 = vor.u32 %v10941_v29, %v8583_v37  ;;  %v11135_v42 = vld [vmem:[#allocation3 + $0x5e0] sm:$0xff]  ;;  %v8585_v37 = vld [vmem:[#allocation2 + $0x184] sm:$0xf0] }
 0x153   :  { %1139 = vst [vmem:[#allocation2 + $0x198] sm:$0xf] %v1135_v33  ;;  %3803 = vmatpush.bf16.msrb.mxu2 %v11100_v44  ;;  %3822 = vmatpush.bf16.msrb.mxu3 %v11108_v45  ;;  %v8572_v33 = vor.u32 %v10926_v22, %v8569_v19  ;;  %v11118_v44 = vld [vmem:[#allocation3 + $0x558] sm:$0xff]  ;;  %v11123_v19 = vld [vmem:[#allocation3 + $0x580] sm:$0xff] }
 0x154   :  { %v11126_v45 = vld [vmem:[#allocation3 + $0x598] sm:$0xff]  ;;  %v11139_v22 = vld [vmem:[#allocation3 + $0x600] sm:$0xff] }
 0x155   :  { %v1177_v46 = vpop.f32.mrf.mxu2  ;;  %v1225_v47 = vpop.f32.mrf.mxu3  ;;  %3766 = vmatpush.bf16.msrb.mxu0 %v11083_v62  ;;  %3785 = vmatpush.bf16.msrb.mxu1 %v11091_v63  ;;  %v11124_v62 = vld [vmem:[#allocation3 + $0x588] sm:$0xff]  ;;  %v10915_v63 = vld [vmem:[#allocation2 + $0xb0] sm:$0xf0] }
 0x156   :  { %v1183_v51 = vpack.c.bf16 %v1177_v46, %v1177_v46  ;;  %v1231_v52 = vpack.c.bf16 %v1225_v47, %v1225_v47  ;;  %v1266_v53 = vpop.f32.mrf.mxu0  ;;  %v1314_v54 = vpop.f32.mrf.mxu1  ;;  %v11134_v46 = vld [vmem:[#allocation3 + $0x5d8] sm:$0xff] }
 0x157   :  { %v1276_v56 = vpack.c.bf16 %v1266_v53, %v1266_v53  ;;  %v1324_v57 = vpack.c.bf16 %v1314_v54, %v1314_v54  ;;  %3804 = vmatpush.bf16.msrb.mxu2 %v11099_v0  ;;  %3823 = vmatpush.bf16.msrb.mxu3 %v11107_v1  ;;  %v11142_v47 = vld [vmem:[#allocation3 + $0x618] sm:$0xff]  ;;  %v11132_v0 = vld [vmem:[#allocation3 + $0x5c8] sm:$0xff] }
 0x158   :  { %1187 = vst [vmem:[#allocation2 + $0x19c] sm:$0xf] %v1183_v51  ;;  %3691 = vmatmul.bf16.vlgmr.msra.gmra.mxu0 %v8464_v55  ;;  %3710 = vmatmul.bf16.vlgmr.msra.gmra.mxu1 %v8468_v58  ;;  %v11117_v55 = vld [vmem:[#allocation3 + $0x550] sm:$0xff]  ;;  %v11140_v1 = vld [vmem:[#allocation3 + $0x608] sm:$0xff] }
 0x159   :  { %1235 = vst [vmem:[#allocation2 + $0x1a0] sm:$0xf] %v1231_v52  ;;  %3835 = vmatpush.bf16.msra.mxu0 %v11122_v2  ;;  %3854 = vmatpush.bf16.msra.mxu1 %v11130_v3  ;;  %v11141_v58 = vld [vmem:[#allocation3 + $0x610] sm:$0xff] }
 0x15a   :  { %1280 = vst [vmem:[#allocation2 + $0x60] sm:$0xf] %v1276_v56  ;;  %3729 = vmatmul.bf16.vlgmr.msra.gmra.mxu2 %v8472_v60  ;;  %3748 = vmatmul.bf16.vlgmr.msra.gmra.mxu3 %v8476_v61  ;;  %v11125_v56 = vld [vmem:[#allocation3 + $0x590] sm:$0xff]  ;;  %v8477_v60 = vld [vmem:[#allocation2 + $0xac] sm:$0xf0]  ;;  %v11116_v61 = vld [vmem:[#allocation3 + $0x548] sm:$0xff] }
 0x15b   :  { %1328 = vst [vmem:[#allocation2 + $0x64] sm:$0xf] %v1324_v57  ;;  %3873 = vmatpush.bf16.msra.mxu2 %v11138_v4  ;;  %3892 = vmatpush.bf16.msra.mxu3 %v11146_v6  ;;  %v11133_v57 = vld [vmem:[#allocation3 + $0x5d0] sm:$0xff]  ;;  %v10902_v4 = vld [vmem:[#allocation2 + $0x4c] sm:$0xf] }
 0x15c   :  { %v8485_v6 = vld [vmem:[#allocation2 + $0xb4] sm:$0xf0] }
 0x15d   :  { %v1362_v5 = vpop.f32.mrf.mxu2  ;;  %v11808_v7 = vpop.f32.mrf.mxu3  ;;  %3836 = vmatpush.bf16.msra.mxu0 %v11121_v13  ;;  %3855 = vmatpush.bf16.msra.mxu1 %v11129_v14  ;;  %v8484_v14 = vor.u32 %v10915_v63, %v8483_v59 }
 0x15e   :  { %v1372_v8 = vpack.c.bf16 %v1362_v5, %v1362_v5  ;;  %v1268_v9 = vpop.f32.mrf.mxu0  ;;  %v1316_v10 = vpop.f32.mrf.mxu1  ;;  %v10916_v5 = vld [vmem:[#allocation2 + $0xb8] sm:$0xf0] }
 0x15f   :  { %v1277_v11 = vpack.c.bf16 %v1268_v9, %v1268_v9  ;;  %v1325_v12 = vpack.c.bf16 %v1316_v10, %v1316_v10  ;;  %3874 = vmatpush.bf16.msra.mxu2 %v11137_v15  ;;  %3893 = vmatpush.bf16.msra.mxu3 %v11145_v16  ;;  %v8491_v15 = vld [vmem:[#allocation2 + $0x50] sm:$0xf]  ;;  %v8488_v16 = vor.u32 %v10902_v4, %v8485_v6  ;;  %v11148_v6 = vld [vmem:[#allocation3 + $0x648] sm:$0xff] }
 0x160   :  { %1376 = vst [vmem:[#allocation2 + $0x68] sm:$0xf] %v1372_v8 }
 0x161   :  { %1281 = vst [vmem:[#allocation2 + $0xcc] sm:$0xf] %v1277_v11  ;;  %3837 = vmatpush.bf16.msra.mxu0 %v11120_v17  ;;  %3856 = vmatpush.bf16.msra.mxu1 %v11128_v18  ;;  %v10901_v11 = vld [vmem:[#allocation2 + $0x44] sm:$0xf]  ;;  %v8492_v17 = vor.u32 %v10916_v5, %v8491_v15  ;;  %v11115_v18 = vld [vmem:[#allocation3 + $0x540] sm:$0xff]  ;;  %v11156_v5 = vld [vmem:[#allocation3 + $0x688] sm:$0xff] }
 0x162   :  { %1329 = vst [vmem:[#allocation2 + $0xd0] sm:$0xf] %v1325_v12  ;;  %v8480_v13 = vor.u32 %v10901_v11, %v8477_v60 }
 0x163   :  { %3875 = vmatpush.bf16.msra.mxu2 %v11136_v20  ;;  %3894 = vmatpush.bf16.msra.mxu3 %v11144_v21  ;;  %v11131_v20 = vld [vmem:[#allocation3 + $0x5c0] sm:$0xff] }
 0x165   :  { %v1364_v25 = vpop.f32.mrf.mxu2  ;;  %v11810_v26 = vpop.f32.mrf.mxu3  ;;  %3838 = vmatpush.bf16.msra.mxu0 %v11119_v40  ;;  %3857 = vmatpush.bf16.msra.mxu1 %v11127_v41 }
 0x166   :  { %v1373_v30 = vpack.c.bf16 %v1364_v25, %v1364_v25  ;;  %v1271_v31 = vpop.f32.mrf.mxu0  ;;  %v1319_v32 = vpop.f32.mrf.mxu1 }
 0x167   :  { %v1278_v34 = vpack.c.bf16 %v1271_v31, %v1271_v31  ;;  %v1326_v35 = vpack.c.bf16 %v1319_v32, %v1319_v32  ;;  %3876 = vmatpush.bf16.msra.mxu2 %v11135_v42  ;;  %3895 = vmatpush.bf16.msra.mxu3 %v11143_v43  ;;  %v11153_v32 = vld [vmem:[#allocation3 + $0x670] sm:$0xff]  ;;  %v8593_v43 = vld [vmem:[#allocation2 + $0x18c] sm:$0xf0] }
 0x168   :  { %1377 = vst [vmem:[#allocation2 + $0xd4] sm:$0xf] %v1373_v30  ;;  %3696 = vmatmul.bf16.gmra.mxu0 %v8572_v33  ;;  %3715 = vmatmul.bf16.gmra.mxu1 %v8576_v36  ;;  %v11161_v33 = vld [vmem:[#allocation3 + $0x6b0] sm:$0xff]  ;;  %v11160_v36 = vld [vmem:[#allocation3 + $0x6a8] sm:$0xff] }
 0x169   :  { %1282 = vst [vmem:[#allocation2 + $0x138] sm:$0xf] %v1278_v34  ;;  %3839 = vmatpush.bf16.msra.mxu0 %v11118_v44  ;;  %3858 = vmatpush.bf16.msra.mxu1 %v11126_v45  ;;  %v10929_v42 = vld [vmem:[#allocation2 + $0x124] sm:$0xf] }
 0x16a   :  { %1330 = vst [vmem:[#allocation2 + $0x13c] sm:$0xf] %v1326_v35  ;;  %3734 = vmatmul.bf16.gmra.mxu2 %v8580_v38  ;;  %3753 = vmatmul.bf16.gmra.mxu3 %v8584_v39  ;;  %v11152_v35 = vld [vmem:[#allocation3 + $0x668] sm:$0xff]  ;;  %v8591_v38 = vld [vmem:[#allocation2 + $0x120] sm:$0xf] }
 0x16b   :  { %3877 = vmatpush.bf16.msra.mxu2 %v11134_v46  ;;  %3896 = vmatpush.bf16.msra.mxu3 %v11142_v47  ;;  %v10942_v39 = vld [vmem:[#allocation2 + $0x188] sm:$0xf0]  ;;  %v10928_v46 = vld [vmem:[#allocation2 + $0x11c] sm:$0xf] }
 0x16d   :  { %v1367_v48 = vpop.f32.mrf.mxu2  ;;  %v11812_v49 = vpop.f32.mrf.mxu3  ;;  %3840 = vmatpush.bf16.msra.mxu0 %v11117_v55  ;;  %3859 = vmatpush.bf16.msra.mxu1 %v11125_v56  ;;  %v11159_v55 = vld [vmem:[#allocation3 + $0x6a0] sm:$0xff] }
 0x16e   :  { %v1374_v50 = vpack.c.bf16 %v1367_v48, %v1367_v48  ;;  %v1273_v51 = vpop.f32.mrf.mxu0  ;;  %v1321_v52 = vpop.f32.mrf.mxu1  ;;  %v8588_v48 = vor.u32 %v10928_v46, %v8585_v37 }
 0x16f   :  { %v1279_v53 = vpack.c.bf16 %v1273_v51, %v1273_v51  ;;  %v1327_v54 = vpack.c.bf16 %v1321_v52, %v1321_v52  ;;  %3878 = vmatpush.bf16.msra.mxu2 %v11133_v57  ;;  %3897 = vmatpush.bf16.msra.mxu3 %v11141_v58  ;;  %v8599_v51 = vld [vmem:[#allocation2 + $0x128] sm:$0xf]  ;;  %v8596_v52 = vor.u32 %v10929_v42, %v8593_v43  ;;  %v8609_v42 = vld [vmem:[#allocation2 + $0x19c] sm:$0xf0] }
 0x170   :  { %1378 = vst [vmem:[#allocation2 + $0x140] sm:$0xf] %v1374_v50  ;;  %v8592_v50 = vor.u32 %v10942_v39, %v8591_v38  ;;  %v11150_v57 = vld [vmem:[#allocation3 + $0x658] sm:$0xff]  ;;  %v10931_v39 = vld [vmem:[#allocation2 + $0x134] sm:$0xf] }
 0x171   :  { %1283 = vst [vmem:[#allocation2 + $0x1a4] sm:$0xf] %v1279_v53  ;;  %3841 = vmatpush.bf16.msra.mxu0 %v11116_v61  ;;  %3860 = vmatpush.bf16.msra.mxu1 %v11124_v62  ;;  %v11158_v58 = vld [vmem:[#allocation3 + $0x698] sm:$0xff] }
 0x172   :  { %1331 = vst [vmem:[#allocation2 + $0x1a8] sm:$0xf] %v1327_v54  ;;  %v11151_v54 = vld [vmem:[#allocation3 + $0x660] sm:$0xff] }
 0x173   :  { %3879 = vmatpush.bf16.msra.mxu2 %v11132_v0  ;;  %3898 = vmatpush.bf16.msra.mxu3 %v11140_v1  ;;  %v11149_v1 = vld [vmem:[#allocation3 + $0x650] sm:$0xff] }
 0x175   :  { %v1369_v2 = vpop.f32.mrf.mxu2  ;;  %v11814_v3 = vpop.f32.mrf.mxu3  ;;  %3842 = vmatpush.bf16.msra.mxu0 %v11115_v18  ;;  %3861 = vmatpush.bf16.msra.mxu1 %v11123_v19 }
 0x176   :  { %v1375_v8 = vpack.c.bf16 %v1369_v2, %v1369_v2  ;;  %v3464_v9 = vpop.f32.mrf.mxu0  ;;  %v3483_v10 = vpop.f32.mrf.mxu1  ;;  %v11157_v2 = vld [vmem:[#allocation3 + $0x690] sm:$0xff] }
 0x177   :  { %v3465_v12 = vadd.f32 %v3464_v9, %v11808_v7  ;;  %v11154_v7 = vld [vmem:[#allocation3 + $0x678] sm:$0xff]  ;;  %3880 = vmatpush.bf16.msra.mxu2 %v11131_v20  ;;  %3899 = vmatpush.bf16.msra.mxu3 %v11139_v22  ;;  %v8499_v9 = vld [vmem:[#allocation2 + $0x58] sm:$0xf] }
 0x178   :  { %1379 = vst [vmem:[#allocation2 + $0x1ac] sm:$0xf] %v1375_v8  ;;  %3767 = vmatmul.bf16.vlgmr.msrb.gmra.mxu0 %v8480_v13  ;;  %3786 = vmatmul.bf16.vlgmr.msrb.gmra.mxu1 %v8484_v14  ;;  %v8493_v8 = vld [vmem:[#allocation2 + $0xbc] sm:$0xf0]  ;;  %v10904_v13 = vld [vmem:[#allocation2 + $0x5c] sm:$0xf] }
 0x179   :  { %v3484_v21 = vadd.f32 %v3483_v10, %v3465_v12  ;;  %3911 = vmatpush.bf16.msrb.mxu0 %v11154_v7  ;;  %3930 = vmatpush.bf16.msrb.mxu1 %v11162_v23  ;;  %v10917_v10 = vld [vmem:[#allocation2 + $0xc0] sm:$0xf0]  ;;  %v10918_v14 = vld [vmem:[#allocation2 + $0xc8] sm:$0xf0]  ;;  %v11147_v23 = vld [vmem:[#allocation3 + $0x640] sm:$0xff] }
 0x17a   :  { %3805 = vmatmul.bf16.vlgmr.msrb.gmra.mxu2 %v8488_v16  ;;  %3824 = vmatmul.bf16.vlgmr.msrb.gmra.mxu3 %v8492_v17  ;;  %v10903_v17 = vld [vmem:[#allocation2 + $0x54] sm:$0xf]  ;;  %v8500_v20 = vor.u32 %v10917_v10, %v8499_v9  ;;  %v10945_v43 = vld [vmem:[#allocation2 + $0x1a0] sm:$0xf0] }
 0x17b   :  { %v8496_v19 = vor.u32 %v10903_v17, %v8493_v8  ;;  %v8617_v17 = vld [vmem:[#allocation2 + $0x1a4] sm:$0xf0] }
 0x17d   :  { %v3502_v24 = vpop.f32.mrf.mxu2  ;;  %v3521_v25 = vpop.f32.mrf.mxu3  ;;  %3912 = vmatpush.bf16.msrb.mxu0 %v11153_v32  ;;  %3931 = vmatpush.bf16.msrb.mxu1 %v11161_v33  ;;  %v8601_v33 = vld [vmem:[#allocation2 + $0x194] sm:$0xf0] }
 0x17e   :  { %v3503_v27 = vadd.f32 %v3502_v24, %v3484_v21  ;;  %v3466_v28 = vpop.f32.mrf.mxu0  ;;  %v3485_v29 = vpop.f32.mrf.mxu1  ;;  %v8507_v21 = vld [vmem:[#allocation2 + $0x60] sm:$0xf]  ;;  %v11155_v24 = vld [vmem:[#allocation3 + $0x680] sm:$0xff] }
 0x17f   :  { %v3467_v30 = vadd.f32 %v3466_v28, %v11810_v26  ;;  %v10943_v26 = vld [vmem:[#allocation2 + $0x190] sm:$0xf0]  ;;  %v8508_v7 = vor.u32 %v10918_v14, %v8507_v21 }
 0x180   :  { %v11818_v31 = vadd.f32 %v3521_v25, %v3503_v27  ;;  %v8600_v53 = vor.u32 %v10943_v26, %v8599_v51  ;;  %v8612_v51 = vor.u32 %v10931_v39, %v8609_v42 }
 0x181   :  { %v11820_v34 = vadd.f32 %v3485_v29, %v3467_v30  ;;  %3913 = vmatpush.bf16.msrb.mxu0 %v11152_v35  ;;  %3932 = vmatpush.bf16.msrb.mxu1 %v11160_v36  ;;  %v8607_v35 = vld [vmem:[#allocation2 + $0x130] sm:$0xf]  ;;  %v10944_v36 = vld [vmem:[#allocation2 + $0x198] sm:$0xf0] }
 0x185   :  { %v11822_v40 = vpop.f32.mrf.mxu2  ;;  %v11824_v41 = vpop.f32.mrf.mxu3  ;;  %3914 = vmatpush.bf16.msrb.mxu0 %v11151_v54  ;;  %3933 = vmatpush.bf16.msrb.mxu1 %v11159_v55 }
 0x186   :  { %v3469_v44 = vpop.f32.mrf.mxu0  ;;  %v3488_v45 = vpop.f32.mrf.mxu1 }
 0x187   :  { %v3470_v47 = vadd.f32 %v3469_v44, %v11812_v49 }
 0x188   :  { %3772 = vmatmul.bf16.gmra.mxu0 %v8588_v48  ;;  %3791 = vmatmul.bf16.gmra.mxu1 %v8592_v50  ;;  %v8608_v48 = vor.u32 %v10944_v36, %v8607_v35  ;;  %v8615_v50 = vld [vmem:[#allocation2 + $0x138] sm:$0xf] }
 0x189   :  { %v3489_v56 = vadd.f32 %v3488_v45, %v3470_v47  ;;  %3915 = vmatpush.bf16.msrb.mxu0 %v11150_v57  ;;  %3934 = vmatpush.bf16.msrb.mxu1 %v11158_v58  ;;  %v10930_v45 = vld [vmem:[#allocation2 + $0x12c] sm:$0xf] }
 0x18a   :  { %3810 = vmatmul.bf16.gmra.mxu2 %v8596_v52  ;;  %3829 = vmatmul.bf16.gmra.mxu3 %v8600_v53  ;;  %v8604_v47 = vor.u32 %v10930_v45, %v8601_v33  ;;  %v8616_v52 = vor.u32 %v10945_v43, %v8615_v50 }
 0x18d   :  { %v3507_v59 = vpop.f32.mrf.mxu2  ;;  %v3526_v60 = vpop.f32.mrf.mxu3  ;;  %3916 = vmatpush.bf16.msrb.mxu0 %v11149_v1  ;;  %3935 = vmatpush.bf16.msrb.mxu1 %v11157_v2  ;;  %v10905_v2 = vld [vmem:[#allocation2 + $0x64] sm:$0xf] }
 0x18e   :  { %v3508_v61 = vadd.f32 %v3507_v59, %v3489_v56  ;;  %v3471_v49 = vpop.f32.mrf.mxu0  ;;  %v3490_v62 = vpop.f32.mrf.mxu1 }
 0x18f   :  { %v3472_v63 = vadd.f32 %v3471_v49, %v11814_v3  ;;  %v8501_v3 = vld [vmem:[#allocation2 + $0xc4] sm:$0xf0]  ;;  %v10919_v49 = vld [vmem:[#allocation2 + $0xd0] sm:$0xf0] }
 0x190   :  { %v3527_v0 = vadd.f32 %v3526_v60, %v3508_v61  ;;  %v8504_v22 = vor.u32 %v10904_v13, %v8501_v3  ;;  %v8509_v60 = vld [vmem:[#allocation2 + $0xcc] sm:$0xf0]  ;;  %v8515_v61 = vld [vmem:[#allocation2 + $0x68] sm:$0xf] }
 0x191   :  { %v11828_v4 = vadd.f32 %v3490_v62, %v3472_v63  ;;  %3917 = vmatpush.bf16.msrb.mxu0 %v11148_v6  ;;  %3936 = vmatpush.bf16.msrb.mxu1 %v11156_v5  ;;  %v8512_v5 = vor.u32 %v10905_v2, %v8509_v60  ;;  %v8516_v8 = vor.u32 %v10919_v49, %v8515_v61  ;;  %v11626_v2 = vmov 0  }
 0x192   :  { %11496 = vset.pattern.permute.xlu2 %v11626_v2  ;;  %11498 = vset.pattern.permute.xlu1 %v11626_v2 }
 0x193   :  { %11497 = vset.pattern.permute.xlu0 %v11626_v2 }
 0x195   :  { %v11830_v11 = vpop.f32.mrf.mxu2  ;;  %v11832_v12 = vpop.f32.mrf.mxu3  ;;  %3918 = vmatpush.bf16.msrb.mxu0 %v11147_v23  ;;  %3937 = vmatpush.bf16.msrb.mxu1 %v11155_v24  ;;  %v10932_v23 = vld [vmem:[#allocation2 + $0x13c] sm:$0xf] }
 0x196   :  { %v3540_v15 = vpop.f32.mrf.mxu0  ;;  %v3559_v16 = vpop.f32.mrf.mxu1 }
 0x197   :  { %v3541_v18 = vadd.f32 %v3540_v15, %v11818_v31 }
 0x198   :  { %3843 = vmatmul.bf16.vlgmr.msra.gmra.mxu0 %v8496_v19  ;;  %3862 = vmatmul.bf16.vlgmr.msra.gmra.mxu1 %v8500_v20  ;;  %v10946_v19 = vld [vmem:[#allocation2 + $0x1a8] sm:$0xf0] }
 0x199   :  { %v3560_v25 = vadd.f32 %v3559_v16, %v3541_v18  ;;  %v8623_v18 = vld [vmem:[#allocation2 + $0x140] sm:$0xf] }
 0x19a   :  { %3881 = vmatmul.bf16.vlgmr.msra.gmra.mxu2 %v8504_v22  ;;  %3900 = vmatmul.bf16.vlgmr.msra.gmra.mxu3 %v8508_v7 }
 0x19d   :  { %v3578_v27 = vpop.f32.mrf.mxu2  ;;  %v3597_v28 = vpop.f32.mrf.mxu3 }
 0x19e   :  { %v3579_v29 = vadd.f32 %v3578_v27, %v3560_v25  ;;  %v11835_v30 = vpop.f32.mrf.mxu0  ;;  %v11837_v31 = vpop.f32.mrf.mxu1  ;;  %v8620_v25 = vor.u32 %v10932_v23, %v8617_v17  ;;  %v8624_v27 = vor.u32 %v10946_v19, %v8623_v18 }
 0x1a0   :  { %v3598_v32 = vadd.f32 %v3597_v28, %v3579_v29 }
 0x1a5   :  { %v11839_v37 = vpop.f32.mrf.mxu2  ;;  %v11841_v38 = vpop.f32.mrf.mxu3 }
 0x1a6   :  { %v3545_v26 = vpop.f32.mrf.mxu0  ;;  %v3564_v44 = vpop.f32.mrf.mxu1 }
 0x1a7   :  { %v3546_v46 = vadd.f32 %v3545_v26, %v3527_v0 }
 0x1a8   :  { %3848 = vmatmul.bf16.gmra.mxu0 %v8604_v47  ;;  %3867 = vmatmul.bf16.gmra.mxu1 %v8608_v48 }
 0x1a9   :  { %v3565_v53 = vadd.f32 %v3564_v44, %v3546_v46 }
 0x1aa   :  { %3886 = vmatmul.bf16.gmra.mxu2 %v8612_v51  ;;  %3905 = vmatmul.bf16.gmra.mxu3 %v8616_v52 }
 0x1ad   :  { %v3583_v54 = vpop.f32.mrf.mxu2  ;;  %v3602_v55 = vpop.f32.mrf.mxu3 }
 0x1ae   :  { %v3584_v56 = vadd.f32 %v3583_v54, %v3565_v53  ;;  %v11843_v57 = vpop.f32.mrf.mxu0  ;;  %v11845_v58 = vpop.f32.mrf.mxu1 }
 0x1b0   :  { %v3603_v59 = vadd.f32 %v3602_v55, %v3584_v56 }
 0x1b5   :  { %v11847_v62 = vpop.f32.mrf.mxu2  ;;  %v11849_v63 = vpop.f32.mrf.mxu3 }
 0x1b6   :  { %v3616_v0 = vpop.f32.mrf.mxu0  ;;  %v3635_v1 = vpop.f32.mrf.mxu1 }
 0x1b7   :  { %v3617_v6 = vadd.f32 %v3616_v0, %v3598_v32 }
 0x1b8   :  { %3919 = vmatmul.bf16.vlgmr.msrb.gmra.mxu0 %v8512_v5  ;;  %3938 = vmatmul.bf16.vlgmr.msrb.gmra.mxu1 %v8516_v8 }
 0x1b9   :  { %v3636_v9 = vadd.f32 %v3635_v1, %v3617_v6  ;;  %v3951_v1 = vld [vmem:[%s12207_s4 + $0x10] sm:$0xff] }
 0x1ba   :  { %4057 = vperm.xlu2 %11496, %v3951_v1  }
 0x1bd   :  { %v3654_v10 = vpop.f32.mrf.mxu2  ;;  %v3673_v13 = vpop.f32.mrf.mxu3 }
 0x1be   :  { %v3655_v3 = vadd.f32 %v3654_v10, %v3636_v9  ;;  %v11851_v14 = vpop.f32.mrf.mxu0  ;;  %v11853_v15 = vpop.f32.mrf.mxu1  ;;  %v3505_v10 = vadd.f32 %v11822_v40, %v11820_v34 }
 0x1c0   :  { %v3674_v16 = vadd.f32 %v3673_v13, %v3655_v3  ;;  %v3524_v17 = vadd.f32 %v11824_v41, %v3505_v10 }
 0x1c2   :  { %v3543_v18 = vadd.f32 %v11835_v30, %v3524_v17 }
 0x1c4   :  { %v3562_v23 = vadd.f32 %v11837_v31, %v3543_v18 }
 0x1c5   :  { %v11855_v20 = vpop.f32.mrf.mxu2  ;;  %v11857_v21 = vpop.f32.mrf.mxu3 }
 0x1c6   :  { %v3621_v22 = vpop.f32.mrf.mxu0  ;;  %v3640_v7 = vpop.f32.mrf.mxu1 }
 0x1c7   :  { %v3622_v24 = vadd.f32 %v3621_v22, %v3603_v59 }
 0x1c8   :  { %3924 = vmatmul.bf16.gmra.mxu0 %v8620_v25  ;;  %3943 = vmatmul.bf16.gmra.mxu1 %v8624_v27  ;;  %v3510_v27 = vadd.f32 %v11830_v11, %v11828_v4 }
 0x1c9   :  { %v3641_v28 = vadd.f32 %v3640_v7, %v3622_v24  ;;  %v3581_v24 = vadd.f32 %v11839_v37, %v3562_v23 }
 0x1ca   :  { %v3529_v30 = vadd.f32 %v11832_v12, %v3510_v27 }
 0x1cb   :  { %v3600_v34 = vadd.f32 %v11841_v38, %v3581_v24 }
 0x1cd   :  { %v3659_v29 = vpop.f32.mrf.mxu2  ;;  %v3678_v32 = vpop.f32.mrf.mxu3  ;;  %v3619_v41 = vadd.f32 %v11851_v14, %v3600_v34 }
 0x1ce   :  { %v3660_v33 = vadd.f32 %v3659_v29, %v3641_v28  ;;  %v11859_v35 = vpop.f32.mrf.mxu0  ;;  %v11861_v36 = vpop.f32.mrf.mxu1 }
 0x1cf   :  { %v3638_v31 = vadd.f32 %v11853_v15, %v3619_v41 }
 0x1d0   :  { %v3679_v39 = vadd.f32 %v3678_v32, %v3660_v33  ;;  %v3548_v32 = vadd.f32 %v11843_v57, %v3529_v30 }
 0x1d1   :  { %v3657_v37 = vadd.f32 %v11855_v20, %v3638_v31 }
 0x1d2   :  { %v3567_v4 = vadd.f32 %v11845_v58, %v3548_v32 }
 0x1d3   :  { %v3676_v38 = vadd.f32 %v11857_v21, %v3657_v37 }
 0x1d4   :  { %v3586_v11 = vadd.f32 %v11847_v62, %v3567_v4 }
 0x1d5   :  { %v11863_v42 = vpop.f32.mrf.mxu2  ;;  %v11865_v43 = vpop.f32.mrf.mxu3 }
 0x1d6   :  { %v3692_v26 = vpop.f32.mrf.mxu0  ;;  %v3711_v44 = vpop.f32.mrf.mxu1  ;;  %v3605_v12 = vadd.f32 %v11849_v63, %v3586_v11 }
 0x1d7   :  { %v3693_v45 = vadd.f32 %v3692_v26, %v3674_v16 }
 0x1d9   :  { %v3712_v46 = vadd.f32 %v3711_v44, %v3693_v45 }
 0x1dd   :  { %v3730_v47 = vpop.f32.mrf.mxu2  ;;  %v3749_v48 = vpop.f32.mrf.mxu3 }
 0x1de   :  { %v3694_v50 = vpop.f32.mrf.mxu0  ;;  %v3713_v51 = vpop.f32.mrf.mxu1  ;;  %v3731_v44 = vadd.f32 %v3730_v47, %v3712_v46 }
 0x1df   :  { %v3695_v45 = vadd.f32 %v3694_v50, %v3676_v38 }
 0x1e1   :  { %v3714_v20 = vadd.f32 %v3713_v51, %v3695_v45 }
 0x1e5   :  { %v3732_v52 = vpop.f32.mrf.mxu2  ;;  %v3751_v55 = vpop.f32.mrf.mxu3 }
 0x1e6   :  { %v3697_v53 = vpop.f32.mrf.mxu0  ;;  %v3716_v54 = vpop.f32.mrf.mxu1  ;;  %v3733_v2 = vadd.f32 %v3732_v52, %v3714_v20 }
 0x1e7   :  { %v3698_v56 = vadd.f32 %v3697_v53, %v3679_v39  ;;  %v3750_v53 = vadd.f32 %v3749_v48, %v3731_v44 }
 0x1e8   :  { %v3752_v46 = vadd.f32 %v3751_v55, %v3733_v2 }
 0x1e9   :  { %v11867_v59 = vadd.f32 %v3716_v54, %v3698_v56  ;;  %v3624_v56 = vadd.f32 %v11859_v35, %v3605_v12 }
 0x1eb   :  { %v3643_v58 = vadd.f32 %v11861_v36, %v3624_v56 }
 0x1ed   :  { %v11869_v60 = vpop.f32.mrf.mxu2  ;;  %v11875_v0 = vpop.f32.mrf.mxu3  ;;  %v3662_v21 = vadd.f32 %v11863_v42, %v3643_v58 }
 0x1ee   :  { %v11871_v61 = vpop.f32.mrf.mxu0  ;;  %v11873_v49 = vpop.f32.mrf.mxu1  ;;  %v3736_v35 = vadd.f32 %v11869_v60, %v11867_v59 }
 0x1ef   :  { %v3681_v18 = vadd.f32 %v11865_v43, %v3662_v21 }
 0x1f1   :  { %v3700_v52 = vadd.f32 %v11871_v61, %v3681_v18  ;;  %v3949_v18 = vld [vmem:[%s12207_s4] sm:$0xff] }
 0x1f3   :  { %v3719_v24 = vadd.f32 %v11873_v49, %v3700_v52  ;;  %v3950_v52 = vld [vmem:[%s12207_s4 + $0x8] sm:$0xff] }
 0x1f5   :  { %v11880_v6 = vpop.f32.mrf.mxu2  ;;  %v11882_v9 = vpop.f32.mrf.mxu3 }
 0x1f6   :  { %v3768_v5 = vpop.f32.mrf.mxu0  ;;  %v3787_v8 = vpop.f32.mrf.mxu1  ;;  %v3738_v43 = vadd.f32 %v11880_v6, %v3719_v24  ;;  %v7966_v24 = vld [vmem:[%s12209_s6 + $0x18] sm:$0xff] }
 0x1f7   :  { %v3769_v1 = vadd.f32 %v3768_v5, %v3750_v53 }
 0x1f8   :  { %v3757_v61 = vadd.f32 %v11882_v9, %v3738_v43 }
 0x1f9   :  { %v3788_v10 = vadd.f32 %v3787_v8, %v3769_v1  ;;  %v3755_v8 = vadd.f32 %v11875_v0, %v3736_v35  ;;  %v3955_v35 = vld [vmem:[%s12208_s5 + $0x10] sm:$0xff] }
 0x1fd   :  { %v3806_v16 = vpop.f32.mrf.mxu2  ;;  %v3825_v19 = vpop.f32.mrf.mxu3 }
 0x1fe   :  { %v3770_v13 = vpop.f32.mrf.mxu0  ;;  %v3789_v3 = vpop.f32.mrf.mxu1  ;;  %v3807_v47 = vadd.f32 %v3806_v16, %v3788_v10 }
 0x1ff   :  { %v3771_v63 = vadd.f32 %v3770_v13, %v3752_v46 }
 0x200   :  { %v3826_v51 = vadd.f32 %v3825_v19, %v3807_v47 }
 0x201   :  { %v3790_v5 = vadd.f32 %v3789_v3, %v3771_v63 }
 0x205   :  { %v3808_v25 = vpop.f32.mrf.mxu2  ;;  %v3827_v29 = vpop.f32.mrf.mxu3 }
 0x206   :  { %v3773_v22 = vpop.f32.mrf.mxu0  ;;  %v3792_v7 = vpop.f32.mrf.mxu1  ;;  %v3809_v23 = vadd.f32 %v3808_v25, %v3790_v5  ;;  %v7964_v5 = vld [vmem:[%s12209_s6 + $0x8] sm:$0xff] }
 0x207   :  { %v3774_v13 = vadd.f32 %v3773_v22, %v3755_v8  ;;  %v7965_v8 = vld [vmem:[%s12209_s6 + $0x10] sm:$0xff] }
 0x208   :  { %v3828_v34 = vadd.f32 %v3827_v29, %v3809_v23 }
 0x209   :  { %v3793_v60 = vadd.f32 %v3792_v7, %v3774_v13 }
 0x20d   :  { %v3811_v33 = vpop.f32.mrf.mxu2  ;;  %v3830_v14 = vpop.f32.mrf.mxu3 }
 0x20e   :  { %v3775_v40 = vpop.f32.mrf.mxu0  ;;  %v11893_v28 = vpop.f32.mrf.mxu1  ;;  %v3812_v3 = vadd.f32 %v3811_v33, %v3793_v60 }
 0x20f   :  { %v3776_v32 = vadd.f32 %v3775_v40, %v3757_v61 }
 0x210   :  { %v3831_v49 = vadd.f32 %v3830_v14, %v3812_v3 }
 0x211   :  { %v3795_v6 = vadd.f32 %v11893_v28, %v3776_v32 }
 0x214   :  { %v11972_v13 = vpop.permute.xlu2 %4057 }
 0x215   :  { %v3813_v57 = vpop.f32.mrf.mxu2  ;;  %v3832_v62 = vpop.f32.mrf.mxu3 }
 0x216   :  { %v3844_v39 = vpop.f32.mrf.mxu0  ;;  %v3863_v26 = vpop.f32.mrf.mxu1  ;;  %v3814_v7 = vadd.f32 %v3813_v57, %v3795_v6 }
 0x217   :  { %v3845_v36 = vadd.f32 %v3844_v39, %v3826_v51  ;;  %v3953_v51 = vld [vmem:[%s12208_s5] sm:$0xff] }
 0x218   :  { %v3833_v14 = vadd.f32 %v3832_v62, %v3814_v7 }
 0x219   :  { %v3864_v27 = vadd.f32 %v3863_v26, %v3845_v36  ;;  %v3952_v36 = vld [vmem:[%s12207_s4 + $0x18] sm:$0xff] }
 0x21d   :  { %v3882_v48 = vpop.f32.mrf.mxu2  ;;  %v3901_v42 = vpop.f32.mrf.mxu3 }
 0x21e   :  { %v3846_v54 = vpop.f32.mrf.mxu0  ;;  %v3865_v15 = vpop.f32.mrf.mxu1  ;;  %v3883_v41 = vadd.f32 %v3882_v48, %v3864_v27  ;;  %v3956_v48 = vld [vmem:[%s12208_s5 + $0x18] sm:$0xff] }
 0x21f   :  { %v3847_v19 = vadd.f32 %v3846_v54, %v3828_v34 }
 0x220   :  { %v3902_v30 = vadd.f32 %v3901_v42, %v3883_v41  ;;  %v7967_v42 = vld [vmem:[%s12210_s7] sm:$0xff] }
 0x221   :  { %v3866_v31 = vadd.f32 %v3865_v15, %v3847_v19 }
 0x225   :  { %v3884_v59 = vpop.f32.mrf.mxu2  ;;  %v3903_v39 = vpop.f32.mrf.mxu3 }
 0x226   :  { %v3849_v50 = vpop.f32.mrf.mxu0  ;;  %v3868_v17 = vpop.f32.mrf.mxu1  ;;  %v3885_v22 = vadd.f32 %v3884_v59, %v3866_v31 }
 0x227   :  { %v3850_v29 = vadd.f32 %v3849_v50, %v3831_v49 }
 0x228   :  { %v3904_v33 = vadd.f32 %v3903_v39, %v3885_v22 }
 0x229   :  { %v3869_v38 = vadd.f32 %v3868_v17, %v3850_v29 }
 0x22d   :  { %v3887_v4 = vpop.f32.mrf.mxu2  ;;  %v3906_v53 = vpop.f32.mrf.mxu3 }
 0x22e   :  { %v3851_v55 = vpop.f32.mrf.mxu0  ;;  %v3870_v16 = vpop.f32.mrf.mxu1  ;;  %v3888_v45 = vadd.f32 %v3887_v4, %v3869_v38 }
 0x22f   :  { %v3852_v28 = vadd.f32 %v3851_v55, %v3833_v14  ;;  %v3954_v55 = vld [vmem:[%s12208_s5 + $0x8] sm:$0xff] }
 0x230   :  { %v3907_v15 = vadd.f32 %v3906_v53, %v3888_v45 }
 0x231   :  { %v3871_v1 = vadd.f32 %v3870_v16, %v3852_v28  ;;  %v7963_v16 = vld [vmem:[%s12209_s6] sm:$0xff] }
 0x235   :  { %v3889_v56 = vpop.f32.mrf.mxu2  ;;  %v3908_v21 = vpop.f32.mrf.mxu3 }
 0x236   :  { %v3920_v0 = vpop.f32.mrf.mxu0  ;;  %v3939_v25 = vpop.f32.mrf.mxu1  ;;  %v3890_v58 = vadd.f32 %v3889_v56, %v3871_v1 }
 0x237   :  { %v3921_v37 = vadd.f32 %v3920_v0, %v3902_v30 }
 0x238   :  { %v3909_v46 = vadd.f32 %v3908_v21, %v3890_v58 }
 0x239   :  { %v11915_v26 = vadd.f32 %v3939_v25, %v3921_v37 }
 0x23b   :  { %3957 = vadd.xlane.f32.xlu2 %v11915_v26  ;;  %v3965_v9 = vmul.f32 %v11915_v26, %v11915_v26 }
 0x23d   :  { %3969 = vadd.xlane.f32.xlu0 %v3965_v9 }
 0x23e   :  { %v3922_v40 = vpop.f32.mrf.mxu0  ;;  %v3941_v11 = vpop.f32.mrf.mxu1 }
 0x23f   :  { %v3923_v44 = vadd.f32 %v3922_v40, %v3904_v33 }
 0x241   :  { %v11921_v12 = vadd.f32 %v3941_v11, %v3923_v44 }
 0x243   :  { %3959 = vadd.xlane.f32.xlu2 %v11921_v12  ;;  %v3966_v54 = vmul.f32 %v11921_v12, %v11921_v12 }
 0x245   :  { %3971 = vadd.xlane.f32.xlu1 %v3966_v54 }
 0x246   :  { %v3925_v57 = vpop.f32.mrf.mxu0  ;;  %v3944_v20 = vpop.f32.mrf.mxu1 }
 0x247   :  { %v3926_v2 = vadd.f32 %v3925_v57, %v3907_v15 }
 0x249   :  { %v11926_v10 = vadd.f32 %v3944_v20, %v3926_v2 }
 0x24b   :  { %3961 = vadd.xlane.f32.xlu0 %v11926_v10  ;;  %v3967_v62 = vmul.f32 %v11926_v10, %v11926_v10 }
 0x24d   :  { %3973 = vadd.xlane.f32.xlu1 %v3967_v62 }
 0x24e   :  { %v3927_v47 = vpop.f32.mrf.mxu0  ;;  %v3946_v17 = vpop.f32.mrf.mxu1 }
 0x24f   :  { %v3928_v50 = vadd.f32 %v3927_v47, %v3909_v46 }
 0x251   :  { %v11931_v63 = vadd.f32 %v3946_v17, %v3928_v50 }
 0x253   :  { %3963 = vadd.xlane.f32.xlu0 %v11931_v63  ;;  %v3968_v23 = vmul.f32 %v11931_v63, %v11931_v63 }
 0x25b   :  { %4086 = vperm.xlu2 %11496, %v3956_v48  }
 0x263   :  { %4047 = vperm.xlu2 %11496, %v3949_v18  }
 0x266   :  { %4081 = vperm.xlu1 %11498, %v3955_v35  }
 0x267   :  { %4062 = vperm.xlu0 %11497, %v3952_v36  }
 0x26b   :  { %4071 = vperm.xlu2 %11496, %v3953_v51  }
 0x26e   :  { %4052 = vperm.xlu1 %11498, %v3950_v52  }
 0x26f   :  { %8071 = vperm.xlu0 %11497, %v7965_v8  }
 0x273   :  { %8066 = vperm.xlu2 %11496, %v7964_v5  }
 0x277   :  { %8085 = vperm.xlu0 %11497, %v7967_v42  }
 0x298   :  { %3975 = vadd.xlane.f32.xlu1 %v3968_v23 }
 0x2ae   :  { %v3958_v34 = vpop.xlane.xlu2 %3957 }
 0x2af   :  { %v11978_v30 = vmul.f32 0.0078125, %v3958_v34 }
 0x2b0   :  { %v3970_v27 = vpop.xlane.xlu0 %3969 }
 0x2b1   :  { %4076 = vperm.xlu1 %11498, %v3954_v55   ;;  %v3985_v32 = vmul.f32 %v11978_v30, %v11978_v30  ;;  %v3981_v31 = vmul.f32 0.0078125, %v3970_v27 }
 0x2b3   :  { %v3989_v6 = vsub.f32 %v3981_v31, %v3985_v32 }
 0x2b5   :  { %v3997_v4 = vadd.f32 1e-05, %v3989_v6 }
 0x2b6   :  { %v3960_v19 = vpop.xlane.xlu2 %3959 }
 0x2b7   :  { %v11980_v0 = vmul.f32 0.0078125, %v3960_v19  ;;  %vm4007_vm6 = vweird.f32 %v3997_v4 }
 0x2b8   :  { %v3972_v43 = vpop.xlane.xlu1 %3971 }
 0x2b9   :  { %8061 = vperm.xlu1 %11498, %v7963_v16   ;;  %v3986_v37 = vmul.f32 %v11980_v0, %v11980_v0  ;;  %v3982_v39 = vmul.f32 0.0078125, %v3972_v43  ;;  %v3994_v34 = vsub.f32 %v11921_v12, %v11980_v0 }
 0x2bb   :  { %v3990_v29 = vsub.f32 %v3982_v39, %v3986_v37 }
 0x2bd   :  { %v3998_v9 = vadd.f32 1e-05, %v3990_v29 }
 0x2be   :  { %v3962_v41 = vpop.xlane.xlu0 %3961  ;;  %v4087_v62 = vpop.permute.xlu2 %4086 }
 0x2bf   :  { %v11974_v59 = vmul.f32 0.0078125, %v3962_v41  ;;  %vm4017_vm8 = vweird.f32 %v3998_v9 }
 0x2c0   :  { %v3974_v60 = vpop.xlane.xlu1 %3973 }
 0x2c1   :  { %8076 = vperm.xlu1 %11498, %v7966_v24   ;;  %v3987_v61 = vmul.f32 %v11974_v59, %v11974_v59  ;;  %v3983_v3 = vmul.f32 0.0078125, %v3974_v60  ;;  %v3995_v5 = vsub.f32 %v11926_v10, %v11974_v59  ;;  %v3993_v10 = vsub.f32 %v11915_v26, %v11978_v30 }
 0x2c3   :  { %v3991_v25 = vsub.f32 %v3983_v3, %v3987_v61 }
 0x2c5   :  { %v3999_v22 = vadd.f32 1e-05, %v3991_v25 }
 0x2c6   :  { %v3964_v40 = vpop.xlane.xlu0 %3963  ;;  %v4048_v36 = vpop.permute.xlu2 %4047 }
 0x2c7   :  { %11499 = vrsqrt.f32 %v3999_v22  ;;  %v3980_v38 = vmul.f32 0.0078125, %v3964_v40  ;;  %vm4027_vm2 = vweird.f32 %v3999_v22  ;;  %v11169_v40 = vld [vmem:[#allocation8 + $0x30] sm:$0xff] }
 0x2c8   :  { %11501 = vrsqrt.f32 %v3997_v4 }
 0x2c9   :  { %11503 = vrsqrt.f32 %v3998_v9  ;;  %v3988_v28 = vmul.f32 %v3980_v38, %v3980_v38  ;;  %v3996_v41 = vsub.f32 %v11931_v63, %v3980_v38  ;;  %v11166_v38 = vld [vmem:[#allocation8 + $0x18] sm:$0xff] }
 0x2cd   :  { %v11500_v33 = vpop.eup %11499 }
 0x2ce   :  { %v4022_v11 = vmul.f32 %v11500_v33, %v3999_v22  ;;  %v11502_v44 = vpop.eup %11501  ;;  %vm4028_vm1 = vweird.f32 %v11500_v33  ;;  %v4072_v26 = vpop.permute.xlu2 %4071 }
 0x2cf   :  { %v11504_v14 = vpop.eup %11503  ;;  %v4002_v15 = vmul.f32 %v11502_v44, %v3997_v4  ;;  %vm4029_vm3 = vmor %vm4027_vm2, %vm4028_vm1  ;;  %vm4008_vm4 = vweird.f32 %v11502_v44 }
 0x2d0   :  { %v4023_v45 = vmul.f32 %v11500_v33, %v4022_v11  ;;  %v4012_v56 = vmul.f32 %v11504_v14, %v3998_v9  ;;  %vm4018_vm5 = vweird.f32 %v11504_v14  ;;  %vm4009_vm7 = vmor %vm4007_vm6, %vm4008_vm4  ;;  %v11163_v9 = vld [vmem:[#allocation8] sm:$0xff]  ;;  %v11164_v11 = vld [vmem:[#allocation8 + $0x8] sm:$0xff] }
 0x2d1   :  { %v4003_v2 = vmul.f32 %v11502_v44, %v4002_v15  ;;  %vm4019_vm10 = vmor %vm4017_vm8, %vm4018_vm5  ;;  %v11172_v15 = vld [vmem:[#allocation8 + $0x48] sm:$0xff] }
 0x2d2   :  { %v4024_v20 = vmul.f32 0.5, %v4023_v45  ;;  %v4013_v58 = vmul.f32 %v11504_v14, %v4012_v56  ;;  %v11171_v45 = vld [vmem:[#allocation8 + $0x40] sm:$0xff]  ;;  %v11174_v56 = vld [vmem:[#allocation8 + $0x58] sm:$0xff] }
 0x2d3   :  { %v4004_v46 = vmul.f32 0.5, %v4003_v2  ;;  %v11181_v2 = vld [vmem:[#allocation8 + $0x90] sm:$0xff] }
 0x2d4   :  { %v4025_v21 = vsub.f32 1.5, %v4024_v20  ;;  %v4014_v47 = vmul.f32 0.5, %v4013_v58  ;;  %v11178_v20 = vld [vmem:[#allocation8 + $0x78] sm:$0xff]  ;;  %v11183_v58 = vld [vmem:[#allocation8 + $0xa0] sm:$0xff] }
 0x2d5   :  { %v4005_v48 = vsub.f32 1.5, %v4004_v46  ;;  %v11182_v46 = vld [vmem:[#allocation8 + $0x98] sm:$0xff] }
 0x2d6   :  { %v4026_v50 = vmul.f32 %v11500_v33, %v4025_v21  ;;  %v4015_v18 = vsub.f32 1.5, %v4014_v47  ;;  %v11180_v21 = vld [vmem:[#allocation8 + $0x88] sm:$0xff] }
 0x2d7   :  { %v4006_v8 = vmul.f32 %v11502_v44, %v4005_v48  ;;  %v11184_v47 = vld [vmem:[#allocation8 + $0xa8] sm:$0xff]  ;;  %v11189_v48 = vld [vmem:[#allocation8 + $0xd0] sm:$0xff] }
 0x2d8   :  { %v11986_v49 = vpop.permute.xlu1 %4081  ;;  %v4030_v51 = vsel %vm4029_vm3, %v11500_v33, %v4026_v50  ;;  %v4016_v23 = vmul.f32 %v11504_v14, %v4015_v18  ;;  %v11167_v33 = vld [vmem:[#allocation8 + $0x20] sm:$0xff]  ;;  %v11186_v50 = vld [vmem:[#allocation8 + $0xb8] sm:$0xff] }
 0x2d9   :  { %v4043_v55 = vmul.f32 %v4030_v51, %v3995_v5  ;;  %v4010_v24 = vsel %vm4009_vm7, %v11502_v44, %v4006_v8  ;;  %v4063_v25 = vpop.permute.xlu0 %4062  ;;  %v11168_v44 = vld [vmem:[#allocation8 + $0x28] sm:$0xff]  ;;  %v11191_v18 = vld [vmem:[#allocation8 + $0xe0] sm:$0xff] }
 0x2da   :  { %v4020_v27 = vsel %vm4019_vm10, %v11504_v14, %v4016_v23  ;;  %v4041_v19 = vmul.f32 %v4010_v24, %v3993_v10  ;;  %v11170_v14 = vld [vmem:[#allocation8 + $0x38] sm:$0xff]  ;;  %v11188_v51 = vld [vmem:[#allocation8 + $0xc8] sm:$0xff]  ;;  %v11195_v8 = vld [vmem:[#allocation8 + $0x100] sm:$0xff] }
 0x2db   :  { %v4067_v59 = vmul.f32 %v11972_v13, %v4043_v55  ;;  %v4042_v61 = vmul.f32 %v4020_v27, %v3994_v34  ;;  %v11192_v5 = vld [vmem:[#allocation8 + $0xe8] sm:$0xff]  ;;  %v11197_v23 = vld [vmem:[#allocation8 + $0x110] sm:$0xff] }
 0x2dc   :  { %v4065_v30 = vmul.f32 %v4048_v36, %v4041_v19  ;;  %v11194_v36 = vld [vmem:[#allocation8 + $0xf8] sm:$0xff]  ;;  %v11201_v55 = vld [vmem:[#allocation8 + $0x130] sm:$0xff]  ;;  %v11278_v10 = vld [vmem:[#allocation3 + $0x38] sm:$0xff] }
 0x2dd   :  { %v4091_v31 = vadd.f32 %v11986_v49, %v4067_v59 }
 0x2de   :  { %v4089_v0 = vadd.f32 %v4072_v26, %v4065_v30 }
 0x2df   :  { %v4095_v63 = vmax.f32 %v4091_v31, 0.0  ;;  %v11276_v31 = vld [vmem:[#allocation3 + $0x28] sm:$0xff] }
 0x2e0   :  { %v11988_v7 = vpop.permute.xlu1 %4052  ;;  %v4093_v4 = vmax.f32 %v4089_v0, 0.0  ;;  %v11200_v0 = vld [vmem:[#allocation8 + $0x128] sm:$0xff] }
 0x2e1   :  { %v4066_v37 = vmul.f32 %v11988_v7, %v4042_v61  ;;  %v11165_v7 = vld [vmem:[#allocation8 + $0x10] sm:$0xff] }
 0x30b   :  { %v3976_v53 = vpop.xlane.xlu1 %3975 }
 0x30c   :  { %v3984_v54 = vmul.f32 0.0078125, %v3976_v53  ;;  %v11173_v53 = vld [vmem:[#allocation8 + $0x50] sm:$0xff] }
 0x30e   :  { %v3992_v57 = vsub.f32 %v3984_v54, %v3988_v28  ;;  %v11175_v28 = vld [vmem:[#allocation8 + $0x60] sm:$0xff]  ;;  %v11177_v54 = vld [vmem:[#allocation8 + $0x70] sm:$0xff] }
 0x310   :  { %v4000_v1 = vadd.f32 1e-05, %v3992_v57  ;;  %v11176_v57 = vld [vmem:[#allocation8 + $0x68] sm:$0xff] }
 0x312   :  { %11505 = vrsqrt.f32 %v4000_v1  ;;  %vm4037_vm11 = vweird.f32 %v4000_v1 }
 0x318   :  { %v11506_v17 = vpop.eup %11505 }
 0x319   :  { %v4032_v35 = vmul.f32 %v11506_v17, %v4000_v1  ;;  %vm4038_vm9 = vweird.f32 %v11506_v17  ;;  %v11179_v1 = vld [vmem:[#allocation8 + $0x80] sm:$0xff] }
 0x31a   :  { %vm4039_vm12 = vmor %vm4037_vm11, %vm4038_vm9 }
 0x31b   :  { %v4033_v52 = vmul.f32 %v11506_v17, %v4032_v35  ;;  %v11193_v35 = vld [vmem:[#allocation8 + $0xf0] sm:$0xff] }
 0x31d   :  { %v4034_v42 = vmul.f32 0.5, %v4033_v52  ;;  %v11190_v52 = vld [vmem:[#allocation8 + $0xd8] sm:$0xff] }
 0x31f   :  { %v4035_v16 = vsub.f32 1.5, %v4034_v42  ;;  %v11199_v42 = vld [vmem:[#allocation8 + $0x120] sm:$0xff] }
 0x321   :  { %v4036_v43 = vmul.f32 %v11506_v17, %v4035_v16 }
 0x323   :  { %v4040_v60 = vsel %vm4039_vm12, %v11506_v17, %v4036_v43  ;;  %v4077_v32 = vpop.permute.xlu1 %4076  ;;  %v11187_v17 = vld [vmem:[#allocation8 + $0xc0] sm:$0xff] }
 0x324   :  { %v4044_v3 = vmul.f32 %v4040_v60, %v3996_v41  ;;  %v4090_v12 = vadd.f32 %v4077_v32, %v4066_v37 }
 0x326   :  { %v4068_v39 = vmul.f32 %v4063_v25, %v4044_v3  ;;  %v4094_v29 = vmax.f32 %v4090_v12, 0.0  ;;  %v11277_v3 = vld [vmem:[#allocation3 + $0x30] sm:$0xff]  ;;  %v11198_v12 = vld [vmem:[#allocation8 + $0x118] sm:$0xff] }
 0x328   :  { %v4092_v22 = vadd.f32 %v4087_v62, %v4068_v39  ;;  %v12006_v49 = vpack.c.bf16 %v4094_v29, %v4093_v4  ;;  %v11185_v62 = vld [vmem:[#allocation8 + $0xb0] sm:$0xff] }
 0x329   :  { %v11275_v29 = vld [vmem:[#allocation3 + $0x20] sm:$0xff] }
 0x32a   :  { %v4096_v6 = vmax.f32 %v4092_v22, 0.0  ;;  %v11196_v22 = vld [vmem:[#allocation8 + $0x108] sm:$0xff] }
 0x32c   :  { %v12000_v13 = vpack.c.bf16 %v4096_v6, %v4095_v63  ;;  %v11202_v63 = vld [vmem:[#allocation8 + $0x138] sm:$0xff] }
 0x32e   :  { %4125 = vmatpush.bf16.msrb.mxu2 %v12000_v13  ;;  %4173 = vmatpush.bf16.msrb.mxu3 %v12000_v13 }
 0x32f   :  { %4221 = vmatpush.bf16.msra.mxu0 %v12000_v13  ;;  %4269 = vmatpush.bf16.msra.mxu1 %v12000_v13 }
 0x332   :  { %4126 = vmatpush.bf16.msrb.mxu2 %v12006_v49  ;;  %4174 = vmatpush.bf16.msrb.mxu3 %v12006_v49 }
 0x333   :  { %4222 = vmatpush.bf16.msra.mxu0 %v12006_v49  ;;  %4270 = vmatpush.bf16.msra.mxu1 %v12006_v49 }
 0x335   :  { %9497 = vmatmul.msk.bf16.vlgmr.msrb.gmra.mxu2 %vm98_vm0, %v11163_v9  ;;  %9507 = vmatmul.msk.bf16.vlgmr.msrb.gmra.mxu3 %vm98_vm0, %v11165_v7  ;;  %v11274_v9 = vld [vmem:[#allocation3 + $0x18] sm:$0xff] }
 0x336   :  { %4317 = vmatpush.bf16.msra.mxu2 %v12000_v13  ;;  %4365 = vmatpush.bf16.msra.mxu3 %v12000_v13 }
 0x337   :  { %4413 = vmatpush.bf16.msrb.mxu0 %v12000_v13  ;;  %4461 = vmatpush.bf16.msrb.mxu1 %v12000_v13 }
 0x338   :  { %9517 = vmatmul.msk.bf16.vlgmr.msra.gmra.mxu0 %vm98_vm0, %v11167_v33  ;;  %9527 = vmatmul.msk.bf16.vlgmr.msra.gmra.mxu1 %vm98_vm0, %v11169_v40 }
 0x33a   :  { %4318 = vmatpush.bf16.msra.mxu2 %v12006_v49  ;;  %4366 = vmatpush.bf16.msra.mxu3 %v12006_v49 }
 0x33b   :  { %4414 = vmatpush.bf16.msrb.mxu0 %v12006_v49  ;;  %4462 = vmatpush.bf16.msrb.mxu1 %v12006_v49 }
 0x33e   :  { %4509 = vmatpush.bf16.msrb.mxu2 %v12000_v13  ;;  %4557 = vmatpush.bf16.msrb.mxu3 %v12000_v13 }
 0x33f   :  { %4605 = vmatpush.bf16.msra.mxu0 %v12000_v13  ;;  %4653 = vmatpush.bf16.msra.mxu1 %v12000_v13 }
 0x342   :  { %4510 = vmatpush.bf16.msrb.mxu2 %v12006_v49  ;;  %4558 = vmatpush.bf16.msrb.mxu3 %v12006_v49 }
 0x343   :  { %4606 = vmatpush.bf16.msra.mxu0 %v12006_v49  ;;  %4654 = vmatpush.bf16.msra.mxu1 %v12006_v49 }
 0x345   :  { %9498 = vmatmul.msk.bf16.gmra.mxu2 %vm98_vm0, %v11164_v11  ;;  %9508 = vmatmul.msk.bf16.gmra.mxu3 %vm98_vm0, %v11166_v38 }
 0x348   :  { %9518 = vmatmul.msk.bf16.gmra.mxu0 %vm98_vm0, %v11168_v44  ;;  %9528 = vmatmul.msk.bf16.gmra.mxu1 %vm98_vm0, %v11170_v14  ;;  %v11273_v14 = vld [vmem:[#allocation3 + $0x10] sm:$0xff] }
 0x355   :  { %9537 = vmatmul.msk.bf16.vlgmr.msra.gmra.mxu2 %vm98_vm0, %v11171_v45  ;;  %9547 = vmatmul.msk.bf16.vlgmr.msra.gmra.mxu3 %vm98_vm0, %v11173_v53 }
 0x356   :  { %4701 = vmatpush.bf16.msra.mxu2 %v12000_v13  ;;  %4749 = vmatpush.bf16.msra.mxu3 %v12000_v13 }
 0x358   :  { %9557 = vmatmul.msk.bf16.vlgmr.msrb.gmra.mxu0 %vm98_vm0, %v11175_v28  ;;  %9567 = vmatmul.msk.bf16.vlgmr.msrb.gmra.mxu1 %vm98_vm0, %v11177_v54  ;;  %v11272_v28 = vld [vmem:[#allocation3 + $0x8] sm:$0xff] }
 0x359   :  { %4797 = vmatpush.bf16.msrb.mxu0 %v12000_v13  ;;  %4845 = vmatpush.bf16.msrb.mxu1 %v12000_v13 }
 0x35a   :  { %4702 = vmatpush.bf16.msra.mxu2 %v12006_v49  ;;  %4750 = vmatpush.bf16.msra.mxu3 %v12006_v49 }
 0x35d   :  { %4798 = vmatpush.bf16.msrb.mxu0 %v12006_v49  ;;  %4846 = vmatpush.bf16.msrb.mxu1 %v12006_v49 }
 0x365   :  { %9538 = vmatmul.msk.bf16.gmra.mxu2 %vm98_vm0, %v11172_v15  ;;  %9548 = vmatmul.msk.bf16.gmra.mxu3 %vm98_vm0, %v11174_v56 }
 0x368   :  { %9558 = vmatmul.msk.bf16.gmra.mxu0 %vm98_vm0, %v11176_v57  ;;  %9568 = vmatmul.msk.bf16.gmra.mxu1 %vm98_vm0, %v11178_v20  ;;  %v11203_v20 = vld [vmem:[#allocation8 + $0x140] sm:$0xff] }
 0x375   :  { %9577 = vmatmul.msk.bf16.vlgmr.msrb.gmra.mxu2 %vm98_vm0, %v11179_v1  ;;  %9587 = vmatmul.msk.bf16.vlgmr.msrb.gmra.mxu3 %vm98_vm0, %v11181_v2  ;;  %v11205_v1 = vld [vmem:[#allocation8 + $0x150] sm:$0xff]  ;;  %v11207_v2 = vld [vmem:[#allocation8 + $0x160] sm:$0xff] }
 0x376   :  { %4893 = vmatpush.bf16.msrb.mxu2 %v12000_v13  ;;  %4941 = vmatpush.bf16.msrb.mxu3 %v12000_v13 }
 0x378   :  { %9597 = vmatmul.msk.bf16.vlgmr.msra.gmra.mxu0 %vm98_vm0, %v11183_v58  ;;  %9607 = vmatmul.msk.bf16.vlgmr.msra.gmra.mxu1 %vm98_vm0, %v11185_v62  ;;  %v11209_v58 = vld [vmem:[#allocation8 + $0x170] sm:$0xff] }
 0x379   :  { %4989 = vmatpush.bf16.msra.mxu0 %v12000_v13  ;;  %5037 = vmatpush.bf16.msra.mxu1 %v12000_v13 }
 0x37a   :  { %4894 = vmatpush.bf16.msrb.mxu2 %v12006_v49  ;;  %4942 = vmatpush.bf16.msrb.mxu3 %v12006_v49 }
 0x37d   :  { %4990 = vmatpush.bf16.msra.mxu0 %v12006_v49  ;;  %5038 = vmatpush.bf16.msra.mxu1 %v12006_v49 }
 0x385   :  { %9578 = vmatmul.msk.bf16.gmra.mxu2 %vm98_vm0, %v11180_v21  ;;  %9588 = vmatmul.msk.bf16.gmra.mxu3 %vm98_vm0, %v11182_v46  ;;  %v11271_v46 = vld [vmem:[#allocation3] sm:$0xff] }
 0x388   :  { %9598 = vmatmul.msk.bf16.gmra.mxu0 %vm98_vm0, %v11184_v47  ;;  %9608 = vmatmul.msk.bf16.gmra.mxu1 %vm98_vm0, %v11186_v50 }
 0x395   :  { %9617 = vmatmul.msk.bf16.vlgmr.msra.gmra.mxu2 %vm98_vm0, %v11187_v17  ;;  %9627 = vmatmul.msk.bf16.vlgmr.msra.gmra.mxu3 %vm98_vm0, %v11189_v48  ;;  %v11286_v17 = vld [vmem:[#allocation3 + $0x78] sm:$0xff] }
 0x396   :  { %5085 = vmatpush.bf16.msra.mxu2 %v12000_v13  ;;  %5133 = vmatpush.bf16.msra.mxu3 %v12000_v13  ;;  %v11294_v48 = vld [vmem:[#allocation3 + $0xb8] sm:$0xff] }
 0x398   :  { %9637 = vmatmul.msk.bf16.vlgmr.msrb.gmra.mxu0 %vm98_vm0, %v11191_v18  ;;  %9647 = vmatmul.msk.bf16.vlgmr.msrb.gmra.mxu1 %vm98_vm0, %v11193_v35  ;;  %v11302_v18 = vld [vmem:[#allocation3 + $0xf8] sm:$0xff] }
 0x399   :  { %5181 = vmatpush.bf16.msrb.mxu0 %v12000_v13  ;;  %5229 = vmatpush.bf16.msrb.mxu1 %v12000_v13 }
 0x39a   :  { %5086 = vmatpush.bf16.msra.mxu2 %v12006_v49  ;;  %5134 = vmatpush.bf16.msra.mxu3 %v12006_v49 }
 0x39d   :  { %5182 = vmatpush.bf16.msrb.mxu0 %v12006_v49  ;;  %5230 = vmatpush.bf16.msrb.mxu1 %v12006_v49 }
 0x3a5   :  { %9618 = vmatmul.msk.bf16.gmra.mxu2 %vm98_vm0, %v11188_v51  ;;  %9628 = vmatmul.msk.bf16.gmra.mxu3 %vm98_vm0, %v11190_v52  ;;  %v11310_v52 = vld [vmem:[#allocation3 + $0x138] sm:$0xff] }
 0x3a8   :  { %9638 = vmatmul.msk.bf16.gmra.mxu0 %vm98_vm0, %v11192_v5  ;;  %9648 = vmatmul.msk.bf16.gmra.mxu1 %vm98_vm0, %v11194_v36 }
 0x3b5   :  { %v4224_v16 = vpop.f32.mrf.mxu0  ;;  %v4272_v24 = vpop.f32.mrf.mxu1  ;;  %9657 = vmatmul.msk.bf16.vlgmr.msrb.gmra.mxu2 %vm98_vm0, %v11195_v8  ;;  %9667 = vmatmul.msk.bf16.vlgmr.msrb.gmra.mxu3 %vm98_vm0, %v11197_v23 }
 0x3b6   :  { %v4234_v27 = vpack.c.bf16 %v4224_v16, %v4224_v16  ;;  %v4282_v43 = vpack.c.bf16 %v4272_v24, %v4272_v24  ;;  %5277 = vmatpush.bf16.msrb.mxu2 %v12000_v13  ;;  %5325 = vmatpush.bf16.msrb.mxu3 %v12000_v13  ;;  %v11301_v16 = vld [vmem:[#allocation3 + $0xf0] sm:$0xff] }
 0x3b8   :  { %4238 = vst [vmem:[#allocation2 + $0x8] sm:$0xf] %v4234_v27  ;;  %9677 = vmatmul.msk.bf16.vlgmr.msra.gmra.mxu0 %vm98_vm0, %v11199_v42  ;;  %9687 = vmatmul.msk.bf16.vlgmr.msra.gmra.mxu1 %vm98_vm0, %v11201_v55  ;;  %v4128_v34 = vpop.f32.mrf.mxu2  ;;  %v4176_v41 = vpop.f32.mrf.mxu3  ;;  %v11285_v42 = vld [vmem:[#allocation3 + $0x70] sm:$0xff] }
 0x3b9   :  { %4286 = vst [vmem:[#allocation2 + $0xc] sm:$0xf] %v4282_v43  ;;  %5373 = vmatpush.bf16.msra.mxu0 %v12000_v13  ;;  %v4138_v59 = vpack.c.bf16 %v4128_v34, %v4128_v34  ;;  %v4186_v60 = vpack.c.bf16 %v4176_v41, %v4176_v41  ;;  %7450 = vmatpush.bf16.msra.mxu1 %v11278_v10  ;;  %v11293_v55 = vld [vmem:[#allocation3 + $0xb0] sm:$0xff]  ;;  %v11284_v10 = vld [vmem:[#allocation3 + $0x68] sm:$0xff] }
 0x3ba   :  { %5278 = vmatpush.bf16.msrb.mxu2 %v12006_v49  ;;  %5326 = vmatpush.bf16.msrb.mxu3 %v12006_v49  ;;  %v11309_v43 = vld [vmem:[#allocation3 + $0x130] sm:$0xff]  ;;  %v11292_v34 = vld [vmem:[#allocation3 + $0xa8] sm:$0xff] }
 0x3bb   :  { %4142 = vst [vmem:[#allocation2] sm:$0xf] %v4138_v59  ;;  %v11300_v41 = vld [vmem:[#allocation3 + $0xe8] sm:$0xff] }
 0x3bc   :  { %4190 = vst [vmem:[#allocation2 + $0x4] sm:$0xf] %v4186_v60 }
 0x3bd   :  { %v4226_v19 = vpop.f32.mrf.mxu0  ;;  %v4274_v61 = vpop.f32.mrf.mxu1  ;;  %5374 = vmatpush.bf16.msra.mxu0 %v12006_v49  ;;  %7451 = vmatpush.bf16.msra.mxu1 %v11277_v3 }
 0x3be   :  { %v4235_v25 = vpack.c.bf16 %v4226_v19, %v4226_v19  ;;  %v4283_v32 = vpack.c.bf16 %v4274_v61, %v4274_v61  ;;  %v11308_v19 = vld [vmem:[#allocation3 + $0x128] sm:$0xff] }
 0x3c0   :  { %4239 = vst [vmem:[#allocation2 + $0x74] sm:$0xf] %v4235_v25  ;;  %v4130_v37 = vpop.f32.mrf.mxu2  ;;  %v4178_v39 = vpop.f32.mrf.mxu3  ;;  %v11204_v25 = vld [vmem:[#allocation8 + $0x148] sm:$0xff] }
 0x3c1   :  { %4287 = vst [vmem:[#allocation2 + $0x78] sm:$0xf] %v4283_v32  ;;  %v4139_v26 = vpack.c.bf16 %v4130_v37, %v4130_v37  ;;  %v4187_v30 = vpack.c.bf16 %v4178_v39, %v4178_v39  ;;  %7452 = vmatpush.bf16.msra.mxu1 %v11276_v31  ;;  %v11206_v32 = vld [vmem:[#allocation8 + $0x158] sm:$0xff]  ;;  %v11208_v31 = vld [vmem:[#allocation8 + $0x168] sm:$0xff] }
 0x3c2   :  { %v11210_v37 = vld [vmem:[#allocation8 + $0x178] sm:$0xff] }
 0x3c3   :  { %4143 = vst [vmem:[#allocation2 + $0x6c] sm:$0xf] %v4139_v26 }
 0x3c4   :  { %4191 = vst [vmem:[#allocation2 + $0x70] sm:$0xf] %v4187_v30  ;;  %v11283_v30 = vld [vmem:[#allocation3 + $0x60] sm:$0xff] }
 0x3c5   :  { %v4229_v6 = vpop.f32.mrf.mxu0  ;;  %v4277_v13 = vpop.f32.mrf.mxu1  ;;  %9658 = vmatmul.msk.bf16.gmra.mxu2 %vm98_vm0, %v11196_v22  ;;  %9668 = vmatmul.msk.bf16.gmra.mxu3 %vm98_vm0, %v11198_v12  ;;  %v11291_v22 = vld [vmem:[#allocation3 + $0xa0] sm:$0xff] }
 0x3c6   :  { %v4236_v4 = vpack.c.bf16 %v4229_v6, %v4229_v6  ;;  %v4284_v49 = vpack.c.bf16 %v4277_v13, %v4277_v13  ;;  %7453 = vmatpush.bf16.msra.mxu1 %v11275_v29  ;;  %v11307_v6 = vld [vmem:[#allocation3 + $0x120] sm:$0xff]  ;;  %v11282_v13 = vld [vmem:[#allocation3 + $0x58] sm:$0xff] }
 0x3c7   :  { %v11290_v29 = vld [vmem:[#allocation3 + $0x98] sm:$0xff] }
 0x3c8   :  { %4240 = vst [vmem:[#allocation2 + $0xe0] sm:$0xf] %v4236_v4  ;;  %9678 = vmatmul.msk.bf16.gmra.mxu0 %vm98_vm0, %v11200_v0  ;;  %9688 = vmatmul.msk.bf16.gmra.mxu1 %vm98_vm0, %v11202_v63  ;;  %v4133_v7 = vpop.f32.mrf.mxu2  ;;  %v4181_v33 = vpop.f32.mrf.mxu3  ;;  %v11299_v63 = vld [vmem:[#allocation3 + $0xe0] sm:$0xff] }
 0x3c9   :  { %4288 = vst [vmem:[#allocation2 + $0xe4] sm:$0xf] %v4284_v49  ;;  %v4140_v40 = vpack.c.bf16 %v4133_v7, %v4133_v7  ;;  %v4188_v11 = vpack.c.bf16 %v4181_v33, %v4181_v33  ;;  %v11306_v7 = vld [vmem:[#allocation3 + $0x118] sm:$0xff] }
 0x3ca   :  { %7454 = vmatpush.bf16.msra.mxu1 %v11274_v9  ;;  %v11298_v9 = vld [vmem:[#allocation3 + $0xd8] sm:$0xff] }
 0x3cb   :  { %4144 = vst [vmem:[#allocation2 + $0xd8] sm:$0xf] %v4140_v40 }
 0x3cc   :  { %4192 = vst [vmem:[#allocation2 + $0xdc] sm:$0xf] %v4188_v11 }
 0x3cd   :  { %v4231_v38 = vpop.f32.mrf.mxu0  ;;  %v4279_v44 = vpop.f32.mrf.mxu1 }
 0x3ce   :  { %v4237_v45 = vpack.c.bf16 %v4231_v38, %v4231_v38  ;;  %v4285_v53 = vpack.c.bf16 %v4279_v44, %v4279_v44  ;;  %7455 = vmatpush.bf16.msra.mxu1 %v11273_v14  ;;  %v11281_v44 = vld [vmem:[#allocation3 + $0x50] sm:$0xff] }
 0x3cf   :  { %v11289_v14 = vld [vmem:[#allocation3 + $0x90] sm:$0xff] }
 0x3d0   :  { %4241 = vst [vmem:[#allocation2 + $0x14c] sm:$0xf] %v4237_v45  ;;  %v4135_v54 = vpop.f32.mrf.mxu2  ;;  %v4183_v15 = vpop.f32.mrf.mxu3 }
 0x3d1   :  { %4289 = vst [vmem:[#allocation2 + $0x150] sm:$0xf] %v4285_v53  ;;  %v4141_v56 = vpack.c.bf16 %v4135_v54, %v4135_v54  ;;  %v4189_v57 = vpack.c.bf16 %v4183_v15, %v4183_v15  ;;  %v11305_v54 = vld [vmem:[#allocation3 + $0x110] sm:$0xff]  ;;  %v11280_v15 = vld [vmem:[#allocation3 + $0x48] sm:$0xff] }
 0x3d2   :  { %7456 = vmatpush.bf16.msra.mxu1 %v11272_v28  ;;  %v11297_v28 = vld [vmem:[#allocation3 + $0xd0] sm:$0xff] }
 0x3d3   :  { %4145 = vst [vmem:[#allocation2 + $0x144] sm:$0xf] %v4141_v56  ;;  %v11288_v56 = vld [vmem:[#allocation3 + $0x88] sm:$0xff] }
 0x3d4   :  { %4193 = vst [vmem:[#allocation2 + $0x148] sm:$0xf] %v4189_v57 }
 0x3d5   :  { %v4416_v62 = vpop.f32.mrf.mxu0  ;;  %v4464_v21 = vpop.f32.mrf.mxu1  ;;  %9697 = vmatmul.msk.bf16.vlgmr.msra.gmra.mxu2 %vm98_vm0, %v11203_v20  ;;  %9707 = vmatmul.msk.bf16.vlgmr.msra.gmra.mxu3 %vm98_vm0, %v11205_v1  ;;  %v11296_v1 = vld [vmem:[#allocation3 + $0xc8] sm:$0xff] }
 0x3d6   :  { %v4426_v47 = vpack.c.bf16 %v4416_v62, %v4416_v62  ;;  %v4474_v50 = vpack.c.bf16 %v4464_v21, %v4464_v21  ;;  %7457 = vmatpush.bf16.msra.mxu1 %v11271_v46  ;;  %7469 = vmatpush.bf16.msra.mxu2 %v11286_v17  ;;  %v11211_v21 = vld [vmem:[#allocation8 + $0x180] sm:$0xff]  ;;  %v11213_v46 = vld [vmem:[#allocation8 + $0x190] sm:$0xff] }
 0x3d7   :  { %7488 = vmatpush.bf16.msra.mxu3 %v11294_v48 }
 0x3d8   :  { %4430 = vst [vmem:[#allocation2 + $0x18] sm:$0xf] %v4426_v47  ;;  %9717 = vmatmul.msk.bf16.vlgmr.msrb.gmra.mxu0 %vm98_vm0, %v11207_v2  ;;  %9727 = vmatmul.msk.bf16.vlgmr.msrb.gmra.mxu1 %vm98_vm0, %v11209_v58  ;;  %v4320_v35 = vpop.f32.mrf.mxu2  ;;  %v4368_v51 = vpop.f32.mrf.mxu3  ;;  %v11304_v2 = vld [vmem:[#allocation3 + $0x108] sm:$0xff]  ;;  %v11230_v47 = vld [vmem:[#allocation2 + $0x68] sm:$0xf0] }
 0x3d9   :  { %4478 = vst [vmem:[#allocation2 + $0x1c] sm:$0xf] %v4474_v50  ;;  %v4330_v5 = vpack.c.bf16 %v4320_v35, %v4320_v35  ;;  %v4378_v36 = vpack.c.bf16 %v4368_v51, %v4368_v51  ;;  %7507 = vmatpush.bf16.msrb.mxu0 %v11302_v18  ;;  %v11215_v50 = vld [vmem:[#allocation8 + $0x1a0] sm:$0xff]  ;;  %v11279_v35 = vld [vmem:[#allocation3 + $0x40] sm:$0xff] }
 0x3da   :  { %7526 = vmatpush.bf16.msrb.mxu1 %v11310_v52  ;;  %7470 = vmatpush.bf16.msra.mxu2 %v11285_v42  ;;  %v9761_v18 = vld [vmem:[#allocation2] sm:$0xf]  ;;  %v11287_v51 = vld [vmem:[#allocation3 + $0x80] sm:$0xff]  ;;  %v11318_v42 = vld [vmem:[#allocation3 + $0x178] sm:$0xff] }
 0x3db   :  { %4334 = vst [vmem:[#allocation2 + $0x10] sm:$0xf] %v4330_v5  ;;  %7489 = vmatpush.bf16.msra.mxu3 %v11293_v55  ;;  %v11326_v55 = vld [vmem:[#allocation3 + $0x1b8] sm:$0xff] }
 0x3dc   :  { %4382 = vst [vmem:[#allocation2 + $0x14] sm:$0xf] %v4378_v36  ;;  %v9762_v36 = vor.u32 %v11230_v47, %v9761_v18  ;;  %v11329_v47 = vld [vmem:[#allocation3 + $0x1d0] sm:$0xff]  ;;  %v11218_v18 = vld [vmem:[#allocation2 + $0xc] sm:$0xf] }
 0x3dd   :  { %v4418_v8 = vpop.f32.mrf.mxu0  ;;  %v4466_v23 = vpop.f32.mrf.mxu1  ;;  %7508 = vmatpush.bf16.msrb.mxu0 %v11301_v16  ;;  %v11334_v16 = vld [vmem:[#allocation3 + $0x1f8] sm:$0xff] }
 0x3de   :  { %v4427_v24 = vpack.c.bf16 %v4418_v8, %v4418_v8  ;;  %v4475_v27 = vpack.c.bf16 %v4466_v23, %v4466_v23  ;;  %7527 = vmatpush.bf16.msrb.mxu1 %v11309_v43  ;;  %7471 = vmatpush.bf16.msra.mxu2 %v11284_v10  ;;  %v11295_v8 = vld [vmem:[#allocation3 + $0xc0] sm:$0xff]  ;;  %v11342_v43 = vld [vmem:[#allocation3 + $0x238] sm:$0xff] }
 0x3df   :  { %7490 = vmatpush.bf16.msra.mxu3 %v11292_v34  ;;  %v11303_v23 = vld [vmem:[#allocation3 + $0x100] sm:$0xff] }
 0x3e0   :  { %4431 = vst [vmem:[#allocation2 + $0x84] sm:$0xf] %v4427_v24  ;;  %v4322_v59 = vpop.f32.mrf.mxu2  ;;  %v4370_v60 = vpop.f32.mrf.mxu3 }
 0x3e1   :  { %4479 = vst [vmem:[#allocation2 + $0x88] sm:$0xf] %v4475_v27  ;;  %v4331_v61 = vpack.c.bf16 %v4322_v59, %v4322_v59  ;;  %v4379_v3 = vpack.c.bf16 %v4370_v60, %v4370_v60  ;;  %7509 = vmatpush.bf16.msrb.mxu0 %v11300_v41  ;;  %v11317_v60 = vld [vmem:[#allocation3 + $0x170] sm:$0xff] }
 0x3e2   :  { %7528 = vmatpush.bf16.msrb.mxu1 %v11308_v19  ;;  %7472 = vmatpush.bf16.msra.mxu2 %v11283_v30  ;;  %v11325_v19 = vld [vmem:[#allocation3 + $0x1b0] sm:$0xff] }
 0x3e3   :  { %4335 = vst [vmem:[#allocation2 + $0x7c] sm:$0xf] %v4331_v61  ;;  %7491 = vmatpush.bf16.msra.mxu3 %v11291_v22  ;;  %v11333_v61 = vld [vmem:[#allocation3 + $0x1f0] sm:$0xff]  ;;  %v11340_v22 = vld [vmem:[#allocation3 + $0x228] sm:$0xff] }
 0x3e4   :  { %4383 = vst [vmem:[#allocation2 + $0x80] sm:$0xf] %v4379_v3 }
 0x3e5   :  { %v4421_v39 = vpop.f32.mrf.mxu0  ;;  %v4469_v26 = vpop.f32.mrf.mxu1  ;;  %9698 = vmatmul.msk.bf16.gmra.mxu2 %vm98_vm0, %v11204_v25  ;;  %9708 = vmatmul.msk.bf16.gmra.mxu3 %vm98_vm0, %v11206_v32  ;;  %v11341_v32 = vld [vmem:[#allocation3 + $0x230] sm:$0xff] }
 0x3e6   :  { %v4428_v12 = vpack.c.bf16 %v4421_v39, %v4421_v39  ;;  %v4476_v0 = vpack.c.bf16 %v4469_v26, %v4469_v26  ;;  %7510 = vmatpush.bf16.msrb.mxu0 %v11299_v63  ;;  %7529 = vmatpush.bf16.msrb.mxu1 %v11307_v6  ;;  %v11332_v39 = vld [vmem:[#allocation3 + $0x1e8] sm:$0xff]  ;;  %v11212_v63 = vld [vmem:[#allocation8 + $0x188] sm:$0xff] }
 0x3e7   :  { %7473 = vmatpush.bf16.msra.mxu2 %v11282_v13  ;;  %7492 = vmatpush.bf16.msra.mxu3 %v11290_v29  ;;  %v11214_v6 = vld [vmem:[#allocation8 + $0x198] sm:$0xff]  ;;  %v11257_v13 = vld [vmem:[#allocation2 + $0x140] sm:$0xf0]  ;;  %v11216_v29 = vld [vmem:[#allocation8 + $0x1a8] sm:$0xff] }
 0x3e8   :  { %4432 = vst [vmem:[#allocation2 + $0xf0] sm:$0xf] %v4428_v12  ;;  %9718 = vmatmul.msk.bf16.gmra.mxu0 %vm98_vm0, %v11208_v31  ;;  %9728 = vmatmul.msk.bf16.gmra.mxu1 %vm98_vm0, %v11210_v37  ;;  %v4325_v4 = vpop.f32.mrf.mxu2  ;;  %v4373_v49 = vpop.f32.mrf.mxu3  ;;  %v11316_v31 = vld [vmem:[#allocation3 + $0x168] sm:$0xff] }
 0x3e9   :  { %4480 = vst [vmem:[#allocation2 + $0xf4] sm:$0xf] %v4476_v0  ;;  %v4332_v33 = vpack.c.bf16 %v4325_v4, %v4325_v4  ;;  %v4380_v40 = vpack.c.bf16 %v4373_v49, %v4373_v49  ;;  %v11324_v37 = vld [vmem:[#allocation3 + $0x1a8] sm:$0xff] }
 0x3ea   :  { %7511 = vmatpush.bf16.msrb.mxu0 %v11298_v9  ;;  %7530 = vmatpush.bf16.msrb.mxu1 %v11306_v7  ;;  %v9869_v9 = vld [vmem:[#allocation2 + $0xd8] sm:$0xf]  ;;  %v11315_v7 = vld [vmem:[#allocation3 + $0x160] sm:$0xff] }
 0x3eb   :  { %4336 = vst [vmem:[#allocation2 + $0xe8] sm:$0xf] %v4332_v33  ;;  %7474 = vmatpush.bf16.msra.mxu2 %v11281_v44  ;;  %7493 = vmatpush.bf16.msra.mxu3 %v11289_v14  ;;  %v11323_v33 = vld [vmem:[#allocation3 + $0x1a0] sm:$0xff] }
 0x3ec   :  { %4384 = vst [vmem:[#allocation2 + $0xec] sm:$0xf] %v4380_v40  ;;  %v11331_v44 = vld [vmem:[#allocation3 + $0x1e0] sm:$0xff] }
 0x3ed   :  { %v4423_v11 = vpop.f32.mrf.mxu0  ;;  %v4471_v38 = vpop.f32.mrf.mxu1  ;;  %v11339_v14 = vld [vmem:[#allocation3 + $0x220] sm:$0xff] }
 0x3ee   :  { %v4429_v45 = vpack.c.bf16 %v4423_v11, %v4423_v11  ;;  %v4477_v53 = vpack.c.bf16 %v4471_v38, %v4471_v38  ;;  %7512 = vmatpush.bf16.msrb.mxu0 %v11297_v28  ;;  %7531 = vmatpush.bf16.msrb.mxu1 %v11305_v54  ;;  %v9870_v38 = vor.u32 %v11257_v13, %v9869_v9  ;;  %v11365_v9 = vld [vmem:[#allocation3 + $0x2f0] sm:$0xff] }
 0x3ef   :  { %7475 = vmatpush.bf16.msra.mxu2 %v11280_v15  ;;  %7494 = vmatpush.bf16.msra.mxu3 %v11288_v56  ;;  %v11330_v15 = vld [vmem:[#allocation3 + $0x1d8] sm:$0xff] }
 0x3f0   :  { %4433 = vst [vmem:[#allocation2 + $0x15c] sm:$0xf] %v4429_v45  ;;  %v4327_v57 = vpop.f32.mrf.mxu2  ;;  %v4375_v20 = vpop.f32.mrf.mxu3  ;;  %v11314_v45 = vld [vmem:[#allocation3 + $0x158] sm:$0xff] }
 0x3f1   :  { %4481 = vst [vmem:[#allocation2 + $0x160] sm:$0xf] %v4477_v53  ;;  %v4333_v58 = vpack.c.bf16 %v4327_v57, %v4327_v57  ;;  %v4381_v62 = vpack.c.bf16 %v4375_v20, %v4375_v20  ;;  %v11322_v53 = vld [vmem:[#allocation3 + $0x198] sm:$0xff] }
 0x3f2   :  { %7513 = vmatpush.bf16.msrb.mxu0 %v11296_v1  ;;  %7532 = vmatpush.bf16.msrb.mxu1 %v11304_v2  ;;  %v11338_v56 = vld [vmem:[#allocation3 + $0x218] sm:$0xff] }
 0x3f3   :  { %4337 = vst [vmem:[#allocation2 + $0x154] sm:$0xf] %v4333_v58  ;;  %7476 = vmatpush.bf16.msra.mxu2 %v11279_v35  ;;  %7495 = vmatpush.bf16.msra.mxu3 %v11287_v51  ;;  %v11313_v58 = vld [vmem:[#allocation3 + $0x150] sm:$0xff]  ;;  %v9771_v35 = vld [vmem:[#allocation2 + $0x74] sm:$0xf0] }
 0x3f4   :  { %4385 = vst [vmem:[#allocation2 + $0x158] sm:$0xf] %v4381_v62  ;;  %v11321_v62 = vld [vmem:[#allocation3 + $0x190] sm:$0xff]  ;;  %v11312_v51 = vld [vmem:[#allocation3 + $0x148] sm:$0xff] }
 0x3f5   :  { %v4608_v17 = vpop.f32.mrf.mxu0  ;;  %v4656_v48 = vpop.f32.mrf.mxu1  ;;  %9737 = vmatmul.msk.bf16.vlgmr.msrb.gmra.mxu2 %vm98_vm0, %v11211_v21  ;;  %9747 = vmatmul.msk.bf16.vlgmr.msrb.gmra.mxu3 %vm98_vm0, %v11213_v46 }
 0x3f6   :  { %v4618_v52 = vpack.c.bf16 %v4608_v17, %v4608_v17  ;;  %v4666_v5 = vpack.c.bf16 %v4656_v48, %v4656_v48  ;;  %7514 = vmatpush.bf16.msrb.mxu0 %v11295_v8  ;;  %7533 = vmatpush.bf16.msrb.mxu1 %v11303_v23  ;;  %v9769_v17 = vld [vmem:[#allocation2 + $0x8] sm:$0xf]  ;;  %v11231_v48 = vld [vmem:[#allocation2 + $0x70] sm:$0xf0]  ;;  %v9763_v8 = vld [vmem:[#allocation2 + $0x6c] sm:$0xf0] }
 0x3f7   :  { %7545 = vmatpush.bf16.msrb.mxu2 %v11318_v42  ;;  %7564 = vmatpush.bf16.msrb.mxu3 %v11326_v55  ;;  %v11328_v23 = vld [vmem:[#allocation3 + $0x1c8] sm:$0xff] }
 0x3f8   :  { %4622 = vst [vmem:[#allocation2 + $0x28] sm:$0xf] %v4618_v52  ;;  %9757 = vmatmul.msk.bf16.vlgmr.msra.gmra.mxu0 %vm98_vm0, %v11215_v50  ;;  %7458 = vmatmul.bf16.vlgmr.msra.gmra.mxu1 %v9762_v36  ;;  %v4512_v24 = vpop.f32.mrf.mxu2  ;;  %v4560_v27 = vpop.f32.mrf.mxu3  ;;  %v11337_v50 = vld [vmem:[#allocation3 + $0x210] sm:$0xff]  ;;  %v11320_v52 = vld [vmem:[#allocation3 + $0x188] sm:$0xff] }
 0x3f9   :  { %4670 = vst [vmem:[#allocation2 + $0x2c] sm:$0xf] %v4666_v5  ;;  %v4522_v10 = vpack.c.bf16 %v4512_v24, %v4512_v24  ;;  %v4570_v34 = vpack.c.bf16 %v4560_v27, %v4560_v27  ;;  %v11336_v42 = vld [vmem:[#allocation3 + $0x208] sm:$0xff]  ;;  %v11217_v27 = vld [vmem:[#allocation2 + $0x4] sm:$0xf] }
 0x3fa   :  { %7583 = vmatpush.bf16.msra.mxu0 %v11334_v16  ;;  %7602 = vmatpush.bf16.msra.mxu1 %v11342_v43  ;;  %v11232_v24 = vld [vmem:[#allocation2 + $0x78] sm:$0xf0] }
 0x3fb   :  { %4526 = vst [vmem:[#allocation2 + $0x20] sm:$0xf] %v4522_v10  ;;  %7546 = vmatpush.bf16.msrb.mxu2 %v11317_v60  ;;  %7565 = vmatpush.bf16.msrb.mxu3 %v11325_v19  ;;  %v9777_v60 = vld [vmem:[#allocation2 + $0x10] sm:$0xf] }
 0x3fc   :  { %4574 = vst [vmem:[#allocation2 + $0x24] sm:$0xf] %v4570_v34  ;;  %v9766_v34 = vor.u32 %v11217_v27, %v9763_v8  ;;  %v11311_v19 = vld [vmem:[#allocation3 + $0x140] sm:$0xff]  ;;  %v11346_v8 = vld [vmem:[#allocation3 + $0x258] sm:$0xff] }
 0x3fd   :  { %v4610_v41 = vpop.f32.mrf.mxu0  ;;  %v4658_v59 = vpop.f32.mrf.mxu1 }
 0x3fe   :  { %v4619_v3 = vpack.c.bf16 %v4610_v41, %v4610_v41  ;;  %v4667_v25 = vpack.c.bf16 %v4658_v59, %v4658_v59  ;;  %7584 = vmatpush.bf16.msra.mxu0 %v11333_v61  ;;  %7603 = vmatpush.bf16.msra.mxu1 %v11341_v32  ;;  %v9770_v41 = vor.u32 %v11231_v48, %v9769_v17  ;;  %v11319_v61 = vld [vmem:[#allocation3 + $0x180] sm:$0xff] }
 0x3ff   :  { %7547 = vmatpush.bf16.msrb.mxu2 %v11316_v31  ;;  %7566 = vmatpush.bf16.msrb.mxu3 %v11324_v37  ;;  %v9774_v59 = vor.u32 %v11218_v18, %v9771_v35  ;;  %v9778_v32 = vor.u32 %v11232_v24, %v9777_v60  ;;  %v11327_v31 = vld [vmem:[#allocation3 + $0x1c0] sm:$0xff]  ;;  %v11370_v24 = vld [vmem:[#allocation3 + $0x318] sm:$0xff] }
 0x400   :  { %4623 = vst [vmem:[#allocation2 + $0x94] sm:$0xf] %v4619_v3  ;;  %v4514_v26 = vpop.f32.mrf.mxu2  ;;  %v4562_v30 = vpop.f32.mrf.mxu3  ;;  %v11335_v37 = vld [vmem:[#allocation3 + $0x200] sm:$0xff] }
 0x401   :  { %4671 = vst [vmem:[#allocation2 + $0x98] sm:$0xf] %v4667_v25  ;;  %v4523_v12 = vpack.c.bf16 %v4514_v26, %v4514_v26  ;;  %v4571_v0 = vpack.c.bf16 %v4562_v30, %v4562_v30  ;;  %v11358_v26 = vld [vmem:[#allocation3 + $0x2b8] sm:$0xff]  ;;  %v11347_v17 = vld [vmem:[#allocation3 + $0x260] sm:$0xff] }
 0x402   :  { %7585 = vmatpush.bf16.msra.mxu0 %v11332_v39  ;;  %7604 = vmatpush.bf16.msra.mxu1 %v11340_v22  ;;  %v11350_v39 = vld [vmem:[#allocation3 + $0x278] sm:$0xff]  ;;  %v11355_v48 = vld [vmem:[#allocation3 + $0x2a0] sm:$0xff] }
 0x403   :  { %4527 = vst [vmem:[#allocation2 + $0x8c] sm:$0xf] %v4523_v12  ;;  %7548 = vmatpush.bf16.msrb.mxu2 %v11315_v7  ;;  %7567 = vmatpush.bf16.msrb.mxu3 %v11323_v33  ;;  %v11366_v30 = vld [vmem:[#allocation3 + $0x2f8] sm:$0xff] }
 0x404   :  { %4575 = vst [vmem:[#allocation2 + $0x90] sm:$0xf] %v4571_v0  ;;  %v11374_v0 = vld [vmem:[#allocation3 + $0x338] sm:$0xff] }
 0x405   :  { %v4613_v4 = vpop.f32.mrf.mxu0  ;;  %v4661_v49 = vpop.f32.mrf.mxu1  ;;  %9738 = vmatmul.msk.bf16.gmra.mxu2 %vm98_vm0, %v11212_v63  ;;  %9748 = vmatmul.msk.bf16.gmra.mxu3 %vm98_vm0, %v11214_v6 }
 0x406   :  { %v4620_v40 = vpack.c.bf16 %v4613_v4, %v4613_v4  ;;  %v4668_v11 = vpack.c.bf16 %v4661_v49, %v4661_v49  ;;  %7586 = vmatpush.bf16.msra.mxu0 %v11331_v44  ;;  %7605 = vmatpush.bf16.msra.mxu1 %v11339_v14  ;;  %v11349_v4 = vld [vmem:[#allocation3 + $0x270] sm:$0xff]  ;;  %v11356_v44 = vld [vmem:[#allocation3 + $0x2a8] sm:$0xff] }
 0x407   :  { %7549 = vmatpush.bf16.msrb.mxu2 %v11314_v45  ;;  %7568 = vmatpush.bf16.msrb.mxu3 %v11322_v53  ;;  %v11357_v49 = vld [vmem:[#allocation3 + $0x2b0] sm:$0xff]  ;;  %v11364_v14 = vld [vmem:[#allocation3 + $0x2e8] sm:$0xff] }
 0x408   :  { %4624 = vst [vmem:[#allocation2 + $0x100] sm:$0xf] %v4620_v40  ;;  %9758 = vmatmul.msk.bf16.gmra.mxu0 %vm98_vm0, %v11216_v29  ;;  %7463 = vmatmul.bf16.gmra.mxu1 %v9870_v38  ;;  %v4517_v28 = vpop.f32.mrf.mxu2  ;;  %v4565_v54 = vpop.f32.mrf.mxu3  ;;  %v11373_v40 = vld [vmem:[#allocation3 + $0x330] sm:$0xff]  ;;  %v11348_v38 = vld [vmem:[#allocation3 + $0x268] sm:$0xff] }
 0x409   :  { %4672 = vst [vmem:[#allocation2 + $0x104] sm:$0xf] %v4668_v11  ;;  %v4524_v57 = vpack.c.bf16 %v4517_v28, %v4517_v28  ;;  %v4572_v20 = vpack.c.bf16 %v4565_v54, %v4565_v54  ;;  %v9877_v11 = vld [vmem:[#allocation2 + $0xe0] sm:$0xf]  ;;  %v9871_v28 = vld [vmem:[#allocation2 + $0x144] sm:$0xf0] }
 0x40a   :  { %7587 = vmatpush.bf16.msra.mxu0 %v11330_v15  ;;  %7606 = vmatpush.bf16.msra.mxu1 %v11338_v56  ;;  %v11258_v54 = vld [vmem:[#allocation2 + $0x148] sm:$0xf0]  ;;  %v11372_v15 = vld [vmem:[#allocation3 + $0x328] sm:$0xff] }
 0x40b   :  { %4528 = vst [vmem:[#allocation2 + $0xf8] sm:$0xf] %v4524_v57  ;;  %7550 = vmatpush.bf16.msrb.mxu2 %v11313_v58  ;;  %7569 = vmatpush.bf16.msrb.mxu3 %v11321_v62  ;;  %v11244_v58 = vld [vmem:[#allocation2 + $0xdc] sm:$0xf] }
 0x40c   :  { %4576 = vst [vmem:[#allocation2 + $0xfc] sm:$0xf] %v4572_v20  ;;  %v11245_v20 = vld [vmem:[#allocation2 + $0xe4] sm:$0xf] }
 0x40d   :  { %v4615_v1 = vpop.f32.mrf.mxu0  ;;  %v4663_v2 = vpop.f32.mrf.mxu1 }
 0x40e   :  { %v4621_v21 = vpack.c.bf16 %v4615_v1, %v4615_v1  ;;  %v4669_v46 = vpack.c.bf16 %v4663_v2, %v4663_v2  ;;  %7588 = vmatpush.bf16.msra.mxu0 %v11329_v47  ;;  %7607 = vmatpush.bf16.msra.mxu1 %v11337_v50  ;;  %v9879_v1 = vld [vmem:[#allocation2 + $0x14c] sm:$0xf0]  ;;  %v11259_v2 = vld [vmem:[#allocation2 + $0x150] sm:$0xf0]  ;;  %v9878_v47 = vor.u32 %v11258_v54, %v9877_v11  ;;  %v9885_v50 = vld [vmem:[#allocation2 + $0xe8] sm:$0xf] }
 0x40f   :  { %7551 = vmatpush.bf16.msrb.mxu2 %v11312_v51  ;;  %7570 = vmatpush.bf16.msrb.mxu3 %v11320_v52  ;;  %v9882_v51 = vor.u32 %v11245_v20, %v9879_v1  ;;  %v9886_v52 = vor.u32 %v11259_v2, %v9885_v50  ;;  %v9793_v11 = vld [vmem:[#allocation2 + $0x20] sm:$0xf]  ;;  %v11367_v54 = vld [vmem:[#allocation3 + $0x300] sm:$0xff]  ;;  %v11406_v2 = vld [vmem:[#allocation3 + $0x438] sm:$0xff] }
 0x410   :  { %4625 = vst [vmem:[#allocation2 + $0x16c] sm:$0xf] %v4621_v21  ;;  %v4519_v5 = vpop.f32.mrf.mxu2  ;;  %v4567_v36 = vpop.f32.mrf.mxu3  ;;  %v11389_v50 = vld [vmem:[#allocation3 + $0x3b0] sm:$0xff] }
 0x411   :  { %4673 = vst [vmem:[#allocation2 + $0x170] sm:$0xf] %v4669_v46  ;;  %v4525_v55 = vpack.c.bf16 %v4519_v5, %v4519_v5  ;;  %v4573_v16 = vpack.c.bf16 %v4567_v36, %v4567_v36  ;;  %v9874_v46 = vor.u32 %v11244_v58, %v9871_v28  ;;  %v11363_v5 = vld [vmem:[#allocation3 + $0x2e0] sm:$0xff] }
 0x412   :  { %7589 = vmatpush.bf16.msra.mxu0 %v11328_v23  ;;  %7608 = vmatpush.bf16.msra.mxu1 %v11336_v42  ;;  %v11371_v36 = vld [vmem:[#allocation3 + $0x320] sm:$0xff]  ;;  %v11354_v23 = vld [vmem:[#allocation3 + $0x298] sm:$0xff] }
 0x413   :  { %4529 = vst [vmem:[#allocation2 + $0x164] sm:$0xf] %v4525_v55  ;;  %7552 = vmatpush.bf16.msrb.mxu2 %v11311_v19  ;;  %7571 = vmatpush.bf16.msrb.mxu3 %v11319_v61  ;;  %v11361_v61 = vld [vmem:[#allocation3 + $0x2d0] sm:$0xff]  ;;  %v11359_v28 = vld [vmem:[#allocation3 + $0x2c0] sm:$0xff] }
 0x414   :  { %4577 = vst [vmem:[#allocation2 + $0x168] sm:$0xf] %v4573_v16  ;;  %v11362_v16 = vld [vmem:[#allocation3 + $0x2d8] sm:$0xff] }
 0x415   :  { %v4800_v43 = vpop.f32.mrf.mxu0  ;;  %v4848_v10 = vpop.f32.mrf.mxu1  ;;  %7477 = vmatmul.bf16.vlgmr.msra.gmra.mxu2 %v9766_v34  ;;  %7496 = vmatmul.bf16.vlgmr.msra.gmra.mxu3 %v9770_v41  ;;  %v11345_v41 = vld [vmem:[#allocation3 + $0x250] sm:$0xff] }
 0x416   :  { %v4810_v3 = vpack.c.bf16 %v4800_v43, %v4800_v43  ;;  %v4858_v25 = vpack.c.bf16 %v4848_v10, %v4848_v10  ;;  %7590 = vmatpush.bf16.msra.mxu0 %v11327_v31  ;;  %7609 = vmatpush.bf16.msra.mxu1 %v11335_v37  ;;  %v11220_v31 = vld [vmem:[#allocation2 + $0x1c] sm:$0xf]  ;;  %v9787_v37 = vld [vmem:[#allocation2 + $0x84] sm:$0xf0] }
 0x417   :  { %7621 = vmatpush.bf16.msra.mxu2 %v11350_v39  ;;  %7640 = vmatpush.bf16.msra.mxu3 %v11358_v26  ;;  %v11344_v39 = vld [vmem:[#allocation3 + $0x248] sm:$0xff] }
 0x418   :  { %4814 = vst [vmem:[#allocation2 + $0x38] sm:$0xf] %v4810_v3  ;;  %7515 = vmatmul.bf16.vlgmr.msrb.gmra.mxu0 %v9774_v59  ;;  %7534 = vmatmul.bf16.vlgmr.msrb.gmra.mxu1 %v9778_v32  ;;  %v4704_v22 = vpop.f32.mrf.mxu2  ;;  %v4752_v12 = vpop.f32.mrf.mxu3  ;;  %v11353_v59 = vld [vmem:[#allocation3 + $0x290] sm:$0xff]  ;;  %v11352_v26 = vld [vmem:[#allocation3 + $0x288] sm:$0xff] }
 0x419   :  { %4862 = vst [vmem:[#allocation2 + $0x3c] sm:$0xf] %v4858_v25  ;;  %v4714_v63 = vpack.c.bf16 %v4704_v22, %v4704_v22  ;;  %v4762_v6 = vpack.c.bf16 %v4752_v12, %v4752_v12  ;;  %v11369_v3 = vld [vmem:[#allocation3 + $0x310] sm:$0xff]  ;;  %v9785_v25 = vld [vmem:[#allocation2 + $0x18] sm:$0xf] }
 0x41a   :  { %7659 = vmatpush.bf16.msrb.mxu0 %v11366_v30  ;;  %7678 = vmatpush.bf16.msrb.mxu1 %v11374_v0  ;;  %v11233_v32 = vld [vmem:[#allocation2 + $0x80] sm:$0xf0]  ;;  %v9779_v12 = vld [vmem:[#allocation2 + $0x7c] sm:$0xf0]  ;;  %v11360_v0 = vld [vmem:[#allocation3 + $0x2c8] sm:$0xff] }
 0x41b   :  { %4718 = vst [vmem:[#allocation2 + $0x30] sm:$0xf] %v4714_v63  ;;  %7622 = vmatpush.bf16.msra.mxu2 %v11349_v4  ;;  %7641 = vmatpush.bf16.msra.mxu3 %v11357_v49  ;;  %v11368_v63 = vld [vmem:[#allocation3 + $0x308] sm:$0xff]  ;;  %v11219_v4 = vld [vmem:[#allocation2 + $0x14] sm:$0xf] }
 0x41c   :  { %4766 = vst [vmem:[#allocation2 + $0x34] sm:$0xf] %v4762_v6 }
 0x41d   :  { %v4802_v13 = vpop.f32.mrf.mxu0  ;;  %v4850_v29 = vpop.f32.mrf.mxu1 }
 0x41e   :  { %v4811_v7 = vpack.c.bf16 %v4802_v13, %v4802_v13  ;;  %v4859_v33 = vpack.c.bf16 %v4850_v29, %v4850_v29  ;;  %7660 = vmatpush.bf16.msrb.mxu0 %v11365_v9  ;;  %7679 = vmatpush.bf16.msrb.mxu1 %v11373_v40  ;;  %v11234_v29 = vld [vmem:[#allocation2 + $0x88] sm:$0xf0]  ;;  %v9790_v40 = vor.u32 %v11220_v31, %v9787_v37 }
 0x41f   :  { %7623 = vmatpush.bf16.msra.mxu2 %v11348_v38  ;;  %7642 = vmatpush.bf16.msra.mxu3 %v11356_v44  ;;  %v11343_v38 = vld [vmem:[#allocation3 + $0x240] sm:$0xff] }
 0x420   :  { %4815 = vst [vmem:[#allocation2 + $0xa4] sm:$0xf] %v4811_v7  ;;  %v4706_v45 = vpop.f32.mrf.mxu2  ;;  %v4754_v53 = vpop.f32.mrf.mxu3  ;;  %v9782_v7 = vor.u32 %v11219_v4, %v9779_v12  ;;  %v11351_v44 = vld [vmem:[#allocation3 + $0x280] sm:$0xff]  ;;  %v11378_v12 = vld [vmem:[#allocation3 + $0x358] sm:$0xff] }
 0x421   :  { %4863 = vst [vmem:[#allocation2 + $0xa8] sm:$0xf] %v4859_v33  ;;  %v4715_v56 = vpack.c.bf16 %v4706_v45, %v4706_v45  ;;  %v4763_v57 = vpack.c.bf16 %v4754_v53, %v4754_v53  ;;  %v9786_v33 = vor.u32 %v11233_v32, %v9785_v25  ;;  %v9794_v53 = vor.u32 %v11234_v29, %v9793_v11  ;;  %v11379_v25 = vld [vmem:[#allocation3 + $0x360] sm:$0xff]  ;;  %v11402_v29 = vld [vmem:[#allocation3 + $0x418] sm:$0xff] }
 0x422   :  { %7661 = vmatpush.bf16.msrb.mxu0 %v11364_v14  ;;  %7680 = vmatpush.bf16.msrb.mxu1 %v11372_v15  ;;  %v11382_v15 = vld [vmem:[#allocation3 + $0x378] sm:$0xff]  ;;  %v11387_v32 = vld [vmem:[#allocation3 + $0x3a0] sm:$0xff] }
 0x423   :  { %4719 = vst [vmem:[#allocation2 + $0x9c] sm:$0xf] %v4715_v56  ;;  %7624 = vmatpush.bf16.msra.mxu2 %v11347_v17  ;;  %7643 = vmatpush.bf16.msra.mxu3 %v11355_v48  ;;  %v11390_v56 = vld [vmem:[#allocation3 + $0x3b8] sm:$0xff]  ;;  %v11397_v17 = vld [vmem:[#allocation3 + $0x3f0] sm:$0xff] }
 0x424   :  { %4767 = vst [vmem:[#allocation2 + $0xa0] sm:$0xf] %v4763_v57  ;;  %v11398_v57 = vld [vmem:[#allocation3 + $0x3f8] sm:$0xff] }
 0x425   :  { %v4805_v62 = vpop.f32.mrf.mxu0  ;;  %v4853_v21 = vpop.f32.mrf.mxu1  ;;  %7482 = vmatmul.bf16.gmra.mxu2 %v9874_v46  ;;  %7501 = vmatmul.bf16.gmra.mxu3 %v9878_v47  ;;  %v11381_v47 = vld [vmem:[#allocation3 + $0x370] sm:$0xff] }
 0x426   :  { %v4812_v18 = vpack.c.bf16 %v4805_v62, %v4805_v62  ;;  %v4860_v35 = vpack.c.bf16 %v4853_v21, %v4853_v21  ;;  %7662 = vmatpush.bf16.msrb.mxu0 %v11363_v5  ;;  %7681 = vmatpush.bf16.msrb.mxu1 %v11371_v36  ;;  %v11388_v5 = vld [vmem:[#allocation3 + $0x3a8] sm:$0xff] }
 0x427   :  { %7625 = vmatpush.bf16.msra.mxu2 %v11346_v8  ;;  %7644 = vmatpush.bf16.msra.mxu3 %v11354_v23  ;;  %v11396_v36 = vld [vmem:[#allocation3 + $0x3e8] sm:$0xff] }
 0x428   :  { %4816 = vst [vmem:[#allocation2 + $0x110] sm:$0xf] %v4812_v18  ;;  %7520 = vmatmul.bf16.gmra.mxu0 %v9882_v51  ;;  %7539 = vmatmul.bf16.gmra.mxu1 %v9886_v52  ;;  %v4709_v42 = vpop.f32.mrf.mxu2  ;;  %v4757_v55 = vpop.f32.mrf.mxu3  ;;  %v9893_v51 = vld [vmem:[#allocation2 + $0xf0] sm:$0xf]  ;;  %v11380_v52 = vld [vmem:[#allocation3 + $0x368] sm:$0xff] }
 0x429   :  { %4864 = vst [vmem:[#allocation2 + $0x114] sm:$0xf] %v4860_v35  ;;  %v4716_v27 = vpack.c.bf16 %v4709_v42, %v4709_v42  ;;  %v4764_v43 = vpack.c.bf16 %v4757_v55, %v4757_v55  ;;  %v11405_v35 = vld [vmem:[#allocation3 + $0x430] sm:$0xff]  ;;  %v9887_v42 = vld [vmem:[#allocation2 + $0x154] sm:$0xf0] }
 0x42a   :  { %7663 = vmatpush.bf16.msrb.mxu0 %v11362_v16  ;;  %7682 = vmatpush.bf16.msrb.mxu1 %v11370_v24  ;;  %v11260_v55 = vld [vmem:[#allocation2 + $0x158] sm:$0xf0] }
 0x42b   :  { %4720 = vst [vmem:[#allocation2 + $0x108] sm:$0xf] %v4716_v27  ;;  %7626 = vmatpush.bf16.msra.mxu2 %v11345_v41  ;;  %7645 = vmatpush.bf16.msra.mxu3 %v11353_v59  ;;  %v11404_v16 = vld [vmem:[#allocation3 + $0x428] sm:$0xff]  ;;  %v11246_v41 = vld [vmem:[#allocation2 + $0xec] sm:$0xf] }
 0x42c   :  { %4768 = vst [vmem:[#allocation2 + $0x10c] sm:$0xf] %v4764_v43  ;;  %v11247_v43 = vld [vmem:[#allocation2 + $0xf4] sm:$0xf] }
 0x42d   :  { %v4807_v10 = vpop.f32.mrf.mxu0  ;;  %v4855_v34 = vpop.f32.mrf.mxu1 }
 0x42e   :  { %v4813_v60 = vpack.c.bf16 %v4807_v10, %v4807_v10  ;;  %v4861_v19 = vpack.c.bf16 %v4855_v34, %v4855_v34  ;;  %7664 = vmatpush.bf16.msrb.mxu0 %v11361_v61  ;;  %7683 = vmatpush.bf16.msrb.mxu1 %v11369_v3  ;;  %v9895_v10 = vld [vmem:[#allocation2 + $0x15c] sm:$0xf0]  ;;  %v11261_v34 = vld [vmem:[#allocation2 + $0x160] sm:$0xf0]  ;;  %v9894_v61 = vor.u32 %v11260_v55, %v9893_v51  ;;  %v9901_v3 = vld [vmem:[#allocation2 + $0xf8] sm:$0xf] }
 0x42f   :  { %7627 = vmatpush.bf16.msra.mxu2 %v11344_v39  ;;  %7646 = vmatpush.bf16.msra.mxu3 %v11352_v26  ;;  %v9898_v39 = vor.u32 %v11247_v43, %v9895_v10  ;;  %v9902_v26 = vor.u32 %v11261_v34, %v9901_v3  ;;  %v9809_v51 = vld [vmem:[#allocation2 + $0x30] sm:$0xf]  ;;  %v11438_v43 = vld [vmem:[#allocation3 + $0x538] sm:$0xff]  ;;  %v11421_v3 = vld [vmem:[#allocation3 + $0x4b0] sm:$0xff] }
 0x430   :  { %4817 = vst [vmem:[#allocation2 + $0x17c] sm:$0xf] %v4813_v60  ;;  %v4711_v30 = vpop.f32.mrf.mxu2  ;;  %v4759_v22 = vpop.f32.mrf.mxu3  ;;  %v11399_v55 = vld [vmem:[#allocation3 + $0x400] sm:$0xff] }
 0x431   :  { %4865 = vst [vmem:[#allocation2 + $0x180] sm:$0xf] %v4861_v19  ;;  %v4717_v6 = vpack.c.bf16 %v4711_v30, %v4711_v30  ;;  %v4765_v13 = vpack.c.bf16 %v4759_v22, %v4759_v22  ;;  %v9890_v19 = vor.u32 %v11246_v41, %v9887_v42  ;;  %v11395_v30 = vld [vmem:[#allocation3 + $0x3e0] sm:$0xff] }
 0x432   :  { %7665 = vmatpush.bf16.msrb.mxu0 %v11360_v0  ;;  %7684 = vmatpush.bf16.msrb.mxu1 %v11368_v63  ;;  %v11403_v22 = vld [vmem:[#allocation3 + $0x420] sm:$0xff]  ;;  %v11386_v0 = vld [vmem:[#allocation3 + $0x398] sm:$0xff] }
 0x433   :  { %4721 = vst [vmem:[#allocation2 + $0x174] sm:$0xf] %v4717_v6  ;;  %7628 = vmatpush.bf16.msra.mxu2 %v11343_v38  ;;  %7647 = vmatpush.bf16.msra.mxu3 %v11351_v44  ;;  %v11393_v44 = vld [vmem:[#allocation3 + $0x3d0] sm:$0xff]  ;;  %v11391_v42 = vld [vmem:[#allocation3 + $0x3c0] sm:$0xff] }
 0x434   :  { %4769 = vst [vmem:[#allocation2 + $0x178] sm:$0xf] %v4765_v13  ;;  %v11394_v13 = vld [vmem:[#allocation3 + $0x3d8] sm:$0xff] }
 0x435   :  { %v4992_v49 = vpop.f32.mrf.mxu0  ;;  %v5040_v9 = vpop.f32.mrf.mxu1  ;;  %7553 = vmatmul.bf16.vlgmr.msrb.gmra.mxu2 %v9782_v7  ;;  %7572 = vmatmul.bf16.vlgmr.msrb.gmra.mxu3 %v9786_v33  ;;  %v11377_v33 = vld [vmem:[#allocation3 + $0x350] sm:$0xff] }
 0x436   :  { %v5002_v14 = vpack.c.bf16 %v4992_v49, %v4992_v49  ;;  %v5050_v45 = vpack.c.bf16 %v5040_v9, %v5040_v9  ;;  %7666 = vmatpush.bf16.msrb.mxu0 %v11359_v28  ;;  %7685 = vmatpush.bf16.msrb.mxu1 %v11367_v54  ;;  %v11222_v28 = vld [vmem:[#allocation2 + $0x2c] sm:$0xf]  ;;  %v9803_v54 = vld [vmem:[#allocation2 + $0x94] sm:$0xf0] }
 0x437   :  { %7697 = vmatpush.bf16.msrb.mxu2 %v11382_v15  ;;  %7716 = vmatpush.bf16.msrb.mxu3 %v11390_v56  ;;  %v11376_v15 = vld [vmem:[#allocation3 + $0x348] sm:$0xff] }
 0x438   :  { %5006 = vst [vmem:[#allocation2 + $0x48] sm:$0xf] %v5002_v14  ;;  %7591 = vmatmul.bf16.vlgmr.msra.gmra.mxu0 %v9790_v40  ;;  %7610 = vmatmul.bf16.vlgmr.msra.gmra.mxu1 %v9794_v53  ;;  %v4896_v20 = vpop.f32.mrf.mxu2  ;;  %v4944_v1 = vpop.f32.mrf.mxu3  ;;  %v11385_v40 = vld [vmem:[#allocation3 + $0x390] sm:$0xff]  ;;  %v11235_v53 = vld [vmem:[#allocation2 + $0x90] sm:$0xf0]  ;;  %v11384_v56 = vld [vmem:[#allocation3 + $0x388] sm:$0xff] }
 0x439   :  { %5054 = vst [vmem:[#allocation2 + $0x4c] sm:$0xf] %v5050_v45  ;;  %v4906_v58 = vpack.c.bf16 %v4896_v20, %v4896_v20  ;;  %v4954_v62 = vpack.c.bf16 %v4944_v1, %v4944_v1  ;;  %v11401_v14 = vld [vmem:[#allocation3 + $0x410] sm:$0xff]  ;;  %v9801_v45 = vld [vmem:[#allocation2 + $0x28] sm:$0xf] }
 0x43a   :  { %7735 = vmatpush.bf16.msra.mxu0 %v11398_v57  ;;  %7754 = vmatpush.bf16.msra.mxu1 %v11406_v2  ;;  %v9795_v1 = vld [vmem:[#allocation2 + $0x8c] sm:$0xf0]  ;;  %v11392_v2 = vld [vmem:[#allocation3 + $0x3c8] sm:$0xff] }
 0x43b   :  { %4910 = vst [vmem:[#allocation2 + $0x40] sm:$0xf] %v4906_v58  ;;  %7698 = vmatpush.bf16.msrb.mxu2 %v11381_v47  ;;  %7717 = vmatpush.bf16.msrb.mxu3 %v11389_v50  ;;  %v11400_v58 = vld [vmem:[#allocation3 + $0x408] sm:$0xff]  ;;  %v11221_v47 = vld [vmem:[#allocation2 + $0x24] sm:$0xf] }
 0x43c   :  { %4958 = vst [vmem:[#allocation2 + $0x44] sm:$0xf] %v4954_v62 }
 0x43d   :  { %v4994_v21 = vpop.f32.mrf.mxu0  ;;  %v5042_v46 = vpop.f32.mrf.mxu1 }
 0x43e   :  { %v5003_v48 = vpack.c.bf16 %v4994_v21, %v4994_v21  ;;  %v5051_v18 = vpack.c.bf16 %v5042_v46, %v5042_v46  ;;  %7736 = vmatpush.bf16.msra.mxu0 %v11397_v17  ;;  %7755 = vmatpush.bf16.msra.mxu1 %v11405_v35  ;;  %v11236_v46 = vld [vmem:[#allocation2 + $0x98] sm:$0xf0]  ;;  %v9806_v35 = vor.u32 %v11222_v28, %v9803_v54 }
 0x43f   :  { %7699 = vmatpush.bf16.msrb.mxu2 %v11380_v52  ;;  %7718 = vmatpush.bf16.msrb.mxu3 %v11388_v5  ;;  %v11375_v52 = vld [vmem:[#allocation3 + $0x340] sm:$0xff] }
 0x440   :  { %5007 = vst [vmem:[#allocation2 + $0xb4] sm:$0xf] %v5003_v48  ;;  %v4898_v8 = vpop.f32.mrf.mxu2  ;;  %v4946_v23 = vpop.f32.mrf.mxu3  ;;  %v9798_v48 = vor.u32 %v11221_v47, %v9795_v1  ;;  %v11383_v5 = vld [vmem:[#allocation3 + $0x380] sm:$0xff]  ;;  %v11410_v1 = vld [vmem:[#allocation3 + $0x458] sm:$0xff] }
 0x441   :  { %5055 = vst [vmem:[#allocation2 + $0xb8] sm:$0xf] %v5051_v18  ;;  %v4907_v24 = vpack.c.bf16 %v4898_v8, %v4898_v8  ;;  %v4955_v27 = vpack.c.bf16 %v4946_v23, %v4946_v23  ;;  %v9802_v18 = vor.u32 %v11235_v53, %v9801_v45  ;;  %v9810_v23 = vor.u32 %v11236_v46, %v9809_v51  ;;  %v11411_v45 = vld [vmem:[#allocation3 + $0x460] sm:$0xff]  ;;  %v11434_v46 = vld [vmem:[#allocation3 + $0x518] sm:$0xff] }
 0x442   :  { %7737 = vmatpush.bf16.msra.mxu0 %v11396_v36  ;;  %7756 = vmatpush.bf16.msra.mxu1 %v11404_v16  ;;  %v11414_v16 = vld [vmem:[#allocation3 + $0x478] sm:$0xff]  ;;  %v11419_v53 = vld [vmem:[#allocation3 + $0x4a0] sm:$0xff] }
 0x443   :  { %4911 = vst [vmem:[#allocation2 + $0xac] sm:$0xf] %v4907_v24  ;;  %7700 = vmatpush.bf16.msrb.mxu2 %v11379_v25  ;;  %7719 = vmatpush.bf16.msrb.mxu3 %v11387_v32  ;;  %v11422_v24 = vld [vmem:[#allocation3 + $0x4b8] sm:$0xff]  ;;  %v11429_v25 = vld [vmem:[#allocation3 + $0x4f0] sm:$0xff] }
 0x444   :  { %4959 = vst [vmem:[#allocation2 + $0xb0] sm:$0xf] %v4955_v27  ;;  %v11430_v27 = vld [vmem:[#allocation3 + $0x4f8] sm:$0xff] }
 0x445   :  { %v4997_v59 = vpop.f32.mrf.mxu0  ;;  %v5045_v60 = vpop.f32.mrf.mxu1  ;;  %7558 = vmatmul.bf16.gmra.mxu2 %v9890_v19  ;;  %7577 = vmatmul.bf16.gmra.mxu3 %v9894_v61  ;;  %v11413_v61 = vld [vmem:[#allocation3 + $0x470] sm:$0xff] }
 0x446   :  { %v5004_v31 = vpack.c.bf16 %v4997_v59, %v4997_v59  ;;  %v5052_v37 = vpack.c.bf16 %v5045_v60, %v5045_v60  ;;  %7738 = vmatpush.bf16.msra.mxu0 %v11395_v30  ;;  %7757 = vmatpush.bf16.msra.mxu1 %v11403_v22  ;;  %v11428_v30 = vld [vmem:[#allocation3 + $0x4e8] sm:$0xff] }
 0x447   :  { %7701 = vmatpush.bf16.msrb.mxu2 %v11378_v12  ;;  %7720 = vmatpush.bf16.msrb.mxu3 %v11386_v0  ;;  %v11436_v22 = vld [vmem:[#allocation3 + $0x528] sm:$0xff] }
 0x448   :  { %5008 = vst [vmem:[#allocation2 + $0x120] sm:$0xf] %v5004_v31  ;;  %7596 = vmatmul.bf16.gmra.mxu0 %v9898_v39  ;;  %7615 = vmatmul.bf16.gmra.mxu1 %v9902_v26  ;;  %v4901_v63 = vpop.f32.mrf.mxu2  ;;  %v4949_v6 = vpop.f32.mrf.mxu3  ;;  %v11412_v39 = vld [vmem:[#allocation3 + $0x468] sm:$0xff] }
 0x449   :  { %5056 = vst [vmem:[#allocation2 + $0x124] sm:$0xf] %v5052_v37  ;;  %v4908_v4 = vpack.c.bf16 %v4901_v63, %v4901_v63  ;;  %v4956_v49 = vpack.c.bf16 %v4949_v6, %v4949_v6  ;;  %v11437_v37 = vld [vmem:[#allocation3 + $0x530] sm:$0xff]  ;;  %v11420_v26 = vld [vmem:[#allocation3 + $0x4a8] sm:$0xff]  ;;  %v9903_v63 = vld [vmem:[#allocation2 + $0x164] sm:$0xf0] }
 0x44a   :  { %7739 = vmatpush.bf16.msra.mxu0 %v11394_v13  ;;  %7758 = vmatpush.bf16.msra.mxu1 %v11402_v29  ;;  %v9909_v6 = vld [vmem:[#allocation2 + $0x100] sm:$0xf]  ;;  %v11262_v13 = vld [vmem:[#allocation2 + $0x168] sm:$0xf0] }
 0x44b   :  { %4912 = vst [vmem:[#allocation2 + $0x118] sm:$0xf] %v4908_v4  ;;  %7702 = vmatpush.bf16.msrb.mxu2 %v11377_v33  ;;  %7721 = vmatpush.bf16.msrb.mxu3 %v11385_v40  ;;  %v11248_v33 = vld [vmem:[#allocation2 + $0xfc] sm:$0xf] }
 0x44c   :  { %4960 = vst [vmem:[#allocation2 + $0x11c] sm:$0xf] %v4956_v49  ;;  %v11249_v49 = vld [vmem:[#allocation2 + $0x104] sm:$0xf] }
 0x44d   :  { %v4999_v9 = vpop.f32.mrf.mxu0  ;;  %v5047_v7 = vpop.f32.mrf.mxu1 }
 0x44e   :  { %v5005_v11 = vpack.c.bf16 %v4999_v9, %v4999_v9  ;;  %v5053_v38 = vpack.c.bf16 %v5047_v7, %v5047_v7  ;;  %7740 = vmatpush.bf16.msra.mxu0 %v11393_v44  ;;  %7759 = vmatpush.bf16.msra.mxu1 %v11401_v14  ;;  %v9911_v9 = vld [vmem:[#allocation2 + $0x16c] sm:$0xf0]  ;;  %v11263_v7 = vld [vmem:[#allocation2 + $0x170] sm:$0xf0]  ;;  %v9910_v44 = vor.u32 %v11262_v13, %v9909_v6  ;;  %v9917_v14 = vld [vmem:[#allocation2 + $0x108] sm:$0xf] }
 0x44f   :  { %7703 = vmatpush.bf16.msrb.mxu2 %v11376_v15  ;;  %7722 = vmatpush.bf16.msrb.mxu3 %v11384_v56  ;;  %v9914_v15 = vor.u32 %v11249_v49, %v9911_v9  ;;  %v9918_v56 = vor.u32 %v11263_v7, %v9917_v14  ;;  %v11446_v6 = vld [vmem:[#allocation3 + $0x578] sm:$0xff]  ;;  %v11461_v14 = vld [vmem:[#allocation3 + $0x5f0] sm:$0xff] }
 0x450   :  { %5009 = vst [vmem:[#allocation2 + $0x18c] sm:$0xf] %v5005_v11  ;;  %v4903_v57 = vpop.f32.mrf.mxu2  ;;  %v4951_v20 = vpop.f32.mrf.mxu3  ;;  %v11454_v13 = vld [vmem:[#allocation3 + $0x5b8] sm:$0xff] }
 0x451   :  { %5057 = vst [vmem:[#allocation2 + $0x190] sm:$0xf] %v5053_v38  ;;  %v4909_v62 = vpack.c.bf16 %v4903_v57, %v4903_v57  ;;  %v4957_v21 = vpack.c.bf16 %v4951_v20, %v4951_v20  ;;  %v9906_v38 = vor.u32 %v11248_v33, %v9903_v63  ;;  %v11427_v57 = vld [vmem:[#allocation3 + $0x4e0] sm:$0xff] }
 0x452   :  { %7741 = vmatpush.bf16.msra.mxu0 %v11392_v2  ;;  %7760 = vmatpush.bf16.msra.mxu1 %v11400_v58  ;;  %v11435_v20 = vld [vmem:[#allocation3 + $0x520] sm:$0xff]  ;;  %v11418_v2 = vld [vmem:[#allocation3 + $0x498] sm:$0xff] }
 0x453   :  { %4913 = vst [vmem:[#allocation2 + $0x184] sm:$0xf] %v4909_v62  ;;  %7704 = vmatpush.bf16.msrb.mxu2 %v11375_v52  ;;  %7723 = vmatpush.bf16.msrb.mxu3 %v11383_v5  ;;  %v11425_v5 = vld [vmem:[#allocation3 + $0x4d0] sm:$0xff]  ;;  %v11431_v63 = vld [vmem:[#allocation3 + $0x500] sm:$0xff] }
 0x454   :  { %4961 = vst [vmem:[#allocation2 + $0x188] sm:$0xf] %v4957_v21  ;;  %v11426_v21 = vld [vmem:[#allocation3 + $0x4d8] sm:$0xff] }
 0x455   :  { %v5184_v50 = vpop.f32.mrf.mxu0  ;;  %v5232_v17 = vpop.f32.mrf.mxu1  ;;  %7629 = vmatmul.bf16.vlgmr.msra.gmra.mxu2 %v9798_v48  ;;  %7648 = vmatmul.bf16.vlgmr.msra.gmra.mxu3 %v9802_v18  ;;  %v11409_v18 = vld [vmem:[#allocation3 + $0x450] sm:$0xff] }
 0x456   :  { %v5194_v36 = vpack.c.bf16 %v5184_v50, %v5184_v50  ;;  %v5242_v8 = vpack.c.bf16 %v5232_v17, %v5232_v17  ;;  %7742 = vmatpush.bf16.msra.mxu0 %v11391_v42  ;;  %7761 = vmatpush.bf16.msra.mxu1 %v11399_v55  ;;  %v11408_v42 = vld [vmem:[#allocation3 + $0x448] sm:$0xff] }
 0x457   :  { %7773 = vmatpush.bf16.msra.mxu2 %v11414_v16  ;;  %7792 = vmatpush.bf16.msra.mxu3 %v11422_v24  ;;  %v11416_v55 = vld [vmem:[#allocation3 + $0x488] sm:$0xff] }
 0x458   :  { %5198 = vst [vmem:[#allocation2 + $0x58] sm:$0xf] %v5194_v36  ;;  %7667 = vmatmul.bf16.vlgmr.msrb.gmra.mxu0 %v9806_v35  ;;  %7686 = vmatmul.bf16.vlgmr.msrb.gmra.mxu1 %v9810_v23  ;;  %v5088_v10 = vpop.f32.mrf.mxu2  ;;  %v5136_v34 = vpop.f32.mrf.mxu3  ;;  %v11417_v35 = vld [vmem:[#allocation3 + $0x490] sm:$0xff] }
 0x459   :  { %5246 = vst [vmem:[#allocation2 + $0x5c] sm:$0xf] %v5242_v8  ;;  %v5098_v41 = vpack.c.bf16 %v5088_v10, %v5088_v10  ;;  %v5146_v59 = vpack.c.bf16 %v5136_v34, %v5136_v34  ;;  %v11433_v36 = vld [vmem:[#allocation3 + $0x510] sm:$0xff]  ;;  %v9817_v8 = vld [vmem:[#allocation2 + $0x38] sm:$0xf] }
 0x45a   :  { %7811 = vmatpush.bf16.msrb.mxu0 %v11430_v27  ;;  %7830 = vmatpush.bf16.msrb.mxu1 %v11438_v43  ;;  %v11237_v23 = vld [vmem:[#allocation2 + $0xa0] sm:$0xf0]  ;;  %v9811_v27 = vld [vmem:[#allocation2 + $0x9c] sm:$0xf0]  ;;  %v11424_v43 = vld [vmem:[#allocation3 + $0x4c8] sm:$0xff] }
 0x45b   :  { %5102 = vst [vmem:[#allocation2 + $0x50] sm:$0xf] %v5098_v41  ;;  %7774 = vmatpush.bf16.msra.mxu2 %v11413_v61  ;;  %7793 = vmatpush.bf16.msra.mxu3 %v11421_v3  ;;  %v11432_v10 = vld [vmem:[#allocation3 + $0x508] sm:$0xff]  ;;  %v11223_v61 = vld [vmem:[#allocation2 + $0x34] sm:$0xf] }
 0x45c   :  { %5150 = vst [vmem:[#allocation2 + $0x54] sm:$0xf] %v5146_v59  ;;  %v11224_v59 = vld [vmem:[#allocation2 + $0x3c] sm:$0xf] }
 0x45d   :  { %v5186_v60 = vpop.f32.mrf.mxu0  ;;  %v5234_v19 = vpop.f32.mrf.mxu1 }
 0x45e   :  { %v5195_v32 = vpack.c.bf16 %v5186_v60, %v5186_v60  ;;  %v5243_v31 = vpack.c.bf16 %v5234_v19, %v5234_v19  ;;  %7812 = vmatpush.bf16.msrb.mxu0 %v11429_v25  ;;  %7831 = vmatpush.bf16.msrb.mxu1 %v11437_v37  ;;  %v9819_v60 = vld [vmem:[#allocation2 + $0xa4] sm:$0xf0]  ;;  %v11238_v19 = vld [vmem:[#allocation2 + $0xa8] sm:$0xf0]  ;;  %v9825_v37 = vld [vmem:[#allocation2 + $0x40] sm:$0xf] }
 0x45f   :  { %7775 = vmatpush.bf16.msra.mxu2 %v11412_v39  ;;  %7794 = vmatpush.bf16.msra.mxu3 %v11420_v26  ;;  %v11407_v39 = vld [vmem:[#allocation3 + $0x440] sm:$0xff] }
 0x460   :  { %5199 = vst [vmem:[#allocation2 + $0xc4] sm:$0xf] %v5195_v32  ;;  %v5090_v12 = vpop.f32.mrf.mxu2  ;;  %v5138_v0 = vpop.f32.mrf.mxu3  ;;  %v9814_v32 = vor.u32 %v11223_v61, %v9811_v27  ;;  %v11415_v26 = vld [vmem:[#allocation3 + $0x480] sm:$0xff]  ;;  %v11450_v27 = vld [vmem:[#allocation3 + $0x598] sm:$0xff] }
 0x461   :  { %5247 = vst [vmem:[#allocation2 + $0xc8] sm:$0xf] %v5243_v31  ;;  %v5099_v29 = vpack.c.bf16 %v5090_v12, %v5090_v12  ;;  %v5147_v4 = vpack.c.bf16 %v5138_v0, %v5138_v0  ;;  %v9818_v31 = vor.u32 %v11237_v23, %v9817_v8  ;;  %v9826_v12 = vor.u32 %v11238_v19, %v9825_v37  ;;  %v11423_v0 = vld [vmem:[#allocation3 + $0x4c0] sm:$0xff]  ;;  %v11457_v37 = vld [vmem:[#allocation3 + $0x5d0] sm:$0xff] }
 0x462   :  { %7813 = vmatpush.bf16.msrb.mxu0 %v11428_v30  ;;  %7832 = vmatpush.bf16.msrb.mxu1 %v11436_v22  ;;  %v9822_v22 = vor.u32 %v11224_v59, %v9819_v60 }
 0x463   :  { %5103 = vst [vmem:[#allocation2 + $0xbc] sm:$0xf] %v5099_v29  ;;  %7776 = vmatpush.bf16.msra.mxu2 %v11411_v45  ;;  %7795 = vmatpush.bf16.msra.mxu3 %v11419_v53  ;;  %v11462_v29 = vld [vmem:[#allocation3 + $0x5f8] sm:$0xff]  ;;  %v11469_v53 = vld [vmem:[#allocation3 + $0x630] sm:$0xff] }
 0x464   :  { %5151 = vst [vmem:[#allocation2 + $0xc0] sm:$0xf] %v5147_v4  ;;  %v11470_v4 = vld [vmem:[#allocation3 + $0x638] sm:$0xff] }
 0x465   :  { %v5189_v40 = vpop.f32.mrf.mxu0  ;;  %v5237_v11 = vpop.f32.mrf.mxu1  ;;  %7634 = vmatmul.bf16.gmra.mxu2 %v9906_v38  ;;  %7653 = vmatmul.bf16.gmra.mxu3 %v9910_v44  ;;  %v11445_v38 = vld [vmem:[#allocation3 + $0x570] sm:$0xff] }
 0x466   :  { %v5196_v28 = vpack.c.bf16 %v5189_v40, %v5189_v40  ;;  %v5244_v54 = vpack.c.bf16 %v5237_v11, %v5237_v11  ;;  %7814 = vmatpush.bf16.msrb.mxu0 %v11427_v57  ;;  %7833 = vmatpush.bf16.msrb.mxu1 %v11435_v20  ;;  %v11453_v44 = vld [vmem:[#allocation3 + $0x5b0] sm:$0xff] }
 0x467   :  { %7777 = vmatpush.bf16.msra.mxu2 %v11410_v1  ;;  %7796 = vmatpush.bf16.msra.mxu3 %v11418_v2  ;;  %v9919_v1 = vld [vmem:[#allocation2 + $0x174] sm:$0xf0]  ;;  %v9925_v2 = vld [vmem:[#allocation2 + $0x110] sm:$0xf] }
 0x468   :  { %5200 = vst [vmem:[#allocation2 + $0x130] sm:$0xf] %v5196_v28  ;;  %7672 = vmatmul.bf16.gmra.mxu0 %v9914_v15  ;;  %7691 = vmatmul.bf16.gmra.mxu1 %v9918_v56  ;;  %v5093_v58 = vpop.f32.mrf.mxu2  ;;  %v5141_v62 = vpop.f32.mrf.mxu3  ;;  %v11444_v28 = vld [vmem:[#allocation3 + $0x568] sm:$0xff] }
 0x469   :  { %5248 = vst [vmem:[#allocation2 + $0x134] sm:$0xf] %v5244_v54  ;;  %v5100_v47 = vpack.c.bf16 %v5093_v58, %v5093_v58  ;;  %v5148_v50 = vpack.c.bf16 %v5141_v62, %v5141_v62  ;;  %v11452_v54 = vld [vmem:[#allocation3 + $0x5a8] sm:$0xff] }
 0x46a   :  { %7815 = vmatpush.bf16.msrb.mxu0 %v11426_v21  ;;  %7834 = vmatpush.bf16.msrb.mxu1 %v11434_v46  ;;  %v11460_v15 = vld [vmem:[#allocation3 + $0x5e8] sm:$0xff]  ;;  %v11251_v46 = vld [vmem:[#allocation2 + $0x114] sm:$0xf] }
 0x46b   :  { %5104 = vst [vmem:[#allocation2 + $0x128] sm:$0xf] %v5100_v47  ;;  %7778 = vmatpush.bf16.msra.mxu2 %v11409_v18  ;;  %7797 = vmatpush.bf16.msra.mxu3 %v11417_v35  ;;  %v11468_v56 = vld [vmem:[#allocation3 + $0x628] sm:$0xff]  ;;  %v9927_v47 = vld [vmem:[#allocation2 + $0x17c] sm:$0xf0] }
 0x46c   :  { %5152 = vst [vmem:[#allocation2 + $0x12c] sm:$0xf] %v5148_v50  ;;  %v11264_v58 = vld [vmem:[#allocation2 + $0x178] sm:$0xf0]  ;;  %v11265_v50 = vld [vmem:[#allocation2 + $0x180] sm:$0xf0]  ;;  %v9930_v23 = vor.u32 %v11251_v46, %v9927_v47 }
 0x46d   :  { %v5191_v17 = vpop.f32.mrf.mxu0  ;;  %v5239_v48 = vpop.f32.mrf.mxu1 }
 0x46e   :  { %v5197_v51 = vpack.c.bf16 %v5191_v17, %v5191_v17  ;;  %v5245_v52 = vpack.c.bf16 %v5239_v48, %v5239_v48  ;;  %7816 = vmatpush.bf16.msrb.mxu0 %v11425_v5  ;;  %7835 = vmatpush.bf16.msrb.mxu1 %v11433_v36  ;;  %v11250_v17 = vld [vmem:[#allocation2 + $0x10c] sm:$0xf]  ;;  %v11443_v5 = vld [vmem:[#allocation3 + $0x560] sm:$0xff] }
 0x46f   :  { %7779 = vmatpush.bf16.msra.mxu2 %v11408_v42  ;;  %7798 = vmatpush.bf16.msra.mxu3 %v11416_v55  ;;  %v9922_v35 = vor.u32 %v11250_v17, %v9919_v1  ;;  %v11451_v36 = vld [vmem:[#allocation3 + $0x5a0] sm:$0xff]  ;;  %v11478_v1 = vld [vmem:[#allocation3 + $0x678] sm:$0xff]  ;;  %v11477_v17 = vld [vmem:[#allocation3 + $0x670] sm:$0xff] }
 0x470   :  { %5201 = vst [vmem:[#allocation2 + $0x19c] sm:$0xf] %v5197_v51  ;;  %v5095_v16 = vpop.f32.mrf.mxu2  ;;  %v5143_v24 = vpop.f32.mrf.mxu3  ;;  %v9926_v51 = vor.u32 %v11264_v58, %v9925_v2  ;;  %v11459_v55 = vld [vmem:[#allocation3 + $0x5e0] sm:$0xff]  ;;  %v11486_v2 = vld [vmem:[#allocation3 + $0x6b8] sm:$0xff] }
 0x471   :  { %5249 = vst [vmem:[#allocation2 + $0x1a0] sm:$0xf] %v5245_v52  ;;  %v5101_v34 = vpack.c.bf16 %v5095_v16, %v5095_v16  ;;  %v5149_v41 = vpack.c.bf16 %v5143_v24, %v5143_v24  ;;  %v9933_v52 = vld [vmem:[#allocation2 + $0x118] sm:$0xf]  ;;  %v11467_v16 = vld [vmem:[#allocation3 + $0x620] sm:$0xff]  ;;  %v11442_v24 = vld [vmem:[#allocation3 + $0x558] sm:$0xff] }
 0x472   :  { %7817 = vmatpush.bf16.msrb.mxu0 %v11424_v43  ;;  %7836 = vmatpush.bf16.msrb.mxu1 %v11432_v10  ;;  %v9934_v42 = vor.u32 %v11265_v50, %v9933_v52  ;;  %v11484_v52 = vld [vmem:[#allocation3 + $0x6a8] sm:$0xff] }
 0x473   :  { %5105 = vst [vmem:[#allocation2 + $0x194] sm:$0xf] %v5101_v34  ;;  %7780 = vmatpush.bf16.msra.mxu2 %v11407_v39  ;;  %7799 = vmatpush.bf16.msra.mxu3 %v11415_v26  ;;  %v11458_v34 = vld [vmem:[#allocation3 + $0x5d8] sm:$0xff]  ;;  %v11465_v39 = vld [vmem:[#allocation3 + $0x610] sm:$0xff] }
 0x474   :  { %5153 = vst [vmem:[#allocation2 + $0x198] sm:$0xf] %v5149_v41  ;;  %v11466_v41 = vld [vmem:[#allocation3 + $0x618] sm:$0xff] }
 0x475   :  { %v5376_v3 = vpop.f32.mrf.mxu0  ;;  %v12112_v25 = vpop.f32.mrf.mxu1  ;;  %7705 = vmatmul.bf16.vlgmr.msrb.gmra.mxu2 %v9814_v32  ;;  %7724 = vmatmul.bf16.vlgmr.msrb.gmra.mxu3 %v9818_v31  ;;  %v11449_v32 = vld [vmem:[#allocation3 + $0x590] sm:$0xff]  ;;  %v9833_v26 = vld [vmem:[#allocation2 + $0x48] sm:$0xf] }
 0x476   :  { %v5386_v30 = vpack.c.bf16 %v5376_v3, %v5376_v3  ;;  %7818 = vmatpush.bf16.msrb.mxu0 %v11423_v0  ;;  %7837 = vmatpush.bf16.msrb.mxu1 %v11431_v63  ;;  %v11441_v3 = vld [vmem:[#allocation3 + $0x550] sm:$0xff] }
 0x477   :  { %7849 = vmatpush.bf16.msrb.mxu2 %v11446_v6  ;;  %7868 = vmatpush.bf16.msrb.mxu3 %v11454_v13  ;;  %v9827_v6 = vld [vmem:[#allocation2 + $0xac] sm:$0xf0]  ;;  %v11456_v13 = vld [vmem:[#allocation3 + $0x5c8] sm:$0xff] }
 0x478   :  { %5390 = vst [vmem:[#allocation2 + $0x68] sm:$0xf] %v5386_v30  ;;  %7743 = vmatmul.bf16.vlgmr.msra.gmra.mxu0 %v9822_v22  ;;  %7762 = vmatmul.bf16.vlgmr.msra.gmra.mxu1 %v9826_v12  ;;  %v5280_v49 = vpop.f32.mrf.mxu2  ;;  %v5328_v9 = vpop.f32.mrf.mxu3  ;;  %v11239_v30 = vld [vmem:[#allocation2 + $0xb0] sm:$0xf0]  ;;  %v11440_v22 = vld [vmem:[#allocation3 + $0x548] sm:$0xff] }
 0x479   :  { %v5290_v7 = vpack.c.bf16 %v5280_v49, %v5280_v49  ;;  %v5338_v33 = vpack.c.bf16 %v5328_v9, %v5328_v9  ;;  %v11448_v12 = vld [vmem:[#allocation3 + $0x588] sm:$0xff]  ;;  %v11226_v9 = vld [vmem:[#allocation2 + $0x4c] sm:$0xf] }
 0x47a   :  { %7887 = vmatpush.bf16.msra.mxu0 %v11462_v29  ;;  %7906 = vmatpush.bf16.msra.mxu1 %v11470_v4  ;;  %v11464_v29 = vld [vmem:[#allocation3 + $0x608] sm:$0xff] }
 0x47b   :  { %5294 = vst [vmem:[#allocation2 + $0x60] sm:$0xf] %v5290_v7  ;;  %7850 = vmatpush.bf16.msrb.mxu2 %v11445_v38  ;;  %7869 = vmatpush.bf16.msrb.mxu3 %v11453_v44  ;;  %v9835_v7 = vld [vmem:[#allocation2 + $0xb4] sm:$0xf0] }
 0x47c   :  { %5342 = vst [vmem:[#allocation2 + $0x64] sm:$0xf] %v5338_v33  ;;  %v11240_v33 = vld [vmem:[#allocation2 + $0xb8] sm:$0xf0] }
 0x47d   :  { %v5378_v40 = vpop.f32.mrf.mxu0  ;;  %v12114_v11 = vpop.f32.mrf.mxu1 }
 0x47e   :  { %v5387_v45 = vpack.c.bf16 %v5378_v40, %v5378_v40  ;;  %7888 = vmatpush.bf16.msra.mxu0 %v11461_v14  ;;  %7907 = vmatpush.bf16.msra.mxu1 %v11469_v53  ;;  %v11225_v40 = vld [vmem:[#allocation2 + $0x44] sm:$0xf]  ;;  %v9841_v53 = vld [vmem:[#allocation2 + $0x50] sm:$0xf] }
 0x47f   :  { %7851 = vmatpush.bf16.msrb.mxu2 %v11444_v28  ;;  %7870 = vmatpush.bf16.msrb.mxu3 %v11452_v54  ;;  %v9830_v14 = vor.u32 %v11225_v40, %v9827_v6  ;;  %v11439_v28 = vld [vmem:[#allocation3 + $0x540] sm:$0xff] }
 0x480   :  { %5391 = vst [vmem:[#allocation2 + $0xd4] sm:$0xf] %v5387_v45  ;;  %v5282_v57 = vpop.f32.mrf.mxu2  ;;  %v5330_v20 = vpop.f32.mrf.mxu3  ;;  %v9834_v45 = vor.u32 %v11239_v30, %v9833_v26  ;;  %v11447_v54 = vld [vmem:[#allocation3 + $0x580] sm:$0xff]  ;;  %v11474_v26 = vld [vmem:[#allocation3 + $0x658] sm:$0xff] }
 0x481   :  { %v5291_v62 = vpack.c.bf16 %v5282_v57, %v5282_v57  ;;  %v5339_v21 = vpack.c.bf16 %v5330_v20, %v5330_v20  ;;  %v11455_v57 = vld [vmem:[#allocation3 + $0x5c0] sm:$0xff]  ;;  %v11482_v30 = vld [vmem:[#allocation3 + $0x698] sm:$0xff] }
 0x482   :  { %7889 = vmatpush.bf16.msra.mxu0 %v11460_v15  ;;  %7908 = vmatpush.bf16.msra.mxu1 %v11468_v56  ;;  %v9838_v15 = vor.u32 %v11226_v9, %v9835_v7  ;;  %v9842_v56 = vor.u32 %v11240_v33, %v9841_v53  ;;  %v11463_v20 = vld [vmem:[#allocation3 + $0x600] sm:$0xff]  ;;  %v11472_v7 = vld [vmem:[#allocation3 + $0x648] sm:$0xff] }
 0x483   :  { %5295 = vst [vmem:[#allocation2 + $0xcc] sm:$0xf] %v5291_v62  ;;  %7852 = vmatpush.bf16.msrb.mxu2 %v11443_v5  ;;  %7871 = vmatpush.bf16.msrb.mxu3 %v11451_v36  ;;  %v11480_v33 = vld [vmem:[#allocation3 + $0x688] sm:$0xff] }
 0x484   :  { %5343 = vst [vmem:[#allocation2 + $0xd0] sm:$0xf] %v5339_v21  ;;  %v11228_v53 = vld [vmem:[#allocation2 + $0x5c] sm:$0xf] }
 0x485   :  { %v5381_v48 = vpop.f32.mrf.mxu0  ;;  %v12116_v18 = vpop.f32.mrf.mxu1  ;;  %7710 = vmatmul.bf16.gmra.mxu2 %v9922_v35  ;;  %7729 = vmatmul.bf16.gmra.mxu3 %v9926_v51  ;;  %v11476_v51 = vld [vmem:[#allocation3 + $0x668] sm:$0xff] }
 0x486   :  { %v5388_v8 = vpack.c.bf16 %v5381_v48, %v5381_v48  ;;  %7890 = vmatpush.bf16.msra.mxu0 %v11459_v55  ;;  %7909 = vmatpush.bf16.msra.mxu1 %v11467_v16  ;;  %v11485_v48 = vld [vmem:[#allocation3 + $0x6b0] sm:$0xff]  ;;  %v11266_v55 = vld [vmem:[#allocation2 + $0x188] sm:$0xf0] }
 0x487   :  { %7853 = vmatpush.bf16.msrb.mxu2 %v11442_v24  ;;  %7872 = vmatpush.bf16.msrb.mxu3 %v11450_v27  ;;  %v11253_v16 = vld [vmem:[#allocation2 + $0x124] sm:$0xf]  ;;  %v9943_v24 = vld [vmem:[#allocation2 + $0x18c] sm:$0xf0]  ;;  %v11267_v27 = vld [vmem:[#allocation2 + $0x190] sm:$0xf0] }
 0x488   :  { %5392 = vst [vmem:[#allocation2 + $0x140] sm:$0xf] %v5388_v8  ;;  %7748 = vmatmul.bf16.gmra.mxu0 %v9930_v23  ;;  %7767 = vmatmul.bf16.gmra.mxu1 %v9934_v42  ;;  %v5285_v43 = vpop.f32.mrf.mxu2  ;;  %v5333_v10 = vpop.f32.mrf.mxu3  ;;  %v9935_v23 = vld [vmem:[#allocation2 + $0x184] sm:$0xf0]  ;;  %v9941_v42 = vld [vmem:[#allocation2 + $0x120] sm:$0xf] }
 0x489   :  { %v5292_v59 = vpack.c.bf16 %v5285_v43, %v5285_v43  ;;  %v5340_v60 = vpack.c.bf16 %v5333_v10, %v5333_v10  ;;  %v11252_v43 = vld [vmem:[#allocation2 + $0x11c] sm:$0xf] }
 0x48a   :  { %7891 = vmatpush.bf16.msra.mxu0 %v11458_v34  ;;  %7910 = vmatpush.bf16.msra.mxu1 %v11466_v41 }
 0x48b   :  { %5296 = vst [vmem:[#allocation2 + $0x138] sm:$0xf] %v5292_v59  ;;  %7854 = vmatpush.bf16.msrb.mxu2 %v11441_v3  ;;  %7873 = vmatpush.bf16.msrb.mxu3 %v11449_v32  ;;  %v9938_v59 = vor.u32 %v11252_v43, %v9935_v23  ;;  %v11475_v3 = vld [vmem:[#allocation3 + $0x660] sm:$0xff] }
 0x48c   :  { %5344 = vst [vmem:[#allocation2 + $0x13c] sm:$0xf] %v5340_v60  ;;  %v9942_v60 = vor.u32 %v11266_v55, %v9941_v42  ;;  %v11483_v32 = vld [vmem:[#allocation3 + $0x6a0] sm:$0xff] }
 0x48d   :  { %v5383_v19 = vpop.f32.mrf.mxu0  ;;  %v12118_v61 = vpop.f32.mrf.mxu1  ;;  %v11255_v43 = vld [vmem:[#allocation2 + $0x134] sm:$0xf] }
 0x48e   :  { %v5389_v31 = vpack.c.bf16 %v5383_v19, %v5383_v19  ;;  %7892 = vmatpush.bf16.msra.mxu0 %v11457_v37  ;;  %7911 = vmatpush.bf16.msra.mxu1 %v11465_v39  ;;  %v9949_v19 = vld [vmem:[#allocation2 + $0x128] sm:$0xf] }
 0x48f   :  { %7855 = vmatpush.bf16.msrb.mxu2 %v11440_v22  ;;  %7874 = vmatpush.bf16.msrb.mxu3 %v11448_v12  ;;  %v9950_v37 = vor.u32 %v11267_v27, %v9949_v19 }
 0x490   :  { %5393 = vst [vmem:[#allocation2 + $0x1ac] sm:$0xf] %v5389_v31  ;;  %v5287_v0 = vpop.f32.mrf.mxu2  ;;  %v5335_v63 = vpop.f32.mrf.mxu3  ;;  %v9946_v31 = vor.u32 %v11253_v16, %v9943_v24  ;;  %v9957_v16 = vld [vmem:[#allocation2 + $0x130] sm:$0xf]  ;;  %v11268_v24 = vld [vmem:[#allocation2 + $0x198] sm:$0xf0] }
 0x491   :  { %v5293_v4 = vpack.c.bf16 %v5287_v0, %v5287_v0  ;;  %v5341_v49 = vpack.c.bf16 %v5335_v63, %v5335_v63 }
 0x492   :  { %7893 = vmatpush.bf16.msra.mxu0 %v11456_v13  ;;  %7912 = vmatpush.bf16.msra.mxu1 %v11464_v29  ;;  %v11473_v29 = vld [vmem:[#allocation3 + $0x650] sm:$0xff] }
 0x493   :  { %5297 = vst [vmem:[#allocation2 + $0x1a4] sm:$0xf] %v5293_v4  ;;  %7856 = vmatpush.bf16.msrb.mxu2 %v11439_v28  ;;  %7875 = vmatpush.bf16.msrb.mxu3 %v11447_v54  ;;  %v11481_v4 = vld [vmem:[#allocation3 + $0x690] sm:$0xff]  ;;  %v9851_v28 = vld [vmem:[#allocation2 + $0xc4] sm:$0xf0] }
 0x494   :  { %5345 = vst [vmem:[#allocation2 + $0x1a8] sm:$0xf] %v5341_v49  ;;  %v11242_v54 = vld [vmem:[#allocation2 + $0xc8] sm:$0xf0] }
 0x495   :  { %v7516_v38 = vpop.f32.mrf.mxu0  ;;  %v7535_v44 = vpop.f32.mrf.mxu1  ;;  %7781 = vmatmul.bf16.vlgmr.msra.gmra.mxu2 %v9830_v14  ;;  %7800 = vmatmul.bf16.vlgmr.msra.gmra.mxu3 %v9834_v45  ;;  %v9849_v14 = vld [vmem:[#allocation2 + $0x58] sm:$0xf]  ;;  %v11241_v45 = vld [vmem:[#allocation2 + $0xc0] sm:$0xf0] }
 0x496   :  { %7894 = vmatpush.bf16.msra.mxu0 %v11455_v57  ;;  %7913 = vmatpush.bf16.msra.mxu1 %v11463_v20 }
 0x497   :  { %7925 = vmatpush.bf16.msra.mxu2 %v11478_v1  ;;  %7944 = vmatpush.bf16.msra.mxu3 %v11486_v2  ;;  %v9850_v2 = vor.u32 %v11241_v45, %v9849_v14 }
 0x498   :  { %7819 = vmatmul.bf16.vlgmr.msrb.gmra.mxu0 %v9838_v15  ;;  %7838 = vmatmul.bf16.vlgmr.msrb.gmra.mxu1 %v9842_v56  ;;  %v7478_v58 = vpop.f32.mrf.mxu2  ;;  %v7497_v62 = vpop.f32.mrf.mxu3  ;;  %v11227_v15 = vld [vmem:[#allocation2 + $0x54] sm:$0xf] }
 0x499   :  { %v7479_v21 = vadd.f32 %v7478_v58, %v12112_v25  ;;  %v9857_v58 = vld [vmem:[#allocation2 + $0x60] sm:$0xf] }
 0x49b   :  { %v7498_v46 = vadd.f32 %v7497_v62, %v7479_v21  ;;  %7926 = vmatpush.bf16.msra.mxu2 %v11477_v17  ;;  %7945 = vmatpush.bf16.msra.mxu3 %v11485_v48  ;;  %v11471_v62 = vld [vmem:[#allocation3 + $0x640] sm:$0xff] }
 0x49c   :  { %v11479_v21 = vld [vmem:[#allocation3 + $0x680] sm:$0xff] }
 0x49d   :  { %v7518_v47 = vpop.f32.mrf.mxu0  ;;  %v7537_v50 = vpop.f32.mrf.mxu1  ;;  %v7517_v35 = vadd.f32 %v7516_v38, %v7498_v46  ;;  %v9854_v46 = vor.u32 %v11228_v53, %v9851_v28 }
 0x49f   :  { %v12121_v5 = vadd.f32 %v7535_v44, %v7517_v35  ;;  %7927 = vmatpush.bf16.msra.mxu2 %v11476_v51  ;;  %7946 = vmatpush.bf16.msra.mxu3 %v11484_v52  ;;  %v9843_v44 = vld [vmem:[#allocation2 + $0xbc] sm:$0xf0] }
 0x4a0   :  { %v7480_v36 = vpop.f32.mrf.mxu2  ;;  %v7499_v8 = vpop.f32.mrf.mxu3  ;;  %v9846_v1 = vor.u32 %v11227_v15, %v9843_v44 }
 0x4a1   :  { %v7481_v25 = vadd.f32 %v7480_v36, %v12114_v11 }
 0x4a3   :  { %v7500_v10 = vadd.f32 %v7499_v8, %v7481_v25  ;;  %7928 = vmatpush.bf16.msra.mxu2 %v11475_v3  ;;  %7947 = vmatpush.bf16.msra.mxu3 %v11483_v32  ;;  %v9951_v25 = vld [vmem:[#allocation2 + $0x194] sm:$0xf0]  ;;  %v9958_v3 = vor.u32 %v11268_v24, %v9957_v16 }
 0x4a4   :  { %v9965_v32 = vld [vmem:[#allocation2 + $0x138] sm:$0xf] }
 0x4a5   :  { %v7521_v34 = vpop.f32.mrf.mxu0  ;;  %v7540_v41 = vpop.f32.mrf.mxu1  ;;  %v7519_v39 = vadd.f32 %v7518_v47, %v7500_v10  ;;  %7786 = vmatmul.bf16.gmra.mxu2 %v9938_v59  ;;  %7805 = vmatmul.bf16.gmra.mxu3 %v9942_v60  ;;  %v9858_v47 = vor.u32 %v11242_v54, %v9857_v58  ;;  %v9959_v10 = vld [vmem:[#allocation2 + $0x19c] sm:$0xf0] }
 0x4a7   :  { %v12124_v11 = vadd.f32 %v7537_v50, %v7519_v39  ;;  %7929 = vmatpush.bf16.msra.mxu2 %v11474_v26  ;;  %7948 = vmatpush.bf16.msra.mxu3 %v11482_v30 }
 0x4a8   :  { %7824 = vmatmul.bf16.gmra.mxu0 %v9946_v31  ;;  %7843 = vmatmul.bf16.gmra.mxu1 %v9950_v37  ;;  %v7483_v22 = vpop.f32.mrf.mxu2  ;;  %v7502_v12 = vpop.f32.mrf.mxu3  ;;  %v9962_v31 = vor.u32 %v11255_v43, %v9959_v10 }
 0x4a9   :  { %v7484_v0 = vadd.f32 %v7483_v22, %v12116_v18 }
 0x4ab   :  { %v7503_v63 = vadd.f32 %v7502_v12, %v7484_v0  ;;  %7930 = vmatpush.bf16.msra.mxu2 %v11473_v29  ;;  %7949 = vmatpush.bf16.msra.mxu3 %v11481_v4 }
 0x4ad   :  { %v7523_v6 = vpop.f32.mrf.mxu0  ;;  %v7542_v13 = vpop.f32.mrf.mxu1  ;;  %v7522_v49 = vadd.f32 %v7521_v34, %v7503_v63  ;;  %v11269_v34 = vld [vmem:[#allocation2 + $0x1a0] sm:$0xf0] }
 0x4ae   :  { %v9966_v37 = vor.u32 %v11269_v34, %v9965_v32 }
 0x4af   :  { %v12127_v9 = vadd.f32 %v7540_v41, %v7522_v49  ;;  %7931 = vmatpush.bf16.msra.mxu2 %v11472_v7  ;;  %7950 = vmatpush.bf16.msra.mxu3 %v11480_v33  ;;  %v11254_v41 = vld [vmem:[#allocation2 + $0x12c] sm:$0xf]  ;;  %v9859_v49 = vld [vmem:[#allocation2 + $0xcc] sm:$0xf0]  ;;  %v9865_v7 = vld [vmem:[#allocation2 + $0x68] sm:$0xf] }
 0x4b0   :  { %v7485_v40 = vpop.f32.mrf.mxu2  ;;  %v7504_v38 = vpop.f32.mrf.mxu3  ;;  %v11243_v33 = vld [vmem:[#allocation2 + $0xd0] sm:$0xf0] }
 0x4b1   :  { %v7486_v18 = vadd.f32 %v7485_v40, %v12118_v61 }
 0x4b3   :  { %v7505_v56 = vadd.f32 %v7504_v38, %v7486_v18  ;;  %7932 = vmatpush.bf16.msra.mxu2 %v11471_v62  ;;  %7951 = vmatpush.bf16.msra.mxu3 %v11479_v21  ;;  %v11229_v38 = vld [vmem:[#allocation2 + $0x64] sm:$0xf]  ;;  %v9866_v18 = vor.u32 %v11243_v33, %v9865_v7  ;;  %v9967_v21 = vld [vmem:[#allocation2 + $0x1a4] sm:$0xf0] }
 0x4b4   :  { %v9862_v45 = vor.u32 %v11229_v38, %v9859_v49 }
 0x4b5   :  { %v7592_v57 = vpop.f32.mrf.mxu0  ;;  %v7611_v20 = vpop.f32.mrf.mxu1  ;;  %v7524_v50 = vadd.f32 %v7523_v6, %v7505_v56  ;;  %7857 = vmatmul.bf16.vlgmr.msrb.gmra.mxu2 %v9846_v1  ;;  %7876 = vmatmul.bf16.vlgmr.msrb.gmra.mxu3 %v9850_v2 }
 0x4b7   :  { %v7543_v61 = vadd.f32 %v7542_v13, %v7524_v50 }
 0x4b8   :  { %7895 = vmatmul.bf16.vlgmr.msra.gmra.mxu0 %v9854_v46  ;;  %7914 = vmatmul.bf16.vlgmr.msra.gmra.mxu1 %v9858_v47  ;;  %v7554_v17 = vpop.f32.mrf.mxu2  ;;  %v7573_v48 = vpop.f32.mrf.mxu3  ;;  %v9973_v46 = vld [vmem:[#allocation2 + $0x140] sm:$0xf]  ;;  %v11270_v47 = vld [vmem:[#allocation2 + $0x1a8] sm:$0xf0] }
 0x4b9   :  { %v7555_v35 = vadd.f32 %v7554_v17, %v12121_v5  ;;  %v9954_v5 = vor.u32 %v11254_v41, %v9951_v25  ;;  %v11256_v17 = vld [vmem:[#allocation2 + $0x13c] sm:$0xf] }
 0x4bb   :  { %v7574_v51 = vadd.f32 %v7573_v48, %v7555_v35  ;;  %v9970_v35 = vor.u32 %v11256_v17, %v9967_v21 }
 0x4bd   :  { %v7594_v52 = vpop.f32.mrf.mxu0  ;;  %v7613_v36 = vpop.f32.mrf.mxu1  ;;  %v7593_v8 = vadd.f32 %v7592_v57, %v7574_v51  ;;  %v9974_v51 = vor.u32 %v11270_v47, %v9973_v46 }
 0x4bf   :  { %v7612_v23 = vadd.f32 %v7611_v20, %v7593_v8 }
 0x4c0   :  { %v7556_v42 = vpop.f32.mrf.mxu2  ;;  %v7575_v55 = vpop.f32.mrf.mxu3 }
 0x4c1   :  { %v7557_v27 = vadd.f32 %v7556_v42, %v12124_v11 }
 0x4c3   :  { %v7576_v59 = vadd.f32 %v7575_v55, %v7557_v27 }
 0x4c5   :  { %v7597_v60 = vpop.f32.mrf.mxu0  ;;  %v7616_v19 = vpop.f32.mrf.mxu1  ;;  %v7595_v39 = vadd.f32 %v7594_v52, %v7576_v59  ;;  %7862 = vmatmul.bf16.gmra.mxu2 %v9954_v5  ;;  %7881 = vmatmul.bf16.gmra.mxu3 %v9958_v3 }
 0x4c7   :  { %v7614_v26 = vadd.f32 %v7613_v36, %v7595_v39 }
 0x4c8   :  { %7900 = vmatmul.bf16.gmra.mxu0 %v9962_v31  ;;  %7919 = vmatmul.bf16.gmra.mxu1 %v9966_v37  ;;  %v7559_v30 = vpop.f32.mrf.mxu2  ;;  %v7578_v11 = vpop.f32.mrf.mxu3 }
 0x4c9   :  { %v7560_v22 = vadd.f32 %v7559_v30, %v12127_v9 }
 0x4cb   :  { %v7579_v12 = vadd.f32 %v7578_v11, %v7560_v22 }
 0x4cd   :  { %v7599_v0 = vpop.f32.mrf.mxu0  ;;  %v7598_v63 = vadd.f32 %v7597_v60, %v7579_v12  ;;  %v7618_v6 = vpop.f32.mrf.mxu1 }
 0x4cf   :  { %v7617_v13 = vadd.f32 %v7616_v19, %v7598_v63 }
 0x4d0   :  { %v7561_v29 = vpop.f32.mrf.mxu2  ;;  %v7580_v4 = vpop.f32.mrf.mxu3 }
 0x4d1   :  { %v7562_v40 = vadd.f32 %v7561_v29, %v7543_v61 }
 0x4d3   :  { %v7581_v44 = vadd.f32 %v7580_v4, %v7562_v40 }
 0x4d5   :  { %v7668_v14 = vpop.f32.mrf.mxu0  ;;  %v7600_v53 = vadd.f32 %v7599_v0, %v7581_v44  ;;  %7933 = vmatmul.bf16.vlgmr.msra.gmra.mxu2 %v9862_v45  ;;  %7952 = vmatmul.bf16.vlgmr.msra.gmra.mxu3 %v9866_v18  ;;  %v7687_v9 = vpop.f32.mrf.mxu1 }
 0x4d7   :  { %v7619_v28 = vadd.f32 %v7618_v6, %v7600_v53 }
 0x4d8   :  { %v7630_v54 = vpop.f32.mrf.mxu2  ;;  %v7649_v15 = vpop.f32.mrf.mxu3 }
 0x4d9   :  { %v7631_v56 = vadd.f32 %v7630_v54, %v7612_v23 }
 0x4db   :  { %v7650_v57 = vadd.f32 %v7649_v15, %v7631_v56 }
 0x4dd   :  { %v7669_v20 = vadd.f32 %v7668_v14, %v7650_v57  ;;  %v7670_v1 = vpop.f32.mrf.mxu0  ;;  %v7689_v50 = vpop.f32.mrf.mxu1 }
 0x4df   :  { %v7688_v2 = vadd.f32 %v7687_v9, %v7669_v20 }
 0x4e0   :  { %v7632_v58 = vpop.f32.mrf.mxu2  ;;  %v7651_v62 = vpop.f32.mrf.mxu3 }
 0x4e1   :  { %v7633_v61 = vadd.f32 %v7632_v58, %v7614_v26 }
 0x4e3   :  { %v7652_v48 = vadd.f32 %v7651_v62, %v7633_v61 }
 0x4e5   :  { %v7671_v52 = vadd.f32 %v7670_v1, %v7652_v48  ;;  %7938 = vmatmul.bf16.gmra.mxu2 %v9970_v35  ;;  %7957 = vmatmul.bf16.gmra.mxu3 %v9974_v51  ;;  %v7673_v36 = vpop.f32.mrf.mxu0  ;;  %v7692_v25 = vpop.f32.mrf.mxu1 }
 0x4e7   :  { %v7690_v8 = vadd.f32 %v7689_v50, %v7671_v52 }
 0x4e8   :  { %v7635_v23 = vpop.f32.mrf.mxu2  ;;  %v7654_v42 = vpop.f32.mrf.mxu3 }
 0x4e9   :  { %v7636_v55 = vadd.f32 %v7635_v23, %v7617_v13 }
 0x4eb   :  { %v7655_v16 = vadd.f32 %v7654_v42, %v7636_v55 }
 0x4ed   :  { %v7674_v24 = vadd.f32 %v7673_v36, %v7655_v16  ;;  %v7675_v34 = vpop.f32.mrf.mxu0  ;;  %v7694_v60 = vpop.f32.mrf.mxu1 }
 0x4ef   :  { %v7693_v27 = vadd.f32 %v7692_v25, %v7674_v24 }
 0x4f0   :  { %v7637_v43 = vpop.f32.mrf.mxu2  ;;  %v7656_v10 = vpop.f32.mrf.mxu3 }
 0x4f1   :  { %v7638_v41 = vadd.f32 %v7637_v43, %v7619_v28 }
 0x4f3   :  { %v7657_v59 = vadd.f32 %v7656_v10, %v7638_v41 }
 0x4f5   :  { %v7676_v19 = vadd.f32 %v7675_v34, %v7657_v59  ;;  %v7744_v37 = vpop.f32.mrf.mxu0  ;;  %v7763_v26 = vpop.f32.mrf.mxu1 }
 0x4f7   :  { %v7695_v5 = vadd.f32 %v7694_v60, %v7676_v19 }
 0x4f8   :  { %v7706_v3 = vpop.f32.mrf.mxu2  ;;  %v7725_v32 = vpop.f32.mrf.mxu3 }
 0x4f9   :  { %v7707_v31 = vadd.f32 %v7706_v3, %v7688_v2 }
 0x4fb   :  { %v7726_v39 = vadd.f32 %v7725_v32, %v7707_v31 }
 0x4fd   :  { %v7746_v0 = vpop.f32.mrf.mxu0  ;;  %v7765_v13 = vpop.f32.mrf.mxu1  ;;  %v7745_v62 = vadd.f32 %v7744_v37, %v7726_v39 }
 0x4ff   :  { %v7764_v50 = vadd.f32 %v7763_v26, %v7745_v62 }
 0x500   :  { %v7708_v30 = vpop.f32.mrf.mxu2  ;;  %v7727_v11 = vpop.f32.mrf.mxu3 }
 0x501   :  { %v7709_v22 = vadd.f32 %v7708_v30, %v7690_v8 }
 0x503   :  { %v7728_v12 = vadd.f32 %v7727_v11, %v7709_v22 }
 0x505   :  { %v7749_v49 = vpop.f32.mrf.mxu0  ;;  %v7768_v38 = vpop.f32.mrf.mxu1  ;;  %v7747_v48 = vadd.f32 %v7746_v0, %v7728_v12 }
 0x507   :  { %v7766_v8 = vadd.f32 %v7765_v13, %v7747_v48 }
 0x508   :  { %v7711_v63 = vpop.f32.mrf.mxu2  ;;  %v7730_v6 = vpop.f32.mrf.mxu3 }
 0x509   :  { %v7712_v29 = vadd.f32 %v7711_v63, %v7693_v27 }
 0x50b   :  { %v7731_v4 = vadd.f32 %v7730_v6, %v7712_v29 }
 0x50d   :  { %v7751_v18 = vpop.f32.mrf.mxu0  ;;  %v7770_v53 = vpop.f32.mrf.mxu1  ;;  %v7750_v25 = vadd.f32 %v7749_v49, %v7731_v4 }
 0x50f   :  { %v7769_v10 = vadd.f32 %v7768_v38, %v7750_v25  ;;  %v7969_v25 = vld [vmem:[%s12210_s7 + $0x10] sm:$0xff] }
 0x510   :  { %v7713_v7 = vpop.f32.mrf.mxu2  ;;  %v7732_v33 = vpop.f32.mrf.mxu3 }
 0x511   :  { %v7714_v40 = vadd.f32 %v7713_v7, %v7695_v5 }
 0x513   :  { %v7733_v44 = vadd.f32 %v7732_v33, %v7714_v40 }
 0x515   :  { %v7820_v54 = vpop.f32.mrf.mxu0  ;;  %v7839_v15 = vpop.f32.mrf.mxu1  ;;  %v7752_v19 = vadd.f32 %v7751_v18, %v7733_v44 }
 0x517   :  { %v7771_v26 = vadd.f32 %v7770_v53, %v7752_v19 }
 0x518   :  { %v7782_v14 = vpop.f32.mrf.mxu2  ;;  %v7801_v45 = vpop.f32.mrf.mxu3 }
 0x519   :  { %v7783_v17 = vadd.f32 %v7782_v14, %v7764_v50 }
 0x51b   :  { %v7802_v52 = vadd.f32 %v7801_v45, %v7783_v17 }
 0x51d   :  { %v7822_v20 = vpop.f32.mrf.mxu0  ;;  %v7841_v58 = vpop.f32.mrf.mxu1  ;;  %v7821_v23 = vadd.f32 %v7820_v54, %v7802_v52 }
 0x51f   :  { %v7840_v43 = vadd.f32 %v7839_v15, %v7821_v23 }
 0x520   :  { %v7784_v9 = vpop.f32.mrf.mxu2  ;;  %v7803_v28 = vpop.f32.mrf.mxu3 }
 0x521   :  { %v7785_v42 = vadd.f32 %v7784_v9, %v7766_v8 }
 0x523   :  { %v7804_v27 = vadd.f32 %v7803_v28, %v7785_v42 }
 0x525   :  { %v7825_v21 = vpop.f32.mrf.mxu0  ;;  %v7844_v61 = vpop.f32.mrf.mxu1  ;;  %v7823_v59 = vadd.f32 %v7822_v20, %v7804_v27 }
 0x526   :  { %v12162_v27 = vpop.permute.xlu0 %8071 }
 0x527   :  { %v7842_v39 = vadd.f32 %v7841_v58, %v7823_v59 }
 0x528   :  { %v7787_v56 = vpop.f32.mrf.mxu2  ;;  %v7806_v57 = vpop.f32.mrf.mxu3 }
 0x529   :  { %v7788_v60 = vadd.f32 %v7787_v56, %v7769_v10  ;;  %v8062_v10 = vpop.permute.xlu1 %8061 }
 0x52b   :  { %v7807_v37 = vadd.f32 %v7806_v57, %v7788_v60 }
 0x52d   :  { %v7827_v36 = vpop.f32.mrf.mxu0  ;;  %v7846_v55 = vpop.f32.mrf.mxu1  ;;  %v7826_v22 = vadd.f32 %v7825_v21, %v7807_v37 }
 0x52f   :  { %v7845_v49 = vadd.f32 %v7844_v61, %v7826_v22 }
 0x530   :  { %v7789_v1 = vpop.f32.mrf.mxu2  ;;  %v7808_v2 = vpop.f32.mrf.mxu3 }
 0x531   :  { %v7790_v12 = vadd.f32 %v7789_v1, %v7771_v26  ;;  %v12168_v59 = vpop.permute.xlu1 %8076 }
 0x533   :  { %v7809_v4 = vadd.f32 %v7808_v2, %v7790_v12 }
 0x535   :  { %v7896_v34 = vpop.f32.mrf.mxu0  ;;  %v7915_v5 = vpop.f32.mrf.mxu1  ;;  %v7828_v14 = vadd.f32 %v7827_v36, %v7809_v4 }
 0x537   :  { %v7847_v54 = vadd.f32 %v7846_v55, %v7828_v14 }
 0x538   :  { %v7858_v46 = vpop.f32.mrf.mxu2  ;;  %v7877_v47 = vpop.f32.mrf.mxu3 }
 0x539   :  { %v7859_v41 = vadd.f32 %v7858_v46, %v7840_v43  ;;  %v12164_v43 = vpop.permute.xlu0 %8085 }
 0x53b   :  { %v7878_v3 = vadd.f32 %v7877_v47, %v7859_v41 }
 0x53d   :  { %v7897_v30 = vadd.f32 %v7896_v34, %v7878_v3  ;;  %v7898_v0 = vpop.f32.mrf.mxu0  ;;  %v7917_v33 = vpop.f32.mrf.mxu1 }
 0x53e   :  { %v12166_v34 = vpop.permute.xlu2 %8066 }
 0x53f   :  { %v7916_v6 = vadd.f32 %v7915_v5, %v7897_v30 }
 0x540   :  { %v7860_v35 = vpop.f32.mrf.mxu2  ;;  %v7879_v51 = vpop.f32.mrf.mxu3 }
 0x541   :  { %v7861_v11 = vadd.f32 %v7860_v35, %v7842_v39 }
 0x543   :  { %v7880_v63 = vadd.f32 %v7879_v51, %v7861_v11 }
 0x545   :  { %v7899_v40 = vadd.f32 %v7898_v0, %v7880_v63  ;;  %v7901_v45 = vpop.f32.mrf.mxu0  ;;  %v7920_v2 = vpop.f32.mrf.mxu1 }
 0x547   :  { %v7918_v53 = vadd.f32 %v7917_v33, %v7899_v40 }
 0x548   :  { %v7863_v16 = vpop.f32.mrf.mxu2  ;;  %v7882_v24 = vpop.f32.mrf.mxu3 }
 0x549   :  { %v7864_v38 = vadd.f32 %v7863_v16, %v7845_v49  ;;  %v7970_v16 = vld [vmem:[%s12210_s7 + $0x18] sm:$0xff] }
 0x54b   :  { %v7883_v18 = vadd.f32 %v7882_v24, %v7864_v38  ;;  %v7968_v24 = vld [vmem:[%s12210_s7 + $0x8] sm:$0xff] }
 0x54d   :  { %v7902_v56 = vadd.f32 %v7901_v45, %v7883_v18  ;;  %v7903_v61 = vpop.f32.mrf.mxu0  ;;  %v7922_v51 = vpop.f32.mrf.mxu1 }
 0x54f   :  { %v7921_v21 = vadd.f32 %v7920_v2, %v7902_v56 }
 0x550   :  { %v7865_v32 = vpop.f32.mrf.mxu2  ;;  %v7884_v31 = vpop.f32.mrf.mxu3 }
 0x551   :  { %v7866_v57 = vadd.f32 %v7865_v32, %v7847_v54 }
 0x553   :  { %v7885_v62 = vadd.f32 %v7884_v31, %v7866_v57 }
 0x555   :  { %v7904_v17 = vadd.f32 %v7903_v61, %v7885_v62 }
 0x557   :  { %v7923_v52 = vadd.f32 %v7922_v51, %v7904_v17 }
 0x558   :  { %v7934_v13 = vpop.f32.mrf.mxu2  ;;  %v7953_v29 = vpop.f32.mrf.mxu3 }
 0x559   :  { %v7935_v7 = vadd.f32 %v7934_v13, %v7916_v6 }
 0x55b   :  { %v12133_v44 = vadd.f32 %v7953_v29, %v7935_v7 }
 0x55d   :  { %7971 = vadd.xlane.f32.xlu0 %v12133_v44  ;;  %v7979_v1 = vmul.f32 %v12133_v44, %v12133_v44 }
 0x560   :  { %v7936_v9 = vpop.f32.mrf.mxu2  ;;  %v7955_v28 = vpop.f32.mrf.mxu3 }
 0x561   :  { %v7937_v15 = vadd.f32 %v7936_v9, %v7918_v53 }
 0x563   :  { %v12136_v20 = vadd.f32 %v7955_v28, %v7937_v15 }
 0x565   :  { %7973 = vadd.xlane.f32.xlu2 %v12136_v20  ;;  %7983 = vadd.xlane.f32.xlu0 %v7979_v1  ;;  %v7980_v58 = vmul.f32 %v12136_v20, %v12136_v20 }
 0x567   :  { %7985 = vadd.xlane.f32.xlu1 %v7980_v58 }
 0x568   :  { %v7939_v46 = vpop.f32.mrf.mxu2  ;;  %v7958_v47 = vpop.f32.mrf.mxu3 }
 0x569   :  { %v7940_v50 = vadd.f32 %v7939_v46, %v7921_v21 }
 0x56b   :  { %v12143_v48 = vadd.f32 %v7958_v47, %v7940_v50 }
 0x56d   :  { %v7981_v35 = vmul.f32 %v12143_v48, %v12143_v48 }
 0x56f   :  { %7987 = vadd.xlane.f32.xlu2 %v7981_v35  ;;  %7975 = vadd.xlane.f32.xlu1 %v12143_v48 }
 0x570   :  { %v7941_v36 = vpop.f32.mrf.mxu2  ;;  %v7960_v23 = vpop.f32.mrf.mxu3 }
 0x571   :  { %v7942_v8 = vadd.f32 %v7941_v36, %v7923_v52 }
 0x573   :  { %v12148_v42 = vadd.f32 %v7960_v23, %v7942_v8 }
 0x575   :  { %v7982_v55 = vmul.f32 %v12148_v42, %v12148_v42 }
 0x577   :  { %7977 = vadd.xlane.f32.xlu2 %v12148_v42  ;;  %7989 = vadd.xlane.f32.xlu0 %v7982_v55 }
 0x588   :  { %8095 = vperm.xlu1 %11498, %v7969_v25  }
 0x58b   :  { %8100 = vperm.xlu0 %11497, %v7970_v16   ;;  %v11515_v16 = vld [vmem:[%s12203_s0] sm:$0xff] }
 0x58f   :  { %8090 = vperm.xlu2 %11496, %v7968_v24  }
 0x5d0   :  { %v7972_v41 = vpop.xlane.xlu0 %7971 }
 0x5d1   :  { %v7991_v60 = vmul.f32 0.0078125, %v7972_v41 }
 0x5d3   :  { %v7999_v3 = vmul.f32 %v7991_v60, %v7991_v60  ;;  %v8007_v58 = vsub.f32 %v12133_v44, %v7991_v60 }
 0x5d8   :  { %v7974_v19 = vpop.xlane.xlu2 %7973  ;;  %v7984_v5 = vpop.xlane.xlu0 %7983 }
 0x5d9   :  { %v7992_v32 = vmul.f32 0.0078125, %v7974_v19  ;;  %v7995_v31 = vmul.f32 0.0078125, %v7984_v5 }
 0x5da   :  { %v7986_v37 = vpop.xlane.xlu1 %7985 }
 0x5db   :  { %v8000_v39 = vmul.f32 %v7992_v32, %v7992_v32  ;;  %v8003_v26 = vsub.f32 %v7995_v31, %v7999_v3  ;;  %v7996_v30 = vmul.f32 0.0078125, %v7986_v37  ;;  %v8008_v50 = vsub.f32 %v12136_v20, %v7992_v32 }
 0x5dd   :  { %v8011_v11 = vadd.f32 1e-05, %v8003_v26  ;;  %v8004_v22 = vsub.f32 %v7996_v30, %v8000_v39 }
 0x5df   :  { %11507 = vrsqrt.f32 %v8011_v11  ;;  %v8012_v12 = vadd.f32 1e-05, %v8004_v22  ;;  %vm8021_vm14 = vweird.f32 %v8011_v11 }
 0x5e1   :  { %11509 = vrsqrt.f32 %v8012_v12  ;;  %vm8031_vm1 = vweird.f32 %v8012_v12 }
 0x5e2   :  { %v7988_v0 = vpop.xlane.xlu2 %7987  ;;  %v7976_v63 = vpop.xlane.xlu1 %7975 }
 0x5e3   :  { %v12170_v6 = vmul.f32 0.0078125, %v7976_v63  ;;  %v7997_v29 = vmul.f32 0.0078125, %v7988_v0 }
 0x5e5   :  { %v11508_v13 = vpop.eup %11507  ;;  %v8001_v4 = vmul.f32 %v12170_v6, %v12170_v6 }
 0x5e6   :  { %v8016_v49 = vmul.f32 %v11508_v13, %v8011_v11  ;;  %vm8022_vm13 = vweird.f32 %v11508_v13 }
 0x5e7   :  { %v11510_v7 = vpop.eup %11509  ;;  %v8005_v33 = vsub.f32 %v7997_v29, %v8001_v4  ;;  %vm8023_vm0 = vmor %vm8021_vm14, %vm8022_vm13 }
 0x5e8   :  { %v8017_v40 = vmul.f32 %v11508_v13, %v8016_v49  ;;  %v8026_v38 = vmul.f32 %v11510_v7, %v8012_v12  ;;  %vm8032_vm15 = vweird.f32 %v11510_v7 }
 0x5e9   :  { %v8013_v14 = vadd.f32 1e-05, %v8005_v33  ;;  %vm8033_vm2 = vmor %vm8031_vm1, %vm8032_vm15 }
 0x5ea   :  { %v8018_v45 = vmul.f32 0.5, %v8017_v40  ;;  %v8027_v18 = vmul.f32 %v11510_v7, %v8026_v38  ;;  %v7978_v53 = vpop.xlane.xlu2 %7977  ;;  %v7990_v9 = vpop.xlane.xlu0 %7989 }
 0x5eb   :  { %11511 = vrsqrt.f32 %v8013_v14  ;;  %v12174_v28 = vmul.f32 0.0078125, %v7978_v53  ;;  %v7998_v57 = vmul.f32 0.0078125, %v7990_v9  ;;  %vm8041_vm4 = vweird.f32 %v8013_v14 }
 0x5ec   :  { %v8019_v54 = vsub.f32 1.5, %v8018_v45  ;;  %v8028_v15 = vmul.f32 0.5, %v8027_v18 }
 0x5ed   :  { %v8002_v56 = vmul.f32 %v12174_v28, %v12174_v28  ;;  %v8010_v63 = vsub.f32 %v12148_v42, %v12174_v28  ;;  %v11518_v42 = vld [vmem:[%s12203_s0 + $0x18] sm:$0xff] }
 0x5ee   :  { %v8020_v1 = vmul.f32 %v11508_v13, %v8019_v54  ;;  %v8029_v2 = vsub.f32 1.5, %v8028_v15 }
 0x5ef   :  { %v8006_v62 = vsub.f32 %v7998_v57, %v8002_v56 }
 0x5f0   :  { %v8024_v21 = vsel %vm8023_vm0, %v11508_v13, %v8020_v1  ;;  %v8030_v46 = vmul.f32 %v11510_v7, %v8029_v2 }
 0x5f1   :  { %v11512_v47 = vpop.eup %11511  ;;  %v8055_v61 = vmul.f32 %v8024_v21, %v8007_v58  ;;  %v8014_v17 = vadd.f32 1e-05, %v8006_v62 }
 0x5f2   :  { %v8036_v35 = vmul.f32 %v11512_v47, %v8013_v14  ;;  %v8034_v51 = vsel %vm8033_vm2, %v11510_v7, %v8030_v46  ;;  %v8091_v25 = vpop.permute.xlu2 %8090  ;;  %vm8042_vm3 = vweird.f32 %v11512_v47 }
 0x5f3   :  { %v8079_v52 = vmul.f32 %v8062_v10, %v8055_v61  ;;  %11513 = vrsqrt.f32 %v8014_v17  ;;  %v8056_v36 = vmul.f32 %v8034_v51, %v8008_v50  ;;  %v11516_v10 = vld [vmem:[%s12203_s0 + $0x8] sm:$0xff]  ;;  %vm8043_vm5 = vmor %vm8041_vm4, %vm8042_vm3  ;;  %vm8051_vm7 = vweird.f32 %v8014_v17 }
 0x5f4   :  { %v8037_v8 = vmul.f32 %v11512_v47, %v8036_v35 }
 0x5f5   :  { %v8103_v23 = vadd.f32 %v12164_v43, %v8079_v52  ;;  %v8080_v44 = vmul.f32 %v12166_v34, %v8056_v36  ;;  %v8009_v34 = vsub.f32 %v12143_v48, %v12170_v6  ;;  %v11517_v48 = vld [vmem:[%s12203_s0 + $0x10] sm:$0xff] }
 0x5f6   :  { %v8038_v55 = vmul.f32 0.5, %v8037_v8 }
 0x5f7   :  { %v8107_v20 = vadd.f32 %v11515_v16, %v8103_v23  ;;  %v8104_v24 = vadd.f32 %v8091_v25, %v8080_v44 }
 0x5f8   :  { %v8039_v41 = vsub.f32 1.5, %v8038_v55 }
 0x5f9   :  { %v11514_v60 = vpop.eup %11513  ;;  %v8111_v19 = vmax.f32 %v8107_v20, 0.0  ;;  %v8108_v5 = vadd.f32 %v11516_v10, %v8104_v24 }
 0x5fa   :  { %v8046_v43 = vmul.f32 %v11514_v60, %v8014_v17  ;;  %v8040_v3 = vmul.f32 %v11512_v47, %v8039_v41  ;;  %v8096_v22 = vpop.permute.xlu1 %8095  ;;  %vm8052_vm6 = vweird.f32 %v11514_v60 }
 0x5fb   :  { %8115 = vst [vmem:[#allocation9] sm:$0xff] %v8111_v19  ;;  %v8112_v32 = vmax.f32 %v8108_v5, 0.0  ;;  %vm8053_vm8 = vmor %vm8051_vm7, %vm8052_vm6 }
 0x5fc   :  { %v8047_v31 = vmul.f32 %v11514_v60, %v8046_v43  ;;  %v8044_v37 = vsel %vm8043_vm5, %v11512_v47, %v8040_v3 }
 0x5fd   :  { %8116 = vst [vmem:[#allocation9 + $0x8] sm:$0xff] %v8112_v32  ;;  %v8057_v39 = vmul.f32 %v8044_v37, %v8009_v34  ;;  %v8101_v49 = vpop.permute.xlu0 %8100 }
 0x5fe   :  { %v8048_v26 = vmul.f32 0.5, %v8047_v31 }
 0x5ff   :  { %v8081_v30 = vmul.f32 %v12162_v27, %v8057_v39 }
 0x600   :  { %v8049_v11 = vsub.f32 1.5, %v8048_v26 }
 0x601   :  { %v8105_v12 = vadd.f32 %v8096_v22, %v8081_v30 }
 0x602   :  { %v8050_v0 = vmul.f32 %v11514_v60, %v8049_v11 }
 0x603   :  { %v8109_v6 = vadd.f32 %v11517_v48, %v8105_v12 }
 0x604   :  { %v8054_v13 = vsel %vm8053_vm8, %v11514_v60, %v8050_v0 }
 0x605   :  { %v8113_v29 = vmax.f32 %v8109_v6, 0.0  ;;  %v8058_v4 = vmul.f32 %v8054_v13, %v8010_v63 }
 0x607   :  { %8117 = vst [vmem:[#allocation9 + $0x10] sm:$0xff] %v8113_v29  ;;  %v8082_v27 = vmul.f32 %v12168_v59, %v8058_v4 }
 0x609   :  { %v8106_v7 = vadd.f32 %v8101_v49, %v8082_v27 }
 0x60b   :  { %v8110_v33 = vadd.f32 %v11518_v42, %v8106_v7 }
 0x60d   :  { %v8114_v40 = vmax.f32 %v8110_v33, 0.0 }
 0x60f   :  { %8118 = vst [vmem:[#allocation9 + $0x18] sm:$0xff] %v8114_v40 }
 0x610   :  { %8131 = dma.vmem_to_hbm [thread:$0]  %s8124_s15, 512, %s8126_s18, [#allocation5], %s11628_s20, %s11628_s20, %s11629_s1  }
 0x611   :  { %11619 = dma.done.wait [#allocation5], 512  }
 0x612   :  { %11620 = vsyncadd [#allocation5], 4294966784 }
 0x613   :  { %8136 = vsyncpa [#allocation4], 1 }
 0x614   :  { %8137 = vsyncpa [#allocation7], 1 }
 0x615   :  { %8138 = vsyncpa [#allocation5], 1 }

</bundles_post_ra>
